<compile_context>
chip_gen: v7x
topology: tpu7x:2x2x1
jax: 0.10.0
libtpu: 0.0.40
codegen_flags: <defaults>
</compile_context>

<pallas_src>
import functools

import numpy as np
import jax
import jax.numpy as jnp
from jax.experimental import pallas as pl
from jax.experimental.pallas import tpu as pltpu

# ----------------------------- hyper-parameters (small) -----------------------------
D_SOURCE     = 6
D_TARGET     = 5
NUM_FLAGS    = 4                    # raw target feature dim = D_TARGET + NUM_FLAGS = 9
D_RAW        = D_TARGET + NUM_FLAGS
D_ENC        = 10                   # d_input_Enc
D_DEC        = 10                   # d_input_Dec
D_ATT        = 10
NUM_HEADS    = 2
D_HEAD       = D_ATT // NUM_HEADS
NUM_ENCODERS = 3
NUM_DECODERS = 3
TARGET_LEN   = 16                   # max target length (padded to this)
LN_EPS       = 1e-5
NEG_INF      = -1e30
OUT_LANES    = 128                  # lane-dense output slab width


# ----------------------------- the fused forward kernel -----------------------------

def _forward_kernel(src_ref, trg_ref, w_ref, h_ref, c_ref, out_ref, *, wl, hl, cl):
    """One batch element of the full forward pass, everything VMEM-resident.

    src_ref: [S_src, D_SOURCE]          trg_ref: [TARGET_LEN, D_RAW]
    w_ref  : packed narrow weights      h_ref  : packed fused prediction heads
    c_ref  : packed attention-structure constants
    out_ref: [1, OUT_LANES]  (physic | flags | action | zero padding)
    """
    f32 = jnp.float32
    scale = 1.0 / (D_HEAD ** 0.5)

    def _get(ref, layout, name):
        off, r, c = layout[name]                 # static python ints -> static slice
        return ref[off:off + r, 0:c]

    W = functools.partial(_get, w_ref, wl)       # narrow weights
    Hd = functools.partial(_get, h_ref, hl)      # fused head weights
    C = functools.partial(_get, c_ref, cl)       # structure constants

    def dot(a, b):
        return jnp.dot(a, b, preferred_element_type=f32)

    def dot_nt(a, b):                            # a @ b.T
        return jax.lax.dot_general(a, b, (((1,), (1,)), ((), ())),
                                   preferred_element_type=f32)

    # ---- constants: loaded once, reused across every layer / head ----
    e_src, m_src, g_src = C("Esrc"), C("Msrc"), C("Gsrc")
    e_trg, m_trg, g_trg = C("Etrg"), C("Mtrg"), C("Gtrg")
    causal_bias = C("causal")                    # [T, H*T], 0 / -1e30
    ones_d = C("onesd")                          # [D_DEC, 1]
    sum_t = C("sumt")                            # [1, T]

    def lin(x, name, relu=False):
        y = dot(x, W(name + ".w")) + W(name + ".b")
        return jnp.maximum(y, 0.0) if relu else y

    def layernorm(x, name):
        # Moments via MXU dots (keeps the 2 XLU slots free for the softmax maxes).
        inv_d = 1.0 / x.shape[-1]
        mu = dot(x, ones_d) * inv_d
        ex2 = dot(x * x, ones_d) * inv_d
        var = ex2 - mu * mu
        return ((x - mu) * jax.lax.rsqrt(var + LN_EPS) * W(name + ".g")
                + W(name + ".b"))

    def attention(q, kv_big, pk, pv, po, hmask, gseg, bias=None):
        # q: [Sq, H*Dh]; kv_big: [H*Sk, d_model] (K/V source rows replicated per head).
        kb = (dot(kv_big, W(pk + ".w")) + W(pk + ".b")) * hmask     # [H*Sk, H*Dh]
        vb = (dot(kv_big, W(pv + ".w")) + W(pv + ".b")) * hmask
        s = dot_nt(q, kb) * scale                                   # [Sq, H*Sk]
        if bias is not None:
            s = s + bias
        m = jnp.max(s, axis=-1, keepdims=True)                      # shared row max (stable)
        e = jnp.exp(s - m)
        denom = dot(e, gseg)              # per-head softmax denominator on the MXU
        p = e * pl.reciprocal(denom, approx=True)   # ~1e-3 rel err; use approx=False for parity
        o = dot(p, vb)                    # heads re-merged into columns by vb's head mask
        return dot(o, W(po + ".w")) + W(po + ".b")

    def encoder_layer(i, x):
        p = f"e{i}"
        xbig = dot(e_src, x)                                        # [H*S_src, D_ENC]
        a = attention(lin(x, p + ".q"), xbig, p + ".k", p + ".v", p + ".o",
                      m_src, g_src)
        x = layernorm(x + a, p + ".ln1")
        f = lin(lin(x, p + ".f1", relu=True), p + ".f2")
        return layernorm(x + f, p + ".ln2")

    def decoder_layer(i, t, src_big):
        p = f"d{i}"
        tbig = dot(e_trg, t)                                        # [H*T, D_DEC]
        a = attention(lin(t, p + ".sq"), tbig, p + ".sk", p + ".sv", p + ".so",
                      m_trg, g_trg, bias=causal_bias)
        x = layernorm(t + a, p + ".ln1")
        c = attention(lin(x, p + ".cq"), src_big, p + ".ck", p + ".cv", p + ".co",
                      m_src, g_src)
        x = layernorm(x + c, p + ".ln2")
        f = lin(lin(x, p + ".f1", relu=True), p + ".f2")
        return layernorm(x + f, p + ".ln3")

    # ------------------------------ forward body ------------------------------
    src = lin(lin(src_ref[...], "semb0", relu=True), "semb1")       # [S_src, D_ENC]
    trg = lin(lin(trg_ref[...], "temb0", relu=True), "temb1")       # [T, D_DEC]

    for i in range(NUM_ENCODERS):
        src = encoder_layer(i, src)
    src_big = dot(e_src, src)             # shared by all decoder cross-attentions
    for i in range(NUM_DECODERS):
        trg = decoder_layer(i, trg, src_big)

    y = dot(sum_t, trg)                   # [1, D_DEC] seq-sum on the MXU

    # fused prediction heads (block-diagonal weights built at pack time)
    h = jnp.maximum(dot(y, Hd("h1.w")) + Hd("h1.b"), 0.0)           # [1, 80]
    h = jnp.maximum(dot(h, Hd("h2.w")) + Hd("h2.b"), 0.0)           # [1, 48]
    h = dot(h, Hd("h3.w")) + Hd("h3.b")                             # [1, 21]
    col = jax.lax.broadcasted_iota(jnp.int32, h.shape, 1)
    h = jnp.where(col < 16, jnp.maximum(h, 0.0), h)  # ReLU only on phys hidden (cols 0:16)
    out = dot(h, Hd("h4.w")) + Hd("h4.b")                           # [1, 128] lane-dense
    out_ref[...] = out.astype(out_ref.dtype)


# ----------------------------- host-side packing helpers -----------------------------

def _round8(n):
    return (n + 7) // 8 * 8


def _pack(named):
    """Pack {name: 2-D np.float32} into one [R, C] buffer at 8-aligned row offsets."""
    width = max(a.shape[1] for a in named.values())
    layout, rows = {}, 0
    for name, a in named.items():
        layout[name] = (rows, a.shape[0], a.shape[1])
        rows += _round8(a.shape[0])
    buf = np.zeros((max(_round8(rows), 8), width), np.float32)
    for name, (off, r, c) in layout.items():
        buf[off:off + r, :c] = named[name]
    return jnp.asarray(buf), layout


def _attn_consts(seq_len):
    """Expansion / head-mask / segment matrices for block-diagonal multi-head attention."""
    H, Dh = NUM_HEADS, D_HEAD
    hs = H * seq_len
    r = np.arange(hs)[:, None]
    expand = (r % seq_len == np.arange(seq_len)[None, :]).astype(np.float32)   # [H*Sk, Sk]
    hmask = ((r // seq_len) == (np.arange(H * Dh)[None, :] // Dh)).astype(np.float32)
    gseg = ((r // seq_len) == (np.arange(hs)[None, :] // seq_len)).astype(np.float32)
    return expand, hmask, gseg


def _const_buffer(s_src):
    e_s, m_s, g_s = _attn_consts(s_src)
    e_t, m_t, g_t = _attn_consts(TARGET_LEN)
    qi = np.arange(TARGET_LEN)[:, None]
    kj = np.arange(NUM_HEADS * TARGET_LEN)[None, :] % TARGET_LEN
    causal = np.where(kj <= qi, 0.0, NEG_INF).astype(np.float32)    # [T, H*T]
    consts = {
        "Esrc": e_s, "Msrc": m_s, "Gsrc": g_s,
        "Etrg": e_t, "Mtrg": m_t, "Gtrg": g_t,
        "causal": causal,
        "onesd": np.ones((D_DEC, 1), np.float32),
        "sumt": np.ones((1, TARGET_LEN), np.float32),
    }
    return _pack(consts)


def _blockdiag(mats):
    r = sum(m.shape[0] for m in mats)
    c = sum(m.shape[1] for m in mats)
    out = np.zeros((r, c), np.float32)
    ro = co = 0
    for m in mats:
        out[ro:ro + m.shape[0], co:co + m.shape[1]] = m
        ro += m.shape[0]
        co += m.shape[1]
    return out


def _fuse_heads(phys, flags, action):
    """Fuse the 3 prediction FFNs (depths 4/3/3) into 4 block-diagonal matmuls.

    Layer 4 passes flags/action through unchanged (identity) and pads the output
    to OUT_LANES so the kernel's final store is a single unmasked 128-lane write.
    Output columns: 0:5 physic, 5:9 flags, 9 action, rest zero.
    """
    pw, pb = zip(*phys)
    fw, fb = zip(*flags)
    aw, ab = zip(*action)
    w1 = np.concatenate([pw[0], fw[0], aw[0]], axis=1)              # [10, 80]
    b1 = np.concatenate([pb[0], fb[0], ab[0]], axis=1)
    w2 = _blockdiag([pw[1], fw[1], aw[1]])                          # [80, 48]
    b2 = np.concatenate([pb[1], fb[1], ab[1]], axis=1)
    w3 = _blockdiag([pw[2], fw[2], aw[2]])                          # [48, 21]
    b3 = np.concatenate([pb[2], fb[2], ab[2]], axis=1)
    w4 = np.zeros((w3.shape[1], OUT_LANES), np.float32)             # [21, 128]
    w4[0:16, 0:D_TARGET] = pw[3]
    w4[16:16 + NUM_FLAGS, D_TARGET:D_TARGET + NUM_FLAGS] = np.eye(NUM_FLAGS, dtype=np.float32)
    w4[16 + NUM_FLAGS, D_TARGET + NUM_FLAGS] = 1.0
    b4 = np.zeros((1, OUT_LANES), np.float32)
    b4[0, 0:D_TARGET] = pb[3]
    return {"h1.w": w1, "h1.b": b1, "h2.w": w2, "h2.b": b2,
            "h3.w": w3, "h3.b": b3, "h4.w": w4, "h4.b": b4}


# ----------------------------- model init (deterministic) -----------------------------

def build_model(seed=0):
    keys = iter(jax.random.split(jax.random.PRNGKey(seed), 256))

    def linear(d_in, d_out):
        k1, k2 = jax.random.split(next(keys))
        bound = 1.0 / (d_in ** 0.5)
        w = np.asarray(jax.random.uniform(k1, (d_in, d_out), jnp.float32, -bound, bound))
        b = np.asarray(jax.random.uniform(k2, (1, d_out), jnp.float32, -bound, bound))
        return w, b

    narrow = {}

    def add_lin(name, d_in, d_out):
        narrow[name + ".w"], narrow[name + ".b"] = linear(d_in, d_out)

    def add_ln(name, d):
        narrow[name + ".g"] = np.ones((1, d), np.float32)
        narrow[name + ".b"] = np.zeros((1, d), np.float32)

    add_lin("semb0", D_SOURCE, 16)
    add_lin("semb1", 16, D_ENC)
    add_lin("temb0", D_RAW, 16)
    add_lin("temb1", 16, D_DEC)
    for i in range(NUM_ENCODERS):
        p = f"e{i}"
        for n in ("q", "k", "v"):
            add_lin(f"{p}.{n}", D_ENC, D_ATT)
        add_lin(f"{p}.o", D_ATT, D_ENC)
        add_ln(f"{p}.ln1", D_ENC)
        add_lin(f"{p}.f1", D_ENC, 16)
        add_lin(f"{p}.f2", 16, D_ENC)
        add_ln(f"{p}.ln2", D_ENC)
    for i in range(NUM_DECODERS):
        p = f"d{i}"
        for n in ("sq", "sk", "sv"):
            add_lin(f"{p}.{n}", D_DEC, D_ATT)
        add_lin(f"{p}.so", D_ATT, D_DEC)
        add_ln(f"{p}.ln1", D_DEC)
        add_lin(f"{p}.cq", D_DEC, D_ATT)
        for n in ("ck", "cv"):
            add_lin(f"{p}.{n}", D_ENC, D_ATT)
        add_lin(f"{p}.co", D_ATT, D_DEC)
        add_ln(f"{p}.ln2", D_DEC)
        add_lin(f"{p}.f1", D_DEC, 16)
        add_lin(f"{p}.f2", 16, D_DEC)
        add_ln(f"{p}.ln3", D_DEC)

    def ff(d_in, widths, d_out):
        dims = [d_in] + list(widths) + [d_out]
        return [linear(dims[i], dims[i + 1]) for i in range(len(dims) - 1)]

    phys = ff(D_DEC, [16, 32, 16], D_TARGET)
    flags = ff(D_DEC, [32, 8], NUM_FLAGS)
    action = ff(D_DEC, [32, 8], 1)
    wide = _fuse_heads(phys, flags, action)

    target_start = np.asarray(jax.random.normal(next(keys), (1, D_RAW), jnp.float32))

    wbuf, wl = _pack(narrow)
    hbuf, hl = _pack(wide)
    return dict(wbuf=wbuf, wl=wl, hbuf=hbuf, hl=hl,
                target_start=jnp.asarray(target_start))


# ----------------------------- wrapper around the single pallas_call -----------------------------

def forward(model, source, target, ended=None):
    B, tgt_len, d_raw = target.shape
    s_src = source.shape[1]
    tgt_len += 1
    if TARGET_LEN - tgt_len <= 0:
        raise ValueError("max len in the target reached")

    start = jnp.broadcast_to(model["target_start"], (B, 1, d_raw))
    trg = jnp.concatenate([start, target.astype(jnp.float32)], axis=1)
    trg = jnp.pad(trg, ((0, 0), (0, TARGET_LEN - tgt_len), (0, 0)))

    # Shape-only constants (masks / expansion matrices); folded into a jit constant.
    cbuf, cl = _const_buffer(s_src)

    kernel = functools.partial(_forward_kernel, wl=model["wl"], hl=model["hl"], cl=cl)
    out = pl.pallas_call(
        kernel,
        out_shape=jax.ShapeDtypeStruct((B, 1, OUT_LANES), jnp.float32),
        grid=(B,),
        in_specs=[
            pl.BlockSpec((None, s_src, D_SOURCE), lambda b: (b, 0, 0)),
            pl.BlockSpec((None, TARGET_LEN, d_raw), lambda b: (b, 0, 0)),
            # Weight / constant buffers: constant index_map -> fetched once,
            # VMEM-resident across grid steps (3 DMAs total).
            pl.BlockSpec(model["wbuf"].shape, lambda b: (0, 0)),
            pl.BlockSpec(model["hbuf"].shape, lambda b: (0, 0)),
            pl.BlockSpec(cbuf.shape, lambda b: (0, 0)),
        ],
        out_specs=pl.BlockSpec((None, 1, OUT_LANES), lambda b: (b, 0, 0)),
        compiler_params=pltpu.CompilerParams(
            dimension_semantics=("parallel",)),      # v7x: batch across the 2 TCs
    )(source.astype(jnp.float32), trg, model["wbuf"], model["hbuf"], cbuf)

    pdw = out[:, :, :D_RAW]                          # [B, 1, D_TARGET + NUM_FLAGS]
    action = out[:, :, D_RAW:D_RAW + 1]              # [B, 1, 1]
    if ended is not None:
        pdw = pdw * (1 - ended)
        action = ended
    return pdw, action


# ----------------------------- main -----------------------------

if __name__ == "__main__":
    model = build_model(seed=0)

    key = jax.random.PRNGKey(0)
    k_src, k_trg = jax.random.split(key)
    B, S_SRC, T_TRG = 2, 12, 8
    source = jax.random.normal(k_src, (B, S_SRC, D_SOURCE), jnp.float32)
    target = jax.random.normal(k_trg, (B, T_TRG, D_RAW), jnp.float32)

    fwd = jax.jit(lambda s, t: forward(model, s, t))
    pdw, action = fwd(source, target)
    jax.block_until_ready((pdw, action))

    assert pdw.shape == (B, 1, D_RAW)
    assert action.shape == (B, 1, 1)
    assert bool(jnp.all(jnp.isfinite(pdw))) and bool(jnp.all(jnp.isfinite(action)))
    print("KERNEL_OK")
</pallas_src>

<mosaic_0001>
module attributes {stable_mosaic.version = 11 : i64} {
  func.func @_forward_kernel(%arg0: i32, %arg1: memref<1x12x6xf32, #tpu.memory_space<vmem>>, %arg2: memref<1x16x9xf32, #tpu.memory_space<vmem>>, %arg3: memref<1480x16xf32, #tpu.memory_space<vmem>>, %arg4: memref<200x128xf32, #tpu.memory_space<vmem>>, %arg5: memref<208x32xf32, #tpu.memory_space<vmem>>, %arg6: memref<1x1x128xf32, #tpu.memory_space<vmem>>) attributes {dimension_semantics = [#tpu.dimension_semantics<parallel>], iteration_bounds = array<i64: 2>, scalar_prefetch = 0 : i64, scratch_operands = 0 : i64, tpu.core_type = #tpu.core_type<tc>, window_params = [{transform_indices = @transform_0, window_bounds = array<i64: 1, 12, 6>}, {transform_indices = @transform_1, window_bounds = array<i64: 1, 16, 9>}, {pipeline_mode = #tpu.pipeline_mode<synchronous>, transform_indices = @transform_2, window_bounds = array<i64: 1480, 16>}, {pipeline_mode = #tpu.pipeline_mode<synchronous>, transform_indices = @transform_3, window_bounds = array<i64: 200, 128>}, {pipeline_mode = #tpu.pipeline_mode<synchronous>, transform_indices = @transform_4, window_bounds = array<i64: 208, 32>}, {transform_indices = @transform_5, window_bounds = array<i64: 1, 1, 128>}]} {
    %c0 = arith.constant 0 : index
    %c0_0 = arith.constant 0 : index
    %0 = vector.load %arg5[%c0, %c0_0] : memref<208x32xf32, #tpu.memory_space<vmem>>, vector<24x12xf32>
    %c24 = arith.constant 24 : index
    %c0_1 = arith.constant 0 : index
    %1 = vector.load %arg5[%c24, %c0_1] : memref<208x32xf32, #tpu.memory_space<vmem>>, vector<24x10xf32>
    %c48 = arith.constant 48 : index
    %c0_2 = arith.constant 0 : index
    %2 = vector.load %arg5[%c48, %c0_2] : memref<208x32xf32, #tpu.memory_space<vmem>>, vector<24x24xf32>
    %c72 = arith.constant 72 : index
    %c0_3 = arith.constant 0 : index
    %3 = vector.load %arg5[%c72, %c0_3] : memref<208x32xf32, #tpu.memory_space<vmem>>, vector<32x16xf32>
    %c104 = arith.constant 104 : index
    %c0_4 = arith.constant 0 : index
    %4 = vector.load %arg5[%c104, %c0_4] : memref<208x32xf32, #tpu.memory_space<vmem>>, vector<32x10xf32>
    %c136 = arith.constant 136 : index
    %c0_5 = arith.constant 0 : index
    %5 = vector.load %arg5[%c136, %c0_5] : memref<208x32xf32, #tpu.memory_space<vmem>>, vector<32x32xf32>
    %c168 = arith.constant 168 : index
    %c0_6 = arith.constant 0 : index
    %6 = vector.load %arg5[%c168, %c0_6] : memref<208x32xf32, #tpu.memory_space<vmem>>, vector<16x32xf32>
    %c184 = arith.constant 184 : index
    %c0_7 = arith.constant 0 : index
    %7 = vector.load %arg5[%c184, %c0_7] : memref<208x32xf32, #tpu.memory_space<vmem>>, vector<10x1xf32>
    %c200 = arith.constant 200 : index
    %c0_8 = arith.constant 0 : index
    %8 = vector.load %arg5[%c200, %c0_8] : memref<208x32xf32, #tpu.memory_space<vmem>>, vector<1x16xf32>
    %c0_9 = arith.constant 0 : index
    %c0_10 = arith.constant 0 : index
    %c0_11 = arith.constant 0 : index
    %9 = vector.load %arg1[%c0_9, %c0_10, %c0_11] : memref<1x12x6xf32, #tpu.memory_space<vmem>>, vector<1x12x6xf32>
    %10 = vector.shape_cast %9 : vector<1x12x6xf32> to vector<12x6xf32>
    %c0_12 = arith.constant 0 : index
    %c0_13 = arith.constant 0 : index
    %11 = vector.load %arg3[%c0_12, %c0_13] : memref<1480x16xf32, #tpu.memory_space<vmem>>, vector<6x16xf32>
    %cst = arith.constant dense<0.000000e+00> : vector<12x16xf32>
    %12 = tpu.matmul %10, %11, %cst {dimension_numbers = #tpu.dot_dimension_numbers<[1], [0], [0], [1], [0, 0, 1, 1], [], []>} : vector<12x6xf32>, vector<6x16xf32>, vector<12x16xf32> -> vector<12x16xf32>
    %c8 = arith.constant 8 : index
    %c0_14 = arith.constant 0 : index
    %13 = vector.load %arg3[%c8, %c0_14] : memref<1480x16xf32, #tpu.memory_space<vmem>>, vector<1x16xf32>
    %14 = vector.broadcast %13 : vector<1x16xf32> to vector<12x16xf32>
    %15 = arith.addf %12, %14 : vector<12x16xf32>
    %cst_15 = arith.constant 0.000000e+00 : f32
    %16 = vector.broadcast %cst_15 : f32 to vector<12x16xf32>
    %17 = arith.maximumf %15, %16 : vector<12x16xf32>
    %c16 = arith.constant 16 : index
    %c0_16 = arith.constant 0 : index
    %18 = vector.load %arg3[%c16, %c0_16] : memref<1480x16xf32, #tpu.memory_space<vmem>>, vector<16x10xf32>
    %cst_17 = arith.constant dense<0.000000e+00> : vector<12x10xf32>
    %19 = tpu.matmul %17, %18, %cst_17 {dimension_numbers = #tpu.dot_dimension_numbers<[1], [0], [0], [1], [0, 0, 1, 1], [], []>} : vector<12x16xf32>, vector<16x10xf32>, vector<12x10xf32> -> vector<12x10xf32>
    %c32 = arith.constant 32 : index
    %c0_18 = arith.constant 0 : index
    %20 = vector.load %arg3[%c32, %c0_18] : memref<1480x16xf32, #tpu.memory_space<vmem>>, vector<1x10xf32>
    %21 = vector.broadcast %20 : vector<1x10xf32> to vector<12x10xf32>
    %22 = arith.addf %19, %21 : vector<12x10xf32>
    %c0_19 = arith.constant 0 : index
    %c0_20 = arith.constant 0 : index
    %c0_21 = arith.constant 0 : index
    %23 = vector.load %arg2[%c0_19, %c0_20, %c0_21] : memref<1x16x9xf32, #tpu.memory_space<vmem>>, vector<1x16x9xf32>
    %24 = vector.shape_cast %23 : vector<1x16x9xf32> to vector<16x9xf32>
    %c40 = arith.constant 40 : index
    %c0_22 = arith.constant 0 : index
    %25 = vector.load %arg3[%c40, %c0_22] : memref<1480x16xf32, #tpu.memory_space<vmem>>, vector<9x16xf32>
    %cst_23 = arith.constant dense<0.000000e+00> : vector<16x16xf32>
    %26 = tpu.matmul %24, %25, %cst_23 {dimension_numbers = #tpu.dot_dimension_numbers<[1], [0], [0], [1], [0, 0, 1, 1], [], []>} : vector<16x9xf32>, vector<9x16xf32>, vector<16x16xf32> -> vector<16x16xf32>
    %c56 = arith.constant 56 : index
    %c0_24 = arith.constant 0 : index
    %27 = vector.load %arg3[%c56, %c0_24] : memref<1480x16xf32, #tpu.memory_space<vmem>>, vector<1x16xf32>
    %28 = vector.broadcast %27 : vector<1x16xf32> to vector<16x16xf32>
    %29 = arith.addf %26, %28 : vector<16x16xf32>
    %cst_25 = arith.constant 0.000000e+00 : f32
    %30 = vector.broadcast %cst_25 : f32 to vector<16x16xf32>
    %31 = arith.maximumf %29, %30 : vector<16x16xf32>
    %c64 = arith.constant 64 : index
    %c0_26 = arith.constant 0 : index
    %32 = vector.load %arg3[%c64, %c0_26] : memref<1480x16xf32, #tpu.memory_space<vmem>>, vector<16x10xf32>
    %cst_27 = arith.constant dense<0.000000e+00> : vector<16x10xf32>
    %33 = tpu.matmul %31, %32, %cst_27 {dimension_numbers = #tpu.dot_dimension_numbers<[1], [0], [0], [1], [0, 0, 1, 1], [], []>} : vector<16x16xf32>, vector<16x10xf32>, vector<16x10xf32> -> vector<16x10xf32>
    %c80 = arith.constant 80 : index
    %c0_28 = arith.constant 0 : index
    %34 = vector.load %arg3[%c80, %c0_28] : memref<1480x16xf32, #tpu.memory_space<vmem>>, vector<1x10xf32>
    %35 = vector.broadcast %34 : vector<1x10xf32> to vector<16x10xf32>
    %36 = arith.addf %33, %35 : vector<16x10xf32>
    %cst_29 = arith.constant dense<0.000000e+00> : vector<24x10xf32>
    %37 = tpu.matmul %0, %22, %cst_29 {dimension_numbers = #tpu.dot_dimension_numbers<[1], [0], [0], [1], [0, 0, 1, 1], [], []>} : vector<24x12xf32>, vector<12x10xf32>, vector<24x10xf32> -> vector<24x10xf32>
    %c88 = arith.constant 88 : index
    %c0_30 = arith.constant 0 : index
    %38 = vector.load %arg3[%c88, %c0_30] : memref<1480x16xf32, #tpu.memory_space<vmem>>, vector<10x10xf32>
    %cst_31 = arith.constant dense<0.000000e+00> : vector<12x10xf32>
    %39 = tpu.matmul %22, %38, %cst_31 {dimension_numbers = #tpu.dot_dimension_numbers<[1], [0], [0], [1], [0, 0, 1, 1], [], []>} : vector<12x10xf32>, vector<10x10xf32>, vector<12x10xf32> -> vector<12x10xf32>
    %c104_32 = arith.constant 104 : index
    %c0_33 = arith.constant 0 : index
    %40 = vector.load %arg3[%c104_32, %c0_33] : memref<1480x16xf32, #tpu.memory_space<vmem>>, vector<1x10xf32>
    %41 = vector.broadcast %40 : vector<1x10xf32> to vector<12x10xf32>
    %42 = arith.addf %39, %41 : vector<12x10xf32>
    %c112 = arith.constant 112 : index
    %c0_34 = arith.constant 0 : index
    %43 = vector.load %arg3[%c112, %c0_34] : memref<1480x16xf32, #tpu.memory_space<vmem>>, vector<10x10xf32>
    %cst_35 = arith.constant dense<0.000000e+00> : vector<24x10xf32>
    %44 = tpu.matmul %37, %43, %cst_35 {dimension_numbers = #tpu.dot_dimension_numbers<[1], [0], [0], [1], [0, 0, 1, 1], [], []>} : vector<24x10xf32>, vector<10x10xf32>, vector<24x10xf32> -> vector<24x10xf32>
    %c128 = arith.constant 128 : index
    %c0_36 = arith.constant 0 : index
    %45 = vector.load %arg3[%c128, %c0_36] : memref<1480x16xf32, #tpu.memory_space<vmem>>, vector<1x10xf32>
    %46 = vector.broadcast %45 : vector<1x10xf32> to vector<24x10xf32>
    %47 = arith.addf %44, %46 : vector<24x10xf32>
    %48 = arith.mulf %47, %1 : vector<24x10xf32>
    %c136_37 = arith.constant 136 : index
    %c0_38 = arith.constant 0 : index
    %49 = vector.load %arg3[%c136_37, %c0_38] : memref<1480x16xf32, #tpu.memory_space<vmem>>, vector<10x10xf32>
    %cst_39 = arith.constant dense<0.000000e+00> : vector<24x10xf32>
    %50 = tpu.matmul %37, %49, %cst_39 {dimension_numbers = #tpu.dot_dimension_numbers<[1], [0], [0], [1], [0, 0, 1, 1], [], []>} : vector<24x10xf32>, vector<10x10xf32>, vector<24x10xf32> -> vector<24x10xf32>
    %c152 = arith.constant 152 : index
    %c0_40 = arith.constant 0 : index
    %51 = vector.load %arg3[%c152, %c0_40] : memref<1480x16xf32, #tpu.memory_space<vmem>>, vector<1x10xf32>
    %52 = vector.broadcast %51 : vector<1x10xf32> to vector<24x10xf32>
    %53 = arith.addf %50, %52 : vector<24x10xf32>
    %54 = arith.mulf %53, %1 : vector<24x10xf32>
    %cst_41 = arith.constant dense<0.000000e+00> : vector<12x24xf32>
    %55 = tpu.matmul %42, %48, %cst_41 {dimension_numbers = #tpu.dot_dimension_numbers<[1], [1], [0], [0], [0, 0, 1, 0], [], []>} : vector<12x10xf32>, vector<24x10xf32>, vector<12x24xf32> -> vector<12x24xf32>
    %cst_42 = arith.constant 0.44721359 : f32
    %56 = vector.broadcast %cst_42 : f32 to vector<12x24xf32>
    %57 = arith.mulf %55, %56 : vector<12x24xf32>
    %cst_43 = arith.constant dense<0xFF800000> : vector<12xf32>
    %58 = vector.multi_reduction <maximumf>, %57, %cst_43 [1] : vector<12x24xf32> to vector<12xf32>
    %59 = vector.shape_cast %58 : vector<12xf32> to vector<12x1xf32>
    %60 = vector.broadcast %59 : vector<12x1xf32> to vector<12x24xf32>
    %61 = arith.subf %57, %60 : vector<12x24xf32>
    %62 = math.exp %61 : vector<12x24xf32>
    %cst_44 = arith.constant dense<0.000000e+00> : vector<12x24xf32>
    %63 = tpu.matmul %62, %2, %cst_44 {dimension_numbers = #tpu.dot_dimension_numbers<[1], [0], [0], [1], [0, 0, 1, 1], [], []>} : vector<12x24xf32>, vector<24x24xf32>, vector<12x24xf32> -> vector<12x24xf32>
    %64 = tpu.reciprocal %63 {approx = true} : vector<12x24xf32> -> vector<12x24xf32>
    %65 = arith.mulf %62, %64 : vector<12x24xf32>
    %cst_45 = arith.constant dense<0.000000e+00> : vector<12x10xf32>
    %66 = tpu.matmul %65, %54, %cst_45 {dimension_numbers = #tpu.dot_dimension_numbers<[1], [0], [0], [1], [0, 0, 1, 1], [], []>} : vector<12x24xf32>, vector<24x10xf32>, vector<12x10xf32> -> vector<12x10xf32>
    %c160 = arith.constant 160 : index
    %c0_46 = arith.constant 0 : index
    %67 = vector.load %arg3[%c160, %c0_46] : memref<1480x16xf32, #tpu.memory_space<vmem>>, vector<10x10xf32>
    %cst_47 = arith.constant dense<0.000000e+00> : vector<12x10xf32>
    %68 = tpu.matmul %66, %67, %cst_47 {dimension_numbers = #tpu.dot_dimension_numbers<[1], [0], [0], [1], [0, 0, 1, 1], [], []>} : vector<12x10xf32>, vector<10x10xf32>, vector<12x10xf32> -> vector<12x10xf32>
    %c176 = arith.constant 176 : index
    %c0_48 = arith.constant 0 : index
    %69 = vector.load %arg3[%c176, %c0_48] : memref<1480x16xf32, #tpu.memory_space<vmem>>, vector<1x10xf32>
    %70 = vector.broadcast %69 : vector<1x10xf32> to vector<12x10xf32>
    %71 = arith.addf %68, %70 : vector<12x10xf32>
    %72 = arith.addf %22, %71 : vector<12x10xf32>
    %cst_49 = arith.constant dense<0.000000e+00> : vector<12x1xf32>
    %73 = tpu.matmul %72, %7, %cst_49 {dimension_numbers = #tpu.dot_dimension_numbers<[1], [0], [0], [1], [0, 0, 1, 1], [], []>} : vector<12x10xf32>, vector<10x1xf32>, vector<12x1xf32> -> vector<12x1xf32>
    %cst_50 = arith.constant 1.000000e-01 : f32
    %74 = vector.broadcast %cst_50 : f32 to vector<12x1xf32>
    %75 = arith.mulf %73, %74 : vector<12x1xf32>
    %76 = arith.mulf %72, %72 : vector<12x10xf32>
    %cst_51 = arith.constant dense<0.000000e+00> : vector<12x1xf32>
    %77 = tpu.matmul %76, %7, %cst_51 {dimension_numbers = #tpu.dot_dimension_numbers<[1], [0], [0], [1], [0, 0, 1, 1], [], []>} : vector<12x10xf32>, vector<10x1xf32>, vector<12x1xf32> -> vector<12x1xf32>
    %cst_52 = arith.constant 1.000000e-01 : f32
    %78 = vector.broadcast %cst_52 : f32 to vector<12x1xf32>
    %79 = arith.mulf %77, %78 : vector<12x1xf32>
    %80 = arith.mulf %75, %75 : vector<12x1xf32>
    %81 = arith.subf %79, %80 : vector<12x1xf32>
    %82 = vector.broadcast %75 : vector<12x1xf32> to vector<12x10xf32>
    %83 = arith.subf %72, %82 : vector<12x10xf32>
    %cst_53 = arith.constant 9.99999974E-6 : f32
    %84 = vector.broadcast %cst_53 : f32 to vector<12x1xf32>
    %85 = arith.addf %81, %84 : vector<12x1xf32>
    %86 = math.rsqrt %85 : vector<12x1xf32>
    %87 = vector.broadcast %86 : vector<12x1xf32> to vector<12x10xf32>
    %88 = arith.mulf %83, %87 : vector<12x10xf32>
    %c184_54 = arith.constant 184 : index
    %c0_55 = arith.constant 0 : index
    %89 = vector.load %arg3[%c184_54, %c0_55] : memref<1480x16xf32, #tpu.memory_space<vmem>>, vector<1x10xf32>
    %90 = vector.broadcast %89 : vector<1x10xf32> to vector<12x10xf32>
    %91 = arith.mulf %88, %90 : vector<12x10xf32>
    %c192 = arith.constant 192 : index
    %c0_56 = arith.constant 0 : index
    %92 = vector.load %arg3[%c192, %c0_56] : memref<1480x16xf32, #tpu.memory_space<vmem>>, vector<1x10xf32>
    %93 = vector.broadcast %92 : vector<1x10xf32> to vector<12x10xf32>
    %94 = arith.addf %91, %93 : vector<12x10xf32>
    %c200_57 = arith.constant 200 : index
    %c0_58 = arith.constant 0 : index
    %95 = vector.load %arg3[%c200_57, %c0_58] : memref<1480x16xf32, #tpu.memory_space<vmem>>, vector<10x16xf32>
    %cst_59 = arith.constant dense<0.000000e+00> : vector<12x16xf32>
    %96 = tpu.matmul %94, %95, %cst_59 {dimension_numbers = #tpu.dot_dimension_numbers<[1], [0], [0], [1], [0, 0, 1, 1], [], []>} : vector<12x10xf32>, vector<10x16xf32>, vector<12x16xf32> -> vector<12x16xf32>
    %c216 = arith.constant 216 : index
    %c0_60 = arith.constant 0 : index
    %97 = vector.load %arg3[%c216, %c0_60] : memref<1480x16xf32, #tpu.memory_space<vmem>>, vector<1x16xf32>
    %98 = vector.broadcast %97 : vector<1x16xf32> to vector<12x16xf32>
    %99 = arith.addf %96, %98 : vector<12x16xf32>
    %cst_61 = arith.constant 0.000000e+00 : f32
    %100 = vector.broadcast %cst_61 : f32 to vector<12x16xf32>
    %101 = arith.maximumf %99, %100 : vector<12x16xf32>
    %c224 = arith.constant 224 : index
    %c0_62 = arith.constant 0 : index
    %102 = vector.load %arg3[%c224, %c0_62] : memref<1480x16xf32, #tpu.memory_space<vmem>>, vector<16x10xf32>
    %cst_63 = arith.constant dense<0.000000e+00> : vector<12x10xf32>
    %103 = tpu.matmul %101, %102, %cst_63 {dimension_numbers = #tpu.dot_dimension_numbers<[1], [0], [0], [1], [0, 0, 1, 1], [], []>} : vector<12x16xf32>, vector<16x10xf32>, vector<12x10xf32> -> vector<12x10xf32>
    %c240 = arith.constant 240 : index
    %c0_64 = arith.constant 0 : index
    %104 = vector.load %arg3[%c240, %c0_64] : memref<1480x16xf32, #tpu.memory_space<vmem>>, vector<1x10xf32>
    %105 = vector.broadcast %104 : vector<1x10xf32> to vector<12x10xf32>
    %106 = arith.addf %103, %105 : vector<12x10xf32>
    %107 = arith.addf %94, %106 : vector<12x10xf32>
    %cst_65 = arith.constant dense<0.000000e+00> : vector<12x1xf32>
    %108 = tpu.matmul %107, %7, %cst_65 {dimension_numbers = #tpu.dot_dimension_numbers<[1], [0], [0], [1], [0, 0, 1, 1], [], []>} : vector<12x10xf32>, vector<10x1xf32>, vector<12x1xf32> -> vector<12x1xf32>
    %cst_66 = arith.constant 1.000000e-01 : f32
    %109 = vector.broadcast %cst_66 : f32 to vector<12x1xf32>
    %110 = arith.mulf %108, %109 : vector<12x1xf32>
    %111 = arith.mulf %107, %107 : vector<12x10xf32>
    %cst_67 = arith.constant dense<0.000000e+00> : vector<12x1xf32>
    %112 = tpu.matmul %111, %7, %cst_67 {dimension_numbers = #tpu.dot_dimension_numbers<[1], [0], [0], [1], [0, 0, 1, 1], [], []>} : vector<12x10xf32>, vector<10x1xf32>, vector<12x1xf32> -> vector<12x1xf32>
    %cst_68 = arith.constant 1.000000e-01 : f32
    %113 = vector.broadcast %cst_68 : f32 to vector<12x1xf32>
    %114 = arith.mulf %112, %113 : vector<12x1xf32>
    %115 = arith.mulf %110, %110 : vector<12x1xf32>
    %116 = arith.subf %114, %115 : vector<12x1xf32>
    %117 = vector.broadcast %110 : vector<12x1xf32> to vector<12x10xf32>
    %118 = arith.subf %107, %117 : vector<12x10xf32>
    %cst_69 = arith.constant 9.99999974E-6 : f32
    %119 = vector.broadcast %cst_69 : f32 to vector<12x1xf32>
    %120 = arith.addf %116, %119 : vector<12x1xf32>
    %121 = math.rsqrt %120 : vector<12x1xf32>
    %122 = vector.broadcast %121 : vector<12x1xf32> to vector<12x10xf32>
    %123 = arith.mulf %118, %122 : vector<12x10xf32>
    %c248 = arith.constant 248 : index
    %c0_70 = arith.constant 0 : index
    %124 = vector.load %arg3[%c248, %c0_70] : memref<1480x16xf32, #tpu.memory_space<vmem>>, vector<1x10xf32>
    %125 = vector.broadcast %124 : vector<1x10xf32> to vector<12x10xf32>
    %126 = arith.mulf %123, %125 : vector<12x10xf32>
    %c256 = arith.constant 256 : index
    %c0_71 = arith.constant 0 : index
    %127 = vector.load %arg3[%c256, %c0_71] : memref<1480x16xf32, #tpu.memory_space<vmem>>, vector<1x10xf32>
    %128 = vector.broadcast %127 : vector<1x10xf32> to vector<12x10xf32>
    %129 = arith.addf %126, %128 : vector<12x10xf32>
    %cst_72 = arith.constant dense<0.000000e+00> : vector<24x10xf32>
    %130 = tpu.matmul %0, %129, %cst_72 {dimension_numbers = #tpu.dot_dimension_numbers<[1], [0], [0], [1], [0, 0, 1, 1], [], []>} : vector<24x12xf32>, vector<12x10xf32>, vector<24x10xf32> -> vector<24x10xf32>
    %c264 = arith.constant 264 : index
    %c0_73 = arith.constant 0 : index
    %131 = vector.load %arg3[%c264, %c0_73] : memref<1480x16xf32, #tpu.memory_space<vmem>>, vector<10x10xf32>
    %cst_74 = arith.constant dense<0.000000e+00> : vector<12x10xf32>
    %132 = tpu.matmul %129, %131, %cst_74 {dimension_numbers = #tpu.dot_dimension_numbers<[1], [0], [0], [1], [0, 0, 1, 1], [], []>} : vector<12x10xf32>, vector<10x10xf32>, vector<12x10xf32> -> vector<12x10xf32>
    %c280 = arith.constant 280 : index
    %c0_75 = arith.constant 0 : index
    %133 = vector.load %arg3[%c280, %c0_75] : memref<1480x16xf32, #tpu.memory_space<vmem>>, vector<1x10xf32>
    %134 = vector.broadcast %133 : vector<1x10xf32> to vector<12x10xf32>
    %135 = arith.addf %132, %134 : vector<12x10xf32>
    %c288 = arith.constant 288 : index
    %c0_76 = arith.constant 0 : index
    %136 = vector.load %arg3[%c288, %c0_76] : memref<1480x16xf32, #tpu.memory_space<vmem>>, vector<10x10xf32>
    %cst_77 = arith.constant dense<0.000000e+00> : vector<24x10xf32>
    %137 = tpu.matmul %130, %136, %cst_77 {dimension_numbers = #tpu.dot_dimension_numbers<[1], [0], [0], [1], [0, 0, 1, 1], [], []>} : vector<24x10xf32>, vector<10x10xf32>, vector<24x10xf32> -> vector<24x10xf32>
    %c304 = arith.constant 304 : index
    %c0_78 = arith.constant 0 : index
    %138 = vector.load %arg3[%c304, %c0_78] : memref<1480x16xf32, #tpu.memory_space<vmem>>, vector<1x10xf32>
    %139 = vector.broadcast %138 : vector<1x10xf32> to vector<24x10xf32>
    %140 = arith.addf %137, %139 : vector<24x10xf32>
    %141 = arith.mulf %140, %1 : vector<24x10xf32>
    %c312 = arith.constant 312 : index
    %c0_79 = arith.constant 0 : index
    %142 = vector.load %arg3[%c312, %c0_79] : memref<1480x16xf32, #tpu.memory_space<vmem>>, vector<10x10xf32>
    %cst_80 = arith.constant dense<0.000000e+00> : vector<24x10xf32>
    %143 = tpu.matmul %130, %142, %cst_80 {dimension_numbers = #tpu.dot_dimension_numbers<[1], [0], [0], [1], [0, 0, 1, 1], [], []>} : vector<24x10xf32>, vector<10x10xf32>, vector<24x10xf32> -> vector<24x10xf32>
    %c328 = arith.constant 328 : index
    %c0_81 = arith.constant 0 : index
    %144 = vector.load %arg3[%c328, %c0_81] : memref<1480x16xf32, #tpu.memory_space<vmem>>, vector<1x10xf32>
    %145 = vector.broadcast %144 : vector<1x10xf32> to vector<24x10xf32>
    %146 = arith.addf %143, %145 : vector<24x10xf32>
    %147 = arith.mulf %146, %1 : vector<24x10xf32>
    %cst_82 = arith.constant dense<0.000000e+00> : vector<12x24xf32>
    %148 = tpu.matmul %135, %141, %cst_82 {dimension_numbers = #tpu.dot_dimension_numbers<[1], [1], [0], [0], [0, 0, 1, 0], [], []>} : vector<12x10xf32>, vector<24x10xf32>, vector<12x24xf32> -> vector<12x24xf32>
    %cst_83 = arith.constant 0.44721359 : f32
    %149 = vector.broadcast %cst_83 : f32 to vector<12x24xf32>
    %150 = arith.mulf %148, %149 : vector<12x24xf32>
    %cst_84 = arith.constant dense<0xFF800000> : vector<12xf32>
    %151 = vector.multi_reduction <maximumf>, %150, %cst_84 [1] : vector<12x24xf32> to vector<12xf32>
    %152 = vector.shape_cast %151 : vector<12xf32> to vector<12x1xf32>
    %153 = vector.broadcast %152 : vector<12x1xf32> to vector<12x24xf32>
    %154 = arith.subf %150, %153 : vector<12x24xf32>
    %155 = math.exp %154 : vector<12x24xf32>
    %cst_85 = arith.constant dense<0.000000e+00> : vector<12x24xf32>
    %156 = tpu.matmul %155, %2, %cst_85 {dimension_numbers = #tpu.dot_dimension_numbers<[1], [0], [0], [1], [0, 0, 1, 1], [], []>} : vector<12x24xf32>, vector<24x24xf32>, vector<12x24xf32> -> vector<12x24xf32>
    %157 = tpu.reciprocal %156 {approx = true} : vector<12x24xf32> -> vector<12x24xf32>
    %158 = arith.mulf %155, %157 : vector<12x24xf32>
    %cst_86 = arith.constant dense<0.000000e+00> : vector<12x10xf32>
    %159 = tpu.matmul %158, %147, %cst_86 {dimension_numbers = #tpu.dot_dimension_numbers<[1], [0], [0], [1], [0, 0, 1, 1], [], []>} : vector<12x24xf32>, vector<24x10xf32>, vector<12x10xf32> -> vector<12x10xf32>
    %c336 = arith.constant 336 : index
    %c0_87 = arith.constant 0 : index
    %160 = vector.load %arg3[%c336, %c0_87] : memref<1480x16xf32, #tpu.memory_space<vmem>>, vector<10x10xf32>
    %cst_88 = arith.constant dense<0.000000e+00> : vector<12x10xf32>
    %161 = tpu.matmul %159, %160, %cst_88 {dimension_numbers = #tpu.dot_dimension_numbers<[1], [0], [0], [1], [0, 0, 1, 1], [], []>} : vector<12x10xf32>, vector<10x10xf32>, vector<12x10xf32> -> vector<12x10xf32>
    %c352 = arith.constant 352 : index
    %c0_89 = arith.constant 0 : index
    %162 = vector.load %arg3[%c352, %c0_89] : memref<1480x16xf32, #tpu.memory_space<vmem>>, vector<1x10xf32>
    %163 = vector.broadcast %162 : vector<1x10xf32> to vector<12x10xf32>
    %164 = arith.addf %161, %163 : vector<12x10xf32>
    %165 = arith.addf %129, %164 : vector<12x10xf32>
    %cst_90 = arith.constant dense<0.000000e+00> : vector<12x1xf32>
    %166 = tpu.matmul %165, %7, %cst_90 {dimension_numbers = #tpu.dot_dimension_numbers<[1], [0], [0], [1], [0, 0, 1, 1], [], []>} : vector<12x10xf32>, vector<10x1xf32>, vector<12x1xf32> -> vector<12x1xf32>
    %cst_91 = arith.constant 1.000000e-01 : f32
    %167 = vector.broadcast %cst_91 : f32 to vector<12x1xf32>
    %168 = arith.mulf %166, %167 : vector<12x1xf32>
    %169 = arith.mulf %165, %165 : vector<12x10xf32>
    %cst_92 = arith.constant dense<0.000000e+00> : vector<12x1xf32>
    %170 = tpu.matmul %169, %7, %cst_92 {dimension_numbers = #tpu.dot_dimension_numbers<[1], [0], [0], [1], [0, 0, 1, 1], [], []>} : vector<12x10xf32>, vector<10x1xf32>, vector<12x1xf32> -> vector<12x1xf32>
    %cst_93 = arith.constant 1.000000e-01 : f32
    %171 = vector.broadcast %cst_93 : f32 to vector<12x1xf32>
    %172 = arith.mulf %170, %171 : vector<12x1xf32>
    %173 = arith.mulf %168, %168 : vector<12x1xf32>
    %174 = arith.subf %172, %173 : vector<12x1xf32>
    %175 = vector.broadcast %168 : vector<12x1xf32> to vector<12x10xf32>
    %176 = arith.subf %165, %175 : vector<12x10xf32>
    %cst_94 = arith.constant 9.99999974E-6 : f32
    %177 = vector.broadcast %cst_94 : f32 to vector<12x1xf32>
    %178 = arith.addf %174, %177 : vector<12x1xf32>
    %179 = math.rsqrt %178 : vector<12x1xf32>
    %180 = vector.broadcast %179 : vector<12x1xf32> to vector<12x10xf32>
    %181 = arith.mulf %176, %180 : vector<12x10xf32>
    %c360 = arith.constant 360 : index
    %c0_95 = arith.constant 0 : index
    %182 = vector.load %arg3[%c360, %c0_95] : memref<1480x16xf32, #tpu.memory_space<vmem>>, vector<1x10xf32>
    %183 = vector.broadcast %182 : vector<1x10xf32> to vector<12x10xf32>
    %184 = arith.mulf %181, %183 : vector<12x10xf32>
    %c368 = arith.constant 368 : index
    %c0_96 = arith.constant 0 : index
    %185 = vector.load %arg3[%c368, %c0_96] : memref<1480x16xf32, #tpu.memory_space<vmem>>, vector<1x10xf32>
    %186 = vector.broadcast %185 : vector<1x10xf32> to vector<12x10xf32>
    %187 = arith.addf %184, %186 : vector<12x10xf32>
    %c376 = arith.constant 376 : index
    %c0_97 = arith.constant 0 : index
    %188 = vector.load %arg3[%c376, %c0_97] : memref<1480x16xf32, #tpu.memory_space<vmem>>, vector<10x16xf32>
    %cst_98 = arith.constant dense<0.000000e+00> : vector<12x16xf32>
    %189 = tpu.matmul %187, %188, %cst_98 {dimension_numbers = #tpu.dot_dimension_numbers<[1], [0], [0], [1], [0, 0, 1, 1], [], []>} : vector<12x10xf32>, vector<10x16xf32>, vector<12x16xf32> -> vector<12x16xf32>
    %c392 = arith.constant 392 : index
    %c0_99 = arith.constant 0 : index
    %190 = vector.load %arg3[%c392, %c0_99] : memref<1480x16xf32, #tpu.memory_space<vmem>>, vector<1x16xf32>
    %191 = vector.broadcast %190 : vector<1x16xf32> to vector<12x16xf32>
    %192 = arith.addf %189, %191 : vector<12x16xf32>
    %cst_100 = arith.constant 0.000000e+00 : f32
    %193 = vector.broadcast %cst_100 : f32 to vector<12x16xf32>
    %194 = arith.maximumf %192, %193 : vector<12x16xf32>
    %c400 = arith.constant 400 : index
    %c0_101 = arith.constant 0 : index
    %195 = vector.load %arg3[%c400, %c0_101] : memref<1480x16xf32, #tpu.memory_space<vmem>>, vector<16x10xf32>
    %cst_102 = arith.constant dense<0.000000e+00> : vector<12x10xf32>
    %196 = tpu.matmul %194, %195, %cst_102 {dimension_numbers = #tpu.dot_dimension_numbers<[1], [0], [0], [1], [0, 0, 1, 1], [], []>} : vector<12x16xf32>, vector<16x10xf32>, vector<12x10xf32> -> vector<12x10xf32>
    %c416 = arith.constant 416 : index
    %c0_103 = arith.constant 0 : index
    %197 = vector.load %arg3[%c416, %c0_103] : memref<1480x16xf32, #tpu.memory_space<vmem>>, vector<1x10xf32>
    %198 = vector.broadcast %197 : vector<1x10xf32> to vector<12x10xf32>
    %199 = arith.addf %196, %198 : vector<12x10xf32>
    %200 = arith.addf %187, %199 : vector<12x10xf32>
    %cst_104 = arith.constant dense<0.000000e+00> : vector<12x1xf32>
    %201 = tpu.matmul %200, %7, %cst_104 {dimension_numbers = #tpu.dot_dimension_numbers<[1], [0], [0], [1], [0, 0, 1, 1], [], []>} : vector<12x10xf32>, vector<10x1xf32>, vector<12x1xf32> -> vector<12x1xf32>
    %cst_105 = arith.constant 1.000000e-01 : f32
    %202 = vector.broadcast %cst_105 : f32 to vector<12x1xf32>
    %203 = arith.mulf %201, %202 : vector<12x1xf32>
    %204 = arith.mulf %200, %200 : vector<12x10xf32>
    %cst_106 = arith.constant dense<0.000000e+00> : vector<12x1xf32>
    %205 = tpu.matmul %204, %7, %cst_106 {dimension_numbers = #tpu.dot_dimension_numbers<[1], [0], [0], [1], [0, 0, 1, 1], [], []>} : vector<12x10xf32>, vector<10x1xf32>, vector<12x1xf32> -> vector<12x1xf32>
    %cst_107 = arith.constant 1.000000e-01 : f32
    %206 = vector.broadcast %cst_107 : f32 to vector<12x1xf32>
    %207 = arith.mulf %205, %206 : vector<12x1xf32>
    %208 = arith.mulf %203, %203 : vector<12x1xf32>
    %209 = arith.subf %207, %208 : vector<12x1xf32>
    %210 = vector.broadcast %203 : vector<12x1xf32> to vector<12x10xf32>
    %211 = arith.subf %200, %210 : vector<12x10xf32>
    %cst_108 = arith.constant 9.99999974E-6 : f32
    %212 = vector.broadcast %cst_108 : f32 to vector<12x1xf32>
    %213 = arith.addf %209, %212 : vector<12x1xf32>
    %214 = math.rsqrt %213 : vector<12x1xf32>
    %215 = vector.broadcast %214 : vector<12x1xf32> to vector<12x10xf32>
    %216 = arith.mulf %211, %215 : vector<12x10xf32>
    %c424 = arith.constant 424 : index
    %c0_109 = arith.constant 0 : index
    %217 = vector.load %arg3[%c424, %c0_109] : memref<1480x16xf32, #tpu.memory_space<vmem>>, vector<1x10xf32>
    %218 = vector.broadcast %217 : vector<1x10xf32> to vector<12x10xf32>
    %219 = arith.mulf %216, %218 : vector<12x10xf32>
    %c432 = arith.constant 432 : index
    %c0_110 = arith.constant 0 : index
    %220 = vector.load %arg3[%c432, %c0_110] : memref<1480x16xf32, #tpu.memory_space<vmem>>, vector<1x10xf32>
    %221 = vector.broadcast %220 : vector<1x10xf32> to vector<12x10xf32>
    %222 = arith.addf %219, %221 : vector<12x10xf32>
    %cst_111 = arith.constant dense<0.000000e+00> : vector<24x10xf32>
    %223 = tpu.matmul %0, %222, %cst_111 {dimension_numbers = #tpu.dot_dimension_numbers<[1], [0], [0], [1], [0, 0, 1, 1], [], []>} : vector<24x12xf32>, vector<12x10xf32>, vector<24x10xf32> -> vector<24x10xf32>
    %c440 = arith.constant 440 : index
    %c0_112 = arith.constant 0 : index
    %224 = vector.load %arg3[%c440, %c0_112] : memref<1480x16xf32, #tpu.memory_space<vmem>>, vector<10x10xf32>
    %cst_113 = arith.constant dense<0.000000e+00> : vector<12x10xf32>
    %225 = tpu.matmul %222, %224, %cst_113 {dimension_numbers = #tpu.dot_dimension_numbers<[1], [0], [0], [1], [0, 0, 1, 1], [], []>} : vector<12x10xf32>, vector<10x10xf32>, vector<12x10xf32> -> vector<12x10xf32>
    %c456 = arith.constant 456 : index
    %c0_114 = arith.constant 0 : index
    %226 = vector.load %arg3[%c456, %c0_114] : memref<1480x16xf32, #tpu.memory_space<vmem>>, vector<1x10xf32>
    %227 = vector.broadcast %226 : vector<1x10xf32> to vector<12x10xf32>
    %228 = arith.addf %225, %227 : vector<12x10xf32>
    %c464 = arith.constant 464 : index
    %c0_115 = arith.constant 0 : index
    %229 = vector.load %arg3[%c464, %c0_115] : memref<1480x16xf32, #tpu.memory_space<vmem>>, vector<10x10xf32>
    %cst_116 = arith.constant dense<0.000000e+00> : vector<24x10xf32>
    %230 = tpu.matmul %223, %229, %cst_116 {dimension_numbers = #tpu.dot_dimension_numbers<[1], [0], [0], [1], [0, 0, 1, 1], [], []>} : vector<24x10xf32>, vector<10x10xf32>, vector<24x10xf32> -> vector<24x10xf32>
    %c480 = arith.constant 480 : index
    %c0_117 = arith.constant 0 : index
    %231 = vector.load %arg3[%c480, %c0_117] : memref<1480x16xf32, #tpu.memory_space<vmem>>, vector<1x10xf32>
    %232 = vector.broadcast %231 : vector<1x10xf32> to vector<24x10xf32>
    %233 = arith.addf %230, %232 : vector<24x10xf32>
    %234 = arith.mulf %233, %1 : vector<24x10xf32>
    %c488 = arith.constant 488 : index
    %c0_118 = arith.constant 0 : index
    %235 = vector.load %arg3[%c488, %c0_118] : memref<1480x16xf32, #tpu.memory_space<vmem>>, vector<10x10xf32>
    %cst_119 = arith.constant dense<0.000000e+00> : vector<24x10xf32>
    %236 = tpu.matmul %223, %235, %cst_119 {dimension_numbers = #tpu.dot_dimension_numbers<[1], [0], [0], [1], [0, 0, 1, 1], [], []>} : vector<24x10xf32>, vector<10x10xf32>, vector<24x10xf32> -> vector<24x10xf32>
    %c504 = arith.constant 504 : index
    %c0_120 = arith.constant 0 : index
    %237 = vector.load %arg3[%c504, %c0_120] : memref<1480x16xf32, #tpu.memory_space<vmem>>, vector<1x10xf32>
    %238 = vector.broadcast %237 : vector<1x10xf32> to vector<24x10xf32>
    %239 = arith.addf %236, %238 : vector<24x10xf32>
    %240 = arith.mulf %239, %1 : vector<24x10xf32>
    %cst_121 = arith.constant dense<0.000000e+00> : vector<12x24xf32>
    %241 = tpu.matmul %228, %234, %cst_121 {dimension_numbers = #tpu.dot_dimension_numbers<[1], [1], [0], [0], [0, 0, 1, 0], [], []>} : vector<12x10xf32>, vector<24x10xf32>, vector<12x24xf32> -> vector<12x24xf32>
    %cst_122 = arith.constant 0.44721359 : f32
    %242 = vector.broadcast %cst_122 : f32 to vector<12x24xf32>
    %243 = arith.mulf %241, %242 : vector<12x24xf32>
    %cst_123 = arith.constant dense<0xFF800000> : vector<12xf32>
    %244 = vector.multi_reduction <maximumf>, %243, %cst_123 [1] : vector<12x24xf32> to vector<12xf32>
    %245 = vector.shape_cast %244 : vector<12xf32> to vector<12x1xf32>
    %246 = vector.broadcast %245 : vector<12x1xf32> to vector<12x24xf32>
    %247 = arith.subf %243, %246 : vector<12x24xf32>
    %248 = math.exp %247 : vector<12x24xf32>
    %cst_124 = arith.constant dense<0.000000e+00> : vector<12x24xf32>
    %249 = tpu.matmul %248, %2, %cst_124 {dimension_numbers = #tpu.dot_dimension_numbers<[1], [0], [0], [1], [0, 0, 1, 1], [], []>} : vector<12x24xf32>, vector<24x24xf32>, vector<12x24xf32> -> vector<12x24xf32>
    %250 = tpu.reciprocal %249 {approx = true} : vector<12x24xf32> -> vector<12x24xf32>
    %251 = arith.mulf %248, %250 : vector<12x24xf32>
    %cst_125 = arith.constant dense<0.000000e+00> : vector<12x10xf32>
    %252 = tpu.matmul %251, %240, %cst_125 {dimension_numbers = #tpu.dot_dimension_numbers<[1], [0], [0], [1], [0, 0, 1, 1], [], []>} : vector<12x24xf32>, vector<24x10xf32>, vector<12x10xf32> -> vector<12x10xf32>
    %c512 = arith.constant 512 : index
    %c0_126 = arith.constant 0 : index
    %253 = vector.load %arg3[%c512, %c0_126] : memref<1480x16xf32, #tpu.memory_space<vmem>>, vector<10x10xf32>
    %cst_127 = arith.constant dense<0.000000e+00> : vector<12x10xf32>
    %254 = tpu.matmul %252, %253, %cst_127 {dimension_numbers = #tpu.dot_dimension_numbers<[1], [0], [0], [1], [0, 0, 1, 1], [], []>} : vector<12x10xf32>, vector<10x10xf32>, vector<12x10xf32> -> vector<12x10xf32>
    %c528 = arith.constant 528 : index
    %c0_128 = arith.constant 0 : index
    %255 = vector.load %arg3[%c528, %c0_128] : memref<1480x16xf32, #tpu.memory_space<vmem>>, vector<1x10xf32>
    %256 = vector.broadcast %255 : vector<1x10xf32> to vector<12x10xf32>
    %257 = arith.addf %254, %256 : vector<12x10xf32>
    %258 = arith.addf %222, %257 : vector<12x10xf32>
    %cst_129 = arith.constant dense<0.000000e+00> : vector<12x1xf32>
    %259 = tpu.matmul %258, %7, %cst_129 {dimension_numbers = #tpu.dot_dimension_numbers<[1], [0], [0], [1], [0, 0, 1, 1], [], []>} : vector<12x10xf32>, vector<10x1xf32>, vector<12x1xf32> -> vector<12x1xf32>
    %cst_130 = arith.constant 1.000000e-01 : f32
    %260 = vector.broadcast %cst_130 : f32 to vector<12x1xf32>
    %261 = arith.mulf %259, %260 : vector<12x1xf32>
    %262 = arith.mulf %258, %258 : vector<12x10xf32>
    %cst_131 = arith.constant dense<0.000000e+00> : vector<12x1xf32>
    %263 = tpu.matmul %262, %7, %cst_131 {dimension_numbers = #tpu.dot_dimension_numbers<[1], [0], [0], [1], [0, 0, 1, 1], [], []>} : vector<12x10xf32>, vector<10x1xf32>, vector<12x1xf32> -> vector<12x1xf32>
    %cst_132 = arith.constant 1.000000e-01 : f32
    %264 = vector.broadcast %cst_132 : f32 to vector<12x1xf32>
    %265 = arith.mulf %263, %264 : vector<12x1xf32>
    %266 = arith.mulf %261, %261 : vector<12x1xf32>
    %267 = arith.subf %265, %266 : vector<12x1xf32>
    %268 = vector.broadcast %261 : vector<12x1xf32> to vector<12x10xf32>
    %269 = arith.subf %258, %268 : vector<12x10xf32>
    %cst_133 = arith.constant 9.99999974E-6 : f32
    %270 = vector.broadcast %cst_133 : f32 to vector<12x1xf32>
    %271 = arith.addf %267, %270 : vector<12x1xf32>
    %272 = math.rsqrt %271 : vector<12x1xf32>
    %273 = vector.broadcast %272 : vector<12x1xf32> to vector<12x10xf32>
    %274 = arith.mulf %269, %273 : vector<12x10xf32>
    %c536 = arith.constant 536 : index
    %c0_134 = arith.constant 0 : index
    %275 = vector.load %arg3[%c536, %c0_134] : memref<1480x16xf32, #tpu.memory_space<vmem>>, vector<1x10xf32>
    %276 = vector.broadcast %275 : vector<1x10xf32> to vector<12x10xf32>
    %277 = arith.mulf %274, %276 : vector<12x10xf32>
    %c544 = arith.constant 544 : index
    %c0_135 = arith.constant 0 : index
    %278 = vector.load %arg3[%c544, %c0_135] : memref<1480x16xf32, #tpu.memory_space<vmem>>, vector<1x10xf32>
    %279 = vector.broadcast %278 : vector<1x10xf32> to vector<12x10xf32>
    %280 = arith.addf %277, %279 : vector<12x10xf32>
    %c552 = arith.constant 552 : index
    %c0_136 = arith.constant 0 : index
    %281 = vector.load %arg3[%c552, %c0_136] : memref<1480x16xf32, #tpu.memory_space<vmem>>, vector<10x16xf32>
    %cst_137 = arith.constant dense<0.000000e+00> : vector<12x16xf32>
    %282 = tpu.matmul %280, %281, %cst_137 {dimension_numbers = #tpu.dot_dimension_numbers<[1], [0], [0], [1], [0, 0, 1, 1], [], []>} : vector<12x10xf32>, vector<10x16xf32>, vector<12x16xf32> -> vector<12x16xf32>
    %c568 = arith.constant 568 : index
    %c0_138 = arith.constant 0 : index
    %283 = vector.load %arg3[%c568, %c0_138] : memref<1480x16xf32, #tpu.memory_space<vmem>>, vector<1x16xf32>
    %284 = vector.broadcast %283 : vector<1x16xf32> to vector<12x16xf32>
    %285 = arith.addf %282, %284 : vector<12x16xf32>
    %cst_139 = arith.constant 0.000000e+00 : f32
    %286 = vector.broadcast %cst_139 : f32 to vector<12x16xf32>
    %287 = arith.maximumf %285, %286 : vector<12x16xf32>
    %c576 = arith.constant 576 : index
    %c0_140 = arith.constant 0 : index
    %288 = vector.load %arg3[%c576, %c0_140] : memref<1480x16xf32, #tpu.memory_space<vmem>>, vector<16x10xf32>
    %cst_141 = arith.constant dense<0.000000e+00> : vector<12x10xf32>
    %289 = tpu.matmul %287, %288, %cst_141 {dimension_numbers = #tpu.dot_dimension_numbers<[1], [0], [0], [1], [0, 0, 1, 1], [], []>} : vector<12x16xf32>, vector<16x10xf32>, vector<12x10xf32> -> vector<12x10xf32>
    %c592 = arith.constant 592 : index
    %c0_142 = arith.constant 0 : index
    %290 = vector.load %arg3[%c592, %c0_142] : memref<1480x16xf32, #tpu.memory_space<vmem>>, vector<1x10xf32>
    %291 = vector.broadcast %290 : vector<1x10xf32> to vector<12x10xf32>
    %292 = arith.addf %289, %291 : vector<12x10xf32>
    %293 = arith.addf %280, %292 : vector<12x10xf32>
    %cst_143 = arith.constant dense<0.000000e+00> : vector<12x1xf32>
    %294 = tpu.matmul %293, %7, %cst_143 {dimension_numbers = #tpu.dot_dimension_numbers<[1], [0], [0], [1], [0, 0, 1, 1], [], []>} : vector<12x10xf32>, vector<10x1xf32>, vector<12x1xf32> -> vector<12x1xf32>
    %cst_144 = arith.constant 1.000000e-01 : f32
    %295 = vector.broadcast %cst_144 : f32 to vector<12x1xf32>
    %296 = arith.mulf %294, %295 : vector<12x1xf32>
    %297 = arith.mulf %293, %293 : vector<12x10xf32>
    %cst_145 = arith.constant dense<0.000000e+00> : vector<12x1xf32>
    %298 = tpu.matmul %297, %7, %cst_145 {dimension_numbers = #tpu.dot_dimension_numbers<[1], [0], [0], [1], [0, 0, 1, 1], [], []>} : vector<12x10xf32>, vector<10x1xf32>, vector<12x1xf32> -> vector<12x1xf32>
    %cst_146 = arith.constant 1.000000e-01 : f32
    %299 = vector.broadcast %cst_146 : f32 to vector<12x1xf32>
    %300 = arith.mulf %298, %299 : vector<12x1xf32>
    %301 = arith.mulf %296, %296 : vector<12x1xf32>
    %302 = arith.subf %300, %301 : vector<12x1xf32>
    %303 = vector.broadcast %296 : vector<12x1xf32> to vector<12x10xf32>
    %304 = arith.subf %293, %303 : vector<12x10xf32>
    %cst_147 = arith.constant 9.99999974E-6 : f32
    %305 = vector.broadcast %cst_147 : f32 to vector<12x1xf32>
    %306 = arith.addf %302, %305 : vector<12x1xf32>
    %307 = math.rsqrt %306 : vector<12x1xf32>
    %308 = vector.broadcast %307 : vector<12x1xf32> to vector<12x10xf32>
    %309 = arith.mulf %304, %308 : vector<12x10xf32>
    %c600 = arith.constant 600 : index
    %c0_148 = arith.constant 0 : index
    %310 = vector.load %arg3[%c600, %c0_148] : memref<1480x16xf32, #tpu.memory_space<vmem>>, vector<1x10xf32>
    %311 = vector.broadcast %310 : vector<1x10xf32> to vector<12x10xf32>
    %312 = arith.mulf %309, %311 : vector<12x10xf32>
    %c608 = arith.constant 608 : index
    %c0_149 = arith.constant 0 : index
    %313 = vector.load %arg3[%c608, %c0_149] : memref<1480x16xf32, #tpu.memory_space<vmem>>, vector<1x10xf32>
    %314 = vector.broadcast %313 : vector<1x10xf32> to vector<12x10xf32>
    %315 = arith.addf %312, %314 : vector<12x10xf32>
    %cst_150 = arith.constant dense<0.000000e+00> : vector<24x10xf32>
    %316 = tpu.matmul %0, %315, %cst_150 {dimension_numbers = #tpu.dot_dimension_numbers<[1], [0], [0], [1], [0, 0, 1, 1], [], []>} : vector<24x12xf32>, vector<12x10xf32>, vector<24x10xf32> -> vector<24x10xf32>
    %cst_151 = arith.constant dense<0.000000e+00> : vector<32x10xf32>
    %317 = tpu.matmul %3, %36, %cst_151 {dimension_numbers = #tpu.dot_dimension_numbers<[1], [0], [0], [1], [0, 0, 1, 1], [], []>} : vector<32x16xf32>, vector<16x10xf32>, vector<32x10xf32> -> vector<32x10xf32>
    %c616 = arith.constant 616 : index
    %c0_152 = arith.constant 0 : index
    %318 = vector.load %arg3[%c616, %c0_152] : memref<1480x16xf32, #tpu.memory_space<vmem>>, vector<10x10xf32>
    %cst_153 = arith.constant dense<0.000000e+00> : vector<16x10xf32>
    %319 = tpu.matmul %36, %318, %cst_153 {dimension_numbers = #tpu.dot_dimension_numbers<[1], [0], [0], [1], [0, 0, 1, 1], [], []>} : vector<16x10xf32>, vector<10x10xf32>, vector<16x10xf32> -> vector<16x10xf32>
    %c632 = arith.constant 632 : index
    %c0_154 = arith.constant 0 : index
    %320 = vector.load %arg3[%c632, %c0_154] : memref<1480x16xf32, #tpu.memory_space<vmem>>, vector<1x10xf32>
    %321 = vector.broadcast %320 : vector<1x10xf32> to vector<16x10xf32>
    %322 = arith.addf %319, %321 : vector<16x10xf32>
    %c640 = arith.constant 640 : index
    %c0_155 = arith.constant 0 : index
    %323 = vector.load %arg3[%c640, %c0_155] : memref<1480x16xf32, #tpu.memory_space<vmem>>, vector<10x10xf32>
    %cst_156 = arith.constant dense<0.000000e+00> : vector<32x10xf32>
    %324 = tpu.matmul %317, %323, %cst_156 {dimension_numbers = #tpu.dot_dimension_numbers<[1], [0], [0], [1], [0, 0, 1, 1], [], []>} : vector<32x10xf32>, vector<10x10xf32>, vector<32x10xf32> -> vector<32x10xf32>
    %c656 = arith.constant 656 : index
    %c0_157 = arith.constant 0 : index
    %325 = vector.load %arg3[%c656, %c0_157] : memref<1480x16xf32, #tpu.memory_space<vmem>>, vector<1x10xf32>
    %326 = vector.broadcast %325 : vector<1x10xf32> to vector<32x10xf32>
    %327 = arith.addf %324, %326 : vector<32x10xf32>
    %328 = arith.mulf %327, %4 : vector<32x10xf32>
    %c664 = arith.constant 664 : index
    %c0_158 = arith.constant 0 : index
    %329 = vector.load %arg3[%c664, %c0_158] : memref<1480x16xf32, #tpu.memory_space<vmem>>, vector<10x10xf32>
    %cst_159 = arith.constant dense<0.000000e+00> : vector<32x10xf32>
    %330 = tpu.matmul %317, %329, %cst_159 {dimension_numbers = #tpu.dot_dimension_numbers<[1], [0], [0], [1], [0, 0, 1, 1], [], []>} : vector<32x10xf32>, vector<10x10xf32>, vector<32x10xf32> -> vector<32x10xf32>
    %c680 = arith.constant 680 : index
    %c0_160 = arith.constant 0 : index
    %331 = vector.load %arg3[%c680, %c0_160] : memref<1480x16xf32, #tpu.memory_space<vmem>>, vector<1x10xf32>
    %332 = vector.broadcast %331 : vector<1x10xf32> to vector<32x10xf32>
    %333 = arith.addf %330, %332 : vector<32x10xf32>
    %334 = arith.mulf %333, %4 : vector<32x10xf32>
    %cst_161 = arith.constant dense<0.000000e+00> : vector<16x32xf32>
    %335 = tpu.matmul %322, %328, %cst_161 {dimension_numbers = #tpu.dot_dimension_numbers<[1], [1], [0], [0], [0, 0, 1, 0], [], []>} : vector<16x10xf32>, vector<32x10xf32>, vector<16x32xf32> -> vector<16x32xf32>
    %cst_162 = arith.constant 0.44721359 : f32
    %336 = vector.broadcast %cst_162 : f32 to vector<16x32xf32>
    %337 = arith.mulf %335, %336 : vector<16x32xf32>
    %338 = arith.addf %337, %6 : vector<16x32xf32>
    %cst_163 = arith.constant dense<0xFF800000> : vector<16xf32>
    %339 = vector.multi_reduction <maximumf>, %338, %cst_163 [1] : vector<16x32xf32> to vector<16xf32>
    %340 = vector.shape_cast %339 : vector<16xf32> to vector<16x1xf32>
    %341 = vector.broadcast %340 : vector<16x1xf32> to vector<16x32xf32>
    %342 = arith.subf %338, %341 : vector<16x32xf32>
    %343 = math.exp %342 : vector<16x32xf32>
    %cst_164 = arith.constant dense<0.000000e+00> : vector<16x32xf32>
    %344 = tpu.matmul %343, %5, %cst_164 {dimension_numbers = #tpu.dot_dimension_numbers<[1], [0], [0], [1], [0, 0, 1, 1], [], []>} : vector<16x32xf32>, vector<32x32xf32>, vector<16x32xf32> -> vector<16x32xf32>
    %345 = tpu.reciprocal %344 {approx = true} : vector<16x32xf32> -> vector<16x32xf32>
    %346 = arith.mulf %343, %345 : vector<16x32xf32>
    %cst_165 = arith.constant dense<0.000000e+00> : vector<16x10xf32>
    %347 = tpu.matmul %346, %334, %cst_165 {dimension_numbers = #tpu.dot_dimension_numbers<[1], [0], [0], [1], [0, 0, 1, 1], [], []>} : vector<16x32xf32>, vector<32x10xf32>, vector<16x10xf32> -> vector<16x10xf32>
    %c688 = arith.constant 688 : index
    %c0_166 = arith.constant 0 : index
    %348 = vector.load %arg3[%c688, %c0_166] : memref<1480x16xf32, #tpu.memory_space<vmem>>, vector<10x10xf32>
    %cst_167 = arith.constant dense<0.000000e+00> : vector<16x10xf32>
    %349 = tpu.matmul %347, %348, %cst_167 {dimension_numbers = #tpu.dot_dimension_numbers<[1], [0], [0], [1], [0, 0, 1, 1], [], []>} : vector<16x10xf32>, vector<10x10xf32>, vector<16x10xf32> -> vector<16x10xf32>
    %c704 = arith.constant 704 : index
    %c0_168 = arith.constant 0 : index
    %350 = vector.load %arg3[%c704, %c0_168] : memref<1480x16xf32, #tpu.memory_space<vmem>>, vector<1x10xf32>
    %351 = vector.broadcast %350 : vector<1x10xf32> to vector<16x10xf32>
    %352 = arith.addf %349, %351 : vector<16x10xf32>
    %353 = arith.addf %36, %352 : vector<16x10xf32>
    %cst_169 = arith.constant dense<0.000000e+00> : vector<16x1xf32>
    %354 = tpu.matmul %353, %7, %cst_169 {dimension_numbers = #tpu.dot_dimension_numbers<[1], [0], [0], [1], [0, 0, 1, 1], [], []>} : vector<16x10xf32>, vector<10x1xf32>, vector<16x1xf32> -> vector<16x1xf32>
    %cst_170 = arith.constant 1.000000e-01 : f32
    %355 = vector.broadcast %cst_170 : f32 to vector<16x1xf32>
    %356 = arith.mulf %354, %355 : vector<16x1xf32>
    %357 = arith.mulf %353, %353 : vector<16x10xf32>
    %cst_171 = arith.constant dense<0.000000e+00> : vector<16x1xf32>
    %358 = tpu.matmul %357, %7, %cst_171 {dimension_numbers = #tpu.dot_dimension_numbers<[1], [0], [0], [1], [0, 0, 1, 1], [], []>} : vector<16x10xf32>, vector<10x1xf32>, vector<16x1xf32> -> vector<16x1xf32>
    %cst_172 = arith.constant 1.000000e-01 : f32
    %359 = vector.broadcast %cst_172 : f32 to vector<16x1xf32>
    %360 = arith.mulf %358, %359 : vector<16x1xf32>
    %361 = arith.mulf %356, %356 : vector<16x1xf32>
    %362 = arith.subf %360, %361 : vector<16x1xf32>
    %363 = vector.broadcast %356 : vector<16x1xf32> to vector<16x10xf32>
    %364 = arith.subf %353, %363 : vector<16x10xf32>
    %cst_173 = arith.constant 9.99999974E-6 : f32
    %365 = vector.broadcast %cst_173 : f32 to vector<16x1xf32>
    %366 = arith.addf %362, %365 : vector<16x1xf32>
    %367 = math.rsqrt %366 : vector<16x1xf32>
    %368 = vector.broadcast %367 : vector<16x1xf32> to vector<16x10xf32>
    %369 = arith.mulf %364, %368 : vector<16x10xf32>
    %c712 = arith.constant 712 : index
    %c0_174 = arith.constant 0 : index
    %370 = vector.load %arg3[%c712, %c0_174] : memref<1480x16xf32, #tpu.memory_space<vmem>>, vector<1x10xf32>
    %371 = vector.broadcast %370 : vector<1x10xf32> to vector<16x10xf32>
    %372 = arith.mulf %369, %371 : vector<16x10xf32>
    %c720 = arith.constant 720 : index
    %c0_175 = arith.constant 0 : index
    %373 = vector.load %arg3[%c720, %c0_175] : memref<1480x16xf32, #tpu.memory_space<vmem>>, vector<1x10xf32>
    %374 = vector.broadcast %373 : vector<1x10xf32> to vector<16x10xf32>
    %375 = arith.addf %372, %374 : vector<16x10xf32>
    %c728 = arith.constant 728 : index
    %c0_176 = arith.constant 0 : index
    %376 = vector.load %arg3[%c728, %c0_176] : memref<1480x16xf32, #tpu.memory_space<vmem>>, vector<10x10xf32>
    %cst_177 = arith.constant dense<0.000000e+00> : vector<16x10xf32>
    %377 = tpu.matmul %375, %376, %cst_177 {dimension_numbers = #tpu.dot_dimension_numbers<[1], [0], [0], [1], [0, 0, 1, 1], [], []>} : vector<16x10xf32>, vector<10x10xf32>, vector<16x10xf32> -> vector<16x10xf32>
    %c744 = arith.constant 744 : index
    %c0_178 = arith.constant 0 : index
    %378 = vector.load %arg3[%c744, %c0_178] : memref<1480x16xf32, #tpu.memory_space<vmem>>, vector<1x10xf32>
    %379 = vector.broadcast %378 : vector<1x10xf32> to vector<16x10xf32>
    %380 = arith.addf %377, %379 : vector<16x10xf32>
    %c752 = arith.constant 752 : index
    %c0_179 = arith.constant 0 : index
    %381 = vector.load %arg3[%c752, %c0_179] : memref<1480x16xf32, #tpu.memory_space<vmem>>, vector<10x10xf32>
    %cst_180 = arith.constant dense<0.000000e+00> : vector<24x10xf32>
    %382 = tpu.matmul %316, %381, %cst_180 {dimension_numbers = #tpu.dot_dimension_numbers<[1], [0], [0], [1], [0, 0, 1, 1], [], []>} : vector<24x10xf32>, vector<10x10xf32>, vector<24x10xf32> -> vector<24x10xf32>
    %c768 = arith.constant 768 : index
    %c0_181 = arith.constant 0 : index
    %383 = vector.load %arg3[%c768, %c0_181] : memref<1480x16xf32, #tpu.memory_space<vmem>>, vector<1x10xf32>
    %384 = vector.broadcast %383 : vector<1x10xf32> to vector<24x10xf32>
    %385 = arith.addf %382, %384 : vector<24x10xf32>
    %386 = arith.mulf %385, %1 : vector<24x10xf32>
    %c776 = arith.constant 776 : index
    %c0_182 = arith.constant 0 : index
    %387 = vector.load %arg3[%c776, %c0_182] : memref<1480x16xf32, #tpu.memory_space<vmem>>, vector<10x10xf32>
    %cst_183 = arith.constant dense<0.000000e+00> : vector<24x10xf32>
    %388 = tpu.matmul %316, %387, %cst_183 {dimension_numbers = #tpu.dot_dimension_numbers<[1], [0], [0], [1], [0, 0, 1, 1], [], []>} : vector<24x10xf32>, vector<10x10xf32>, vector<24x10xf32> -> vector<24x10xf32>
    %c792 = arith.constant 792 : index
    %c0_184 = arith.constant 0 : index
    %389 = vector.load %arg3[%c792, %c0_184] : memref<1480x16xf32, #tpu.memory_space<vmem>>, vector<1x10xf32>
    %390 = vector.broadcast %389 : vector<1x10xf32> to vector<24x10xf32>
    %391 = arith.addf %388, %390 : vector<24x10xf32>
    %392 = arith.mulf %391, %1 : vector<24x10xf32>
    %cst_185 = arith.constant dense<0.000000e+00> : vector<16x24xf32>
    %393 = tpu.matmul %380, %386, %cst_185 {dimension_numbers = #tpu.dot_dimension_numbers<[1], [1], [0], [0], [0, 0, 1, 0], [], []>} : vector<16x10xf32>, vector<24x10xf32>, vector<16x24xf32> -> vector<16x24xf32>
    %cst_186 = arith.constant 0.44721359 : f32
    %394 = vector.broadcast %cst_186 : f32 to vector<16x24xf32>
    %395 = arith.mulf %393, %394 : vector<16x24xf32>
    %cst_187 = arith.constant dense<0xFF800000> : vector<16xf32>
    %396 = vector.multi_reduction <maximumf>, %395, %cst_187 [1] : vector<16x24xf32> to vector<16xf32>
    %397 = vector.shape_cast %396 : vector<16xf32> to vector<16x1xf32>
    %398 = vector.broadcast %397 : vector<16x1xf32> to vector<16x24xf32>
    %399 = arith.subf %395, %398 : vector<16x24xf32>
    %400 = math.exp %399 : vector<16x24xf32>
    %cst_188 = arith.constant dense<0.000000e+00> : vector<16x24xf32>
    %401 = tpu.matmul %400, %2, %cst_188 {dimension_numbers = #tpu.dot_dimension_numbers<[1], [0], [0], [1], [0, 0, 1, 1], [], []>} : vector<16x24xf32>, vector<24x24xf32>, vector<16x24xf32> -> vector<16x24xf32>
    %402 = tpu.reciprocal %401 {approx = true} : vector<16x24xf32> -> vector<16x24xf32>
    %403 = arith.mulf %400, %402 : vector<16x24xf32>
    %cst_189 = arith.constant dense<0.000000e+00> : vector<16x10xf32>
    %404 = tpu.matmul %403, %392, %cst_189 {dimension_numbers = #tpu.dot_dimension_numbers<[1], [0], [0], [1], [0, 0, 1, 1], [], []>} : vector<16x24xf32>, vector<24x10xf32>, vector<16x10xf32> -> vector<16x10xf32>
    %c800 = arith.constant 800 : index
    %c0_190 = arith.constant 0 : index
    %405 = vector.load %arg3[%c800, %c0_190] : memref<1480x16xf32, #tpu.memory_space<vmem>>, vector<10x10xf32>
    %cst_191 = arith.constant dense<0.000000e+00> : vector<16x10xf32>
    %406 = tpu.matmul %404, %405, %cst_191 {dimension_numbers = #tpu.dot_dimension_numbers<[1], [0], [0], [1], [0, 0, 1, 1], [], []>} : vector<16x10xf32>, vector<10x10xf32>, vector<16x10xf32> -> vector<16x10xf32>
    %c816 = arith.constant 816 : index
    %c0_192 = arith.constant 0 : index
    %407 = vector.load %arg3[%c816, %c0_192] : memref<1480x16xf32, #tpu.memory_space<vmem>>, vector<1x10xf32>
    %408 = vector.broadcast %407 : vector<1x10xf32> to vector<16x10xf32>
    %409 = arith.addf %406, %408 : vector<16x10xf32>
    %410 = arith.addf %375, %409 : vector<16x10xf32>
    %cst_193 = arith.constant dense<0.000000e+00> : vector<16x1xf32>
    %411 = tpu.matmul %410, %7, %cst_193 {dimension_numbers = #tpu.dot_dimension_numbers<[1], [0], [0], [1], [0, 0, 1, 1], [], []>} : vector<16x10xf32>, vector<10x1xf32>, vector<16x1xf32> -> vector<16x1xf32>
    %cst_194 = arith.constant 1.000000e-01 : f32
    %412 = vector.broadcast %cst_194 : f32 to vector<16x1xf32>
    %413 = arith.mulf %411, %412 : vector<16x1xf32>
    %414 = arith.mulf %410, %410 : vector<16x10xf32>
    %cst_195 = arith.constant dense<0.000000e+00> : vector<16x1xf32>
    %415 = tpu.matmul %414, %7, %cst_195 {dimension_numbers = #tpu.dot_dimension_numbers<[1], [0], [0], [1], [0, 0, 1, 1], [], []>} : vector<16x10xf32>, vector<10x1xf32>, vector<16x1xf32> -> vector<16x1xf32>
    %cst_196 = arith.constant 1.000000e-01 : f32
    %416 = vector.broadcast %cst_196 : f32 to vector<16x1xf32>
    %417 = arith.mulf %415, %416 : vector<16x1xf32>
    %418 = arith.mulf %413, %413 : vector<16x1xf32>
    %419 = arith.subf %417, %418 : vector<16x1xf32>
    %420 = vector.broadcast %413 : vector<16x1xf32> to vector<16x10xf32>
    %421 = arith.subf %410, %420 : vector<16x10xf32>
    %cst_197 = arith.constant 9.99999974E-6 : f32
    %422 = vector.broadcast %cst_197 : f32 to vector<16x1xf32>
    %423 = arith.addf %419, %422 : vector<16x1xf32>
    %424 = math.rsqrt %423 : vector<16x1xf32>
    %425 = vector.broadcast %424 : vector<16x1xf32> to vector<16x10xf32>
    %426 = arith.mulf %421, %425 : vector<16x10xf32>
    %c824 = arith.constant 824 : index
    %c0_198 = arith.constant 0 : index
    %427 = vector.load %arg3[%c824, %c0_198] : memref<1480x16xf32, #tpu.memory_space<vmem>>, vector<1x10xf32>
    %428 = vector.broadcast %427 : vector<1x10xf32> to vector<16x10xf32>
    %429 = arith.mulf %426, %428 : vector<16x10xf32>
    %c832 = arith.constant 832 : index
    %c0_199 = arith.constant 0 : index
    %430 = vector.load %arg3[%c832, %c0_199] : memref<1480x16xf32, #tpu.memory_space<vmem>>, vector<1x10xf32>
    %431 = vector.broadcast %430 : vector<1x10xf32> to vector<16x10xf32>
    %432 = arith.addf %429, %431 : vector<16x10xf32>
    %c840 = arith.constant 840 : index
    %c0_200 = arith.constant 0 : index
    %433 = vector.load %arg3[%c840, %c0_200] : memref<1480x16xf32, #tpu.memory_space<vmem>>, vector<10x16xf32>
    %cst_201 = arith.constant dense<0.000000e+00> : vector<16x16xf32>
    %434 = tpu.matmul %432, %433, %cst_201 {dimension_numbers = #tpu.dot_dimension_numbers<[1], [0], [0], [1], [0, 0, 1, 1], [], []>} : vector<16x10xf32>, vector<10x16xf32>, vector<16x16xf32> -> vector<16x16xf32>
    %c856 = arith.constant 856 : index
    %c0_202 = arith.constant 0 : index
    %435 = vector.load %arg3[%c856, %c0_202] : memref<1480x16xf32, #tpu.memory_space<vmem>>, vector<1x16xf32>
    %436 = vector.broadcast %435 : vector<1x16xf32> to vector<16x16xf32>
    %437 = arith.addf %434, %436 : vector<16x16xf32>
    %cst_203 = arith.constant 0.000000e+00 : f32
    %438 = vector.broadcast %cst_203 : f32 to vector<16x16xf32>
    %439 = arith.maximumf %437, %438 : vector<16x16xf32>
    %c864 = arith.constant 864 : index
    %c0_204 = arith.constant 0 : index
    %440 = vector.load %arg3[%c864, %c0_204] : memref<1480x16xf32, #tpu.memory_space<vmem>>, vector<16x10xf32>
    %cst_205 = arith.constant dense<0.000000e+00> : vector<16x10xf32>
    %441 = tpu.matmul %439, %440, %cst_205 {dimension_numbers = #tpu.dot_dimension_numbers<[1], [0], [0], [1], [0, 0, 1, 1], [], []>} : vector<16x16xf32>, vector<16x10xf32>, vector<16x10xf32> -> vector<16x10xf32>
    %c880 = arith.constant 880 : index
    %c0_206 = arith.constant 0 : index
    %442 = vector.load %arg3[%c880, %c0_206] : memref<1480x16xf32, #tpu.memory_space<vmem>>, vector<1x10xf32>
    %443 = vector.broadcast %442 : vector<1x10xf32> to vector<16x10xf32>
    %444 = arith.addf %441, %443 : vector<16x10xf32>
    %445 = arith.addf %432, %444 : vector<16x10xf32>
    %cst_207 = arith.constant dense<0.000000e+00> : vector<16x1xf32>
    %446 = tpu.matmul %445, %7, %cst_207 {dimension_numbers = #tpu.dot_dimension_numbers<[1], [0], [0], [1], [0, 0, 1, 1], [], []>} : vector<16x10xf32>, vector<10x1xf32>, vector<16x1xf32> -> vector<16x1xf32>
    %cst_208 = arith.constant 1.000000e-01 : f32
    %447 = vector.broadcast %cst_208 : f32 to vector<16x1xf32>
    %448 = arith.mulf %446, %447 : vector<16x1xf32>
    %449 = arith.mulf %445, %445 : vector<16x10xf32>
    %cst_209 = arith.constant dense<0.000000e+00> : vector<16x1xf32>
    %450 = tpu.matmul %449, %7, %cst_209 {dimension_numbers = #tpu.dot_dimension_numbers<[1], [0], [0], [1], [0, 0, 1, 1], [], []>} : vector<16x10xf32>, vector<10x1xf32>, vector<16x1xf32> -> vector<16x1xf32>
    %cst_210 = arith.constant 1.000000e-01 : f32
    %451 = vector.broadcast %cst_210 : f32 to vector<16x1xf32>
    %452 = arith.mulf %450, %451 : vector<16x1xf32>
    %453 = arith.mulf %448, %448 : vector<16x1xf32>
    %454 = arith.subf %452, %453 : vector<16x1xf32>
    %455 = vector.broadcast %448 : vector<16x1xf32> to vector<16x10xf32>
    %456 = arith.subf %445, %455 : vector<16x10xf32>
    %cst_211 = arith.constant 9.99999974E-6 : f32
    %457 = vector.broadcast %cst_211 : f32 to vector<16x1xf32>
    %458 = arith.addf %454, %457 : vector<16x1xf32>
    %459 = math.rsqrt %458 : vector<16x1xf32>
    %460 = vector.broadcast %459 : vector<16x1xf32> to vector<16x10xf32>
    %461 = arith.mulf %456, %460 : vector<16x10xf32>
    %c888 = arith.constant 888 : index
    %c0_212 = arith.constant 0 : index
    %462 = vector.load %arg3[%c888, %c0_212] : memref<1480x16xf32, #tpu.memory_space<vmem>>, vector<1x10xf32>
    %463 = vector.broadcast %462 : vector<1x10xf32> to vector<16x10xf32>
    %464 = arith.mulf %461, %463 : vector<16x10xf32>
    %c896 = arith.constant 896 : index
    %c0_213 = arith.constant 0 : index
    %465 = vector.load %arg3[%c896, %c0_213] : memref<1480x16xf32, #tpu.memory_space<vmem>>, vector<1x10xf32>
    %466 = vector.broadcast %465 : vector<1x10xf32> to vector<16x10xf32>
    %467 = arith.addf %464, %466 : vector<16x10xf32>
    %cst_214 = arith.constant dense<0.000000e+00> : vector<32x10xf32>
    %468 = tpu.matmul %3, %467, %cst_214 {dimension_numbers = #tpu.dot_dimension_numbers<[1], [0], [0], [1], [0, 0, 1, 1], [], []>} : vector<32x16xf32>, vector<16x10xf32>, vector<32x10xf32> -> vector<32x10xf32>
    %c904 = arith.constant 904 : index
    %c0_215 = arith.constant 0 : index
    %469 = vector.load %arg3[%c904, %c0_215] : memref<1480x16xf32, #tpu.memory_space<vmem>>, vector<10x10xf32>
    %cst_216 = arith.constant dense<0.000000e+00> : vector<16x10xf32>
    %470 = tpu.matmul %467, %469, %cst_216 {dimension_numbers = #tpu.dot_dimension_numbers<[1], [0], [0], [1], [0, 0, 1, 1], [], []>} : vector<16x10xf32>, vector<10x10xf32>, vector<16x10xf32> -> vector<16x10xf32>
    %c920 = arith.constant 920 : index
    %c0_217 = arith.constant 0 : index
    %471 = vector.load %arg3[%c920, %c0_217] : memref<1480x16xf32, #tpu.memory_space<vmem>>, vector<1x10xf32>
    %472 = vector.broadcast %471 : vector<1x10xf32> to vector<16x10xf32>
    %473 = arith.addf %470, %472 : vector<16x10xf32>
    %c928 = arith.constant 928 : index
    %c0_218 = arith.constant 0 : index
    %474 = vector.load %arg3[%c928, %c0_218] : memref<1480x16xf32, #tpu.memory_space<vmem>>, vector<10x10xf32>
    %cst_219 = arith.constant dense<0.000000e+00> : vector<32x10xf32>
    %475 = tpu.matmul %468, %474, %cst_219 {dimension_numbers = #tpu.dot_dimension_numbers<[1], [0], [0], [1], [0, 0, 1, 1], [], []>} : vector<32x10xf32>, vector<10x10xf32>, vector<32x10xf32> -> vector<32x10xf32>
    %c944 = arith.constant 944 : index
    %c0_220 = arith.constant 0 : index
    %476 = vector.load %arg3[%c944, %c0_220] : memref<1480x16xf32, #tpu.memory_space<vmem>>, vector<1x10xf32>
    %477 = vector.broadcast %476 : vector<1x10xf32> to vector<32x10xf32>
    %478 = arith.addf %475, %477 : vector<32x10xf32>
    %479 = arith.mulf %478, %4 : vector<32x10xf32>
    %c952 = arith.constant 952 : index
    %c0_221 = arith.constant 0 : index
    %480 = vector.load %arg3[%c952, %c0_221] : memref<1480x16xf32, #tpu.memory_space<vmem>>, vector<10x10xf32>
    %cst_222 = arith.constant dense<0.000000e+00> : vector<32x10xf32>
    %481 = tpu.matmul %468, %480, %cst_222 {dimension_numbers = #tpu.dot_dimension_numbers<[1], [0], [0], [1], [0, 0, 1, 1], [], []>} : vector<32x10xf32>, vector<10x10xf32>, vector<32x10xf32> -> vector<32x10xf32>
    %c968 = arith.constant 968 : index
    %c0_223 = arith.constant 0 : index
    %482 = vector.load %arg3[%c968, %c0_223] : memref<1480x16xf32, #tpu.memory_space<vmem>>, vector<1x10xf32>
    %483 = vector.broadcast %482 : vector<1x10xf32> to vector<32x10xf32>
    %484 = arith.addf %481, %483 : vector<32x10xf32>
    %485 = arith.mulf %484, %4 : vector<32x10xf32>
    %cst_224 = arith.constant dense<0.000000e+00> : vector<16x32xf32>
    %486 = tpu.matmul %473, %479, %cst_224 {dimension_numbers = #tpu.dot_dimension_numbers<[1], [1], [0], [0], [0, 0, 1, 0], [], []>} : vector<16x10xf32>, vector<32x10xf32>, vector<16x32xf32> -> vector<16x32xf32>
    %cst_225 = arith.constant 0.44721359 : f32
    %487 = vector.broadcast %cst_225 : f32 to vector<16x32xf32>
    %488 = arith.mulf %486, %487 : vector<16x32xf32>
    %489 = arith.addf %488, %6 : vector<16x32xf32>
    %cst_226 = arith.constant dense<0xFF800000> : vector<16xf32>
    %490 = vector.multi_reduction <maximumf>, %489, %cst_226 [1] : vector<16x32xf32> to vector<16xf32>
    %491 = vector.shape_cast %490 : vector<16xf32> to vector<16x1xf32>
    %492 = vector.broadcast %491 : vector<16x1xf32> to vector<16x32xf32>
    %493 = arith.subf %489, %492 : vector<16x32xf32>
    %494 = math.exp %493 : vector<16x32xf32>
    %cst_227 = arith.constant dense<0.000000e+00> : vector<16x32xf32>
    %495 = tpu.matmul %494, %5, %cst_227 {dimension_numbers = #tpu.dot_dimension_numbers<[1], [0], [0], [1], [0, 0, 1, 1], [], []>} : vector<16x32xf32>, vector<32x32xf32>, vector<16x32xf32> -> vector<16x32xf32>
    %496 = tpu.reciprocal %495 {approx = true} : vector<16x32xf32> -> vector<16x32xf32>
    %497 = arith.mulf %494, %496 : vector<16x32xf32>
    %cst_228 = arith.constant dense<0.000000e+00> : vector<16x10xf32>
    %498 = tpu.matmul %497, %485, %cst_228 {dimension_numbers = #tpu.dot_dimension_numbers<[1], [0], [0], [1], [0, 0, 1, 1], [], []>} : vector<16x32xf32>, vector<32x10xf32>, vector<16x10xf32> -> vector<16x10xf32>
    %c976 = arith.constant 976 : index
    %c0_229 = arith.constant 0 : index
    %499 = vector.load %arg3[%c976, %c0_229] : memref<1480x16xf32, #tpu.memory_space<vmem>>, vector<10x10xf32>
    %cst_230 = arith.constant dense<0.000000e+00> : vector<16x10xf32>
    %500 = tpu.matmul %498, %499, %cst_230 {dimension_numbers = #tpu.dot_dimension_numbers<[1], [0], [0], [1], [0, 0, 1, 1], [], []>} : vector<16x10xf32>, vector<10x10xf32>, vector<16x10xf32> -> vector<16x10xf32>
    %c992 = arith.constant 992 : index
    %c0_231 = arith.constant 0 : index
    %501 = vector.load %arg3[%c992, %c0_231] : memref<1480x16xf32, #tpu.memory_space<vmem>>, vector<1x10xf32>
    %502 = vector.broadcast %501 : vector<1x10xf32> to vector<16x10xf32>
    %503 = arith.addf %500, %502 : vector<16x10xf32>
    %504 = arith.addf %467, %503 : vector<16x10xf32>
    %cst_232 = arith.constant dense<0.000000e+00> : vector<16x1xf32>
    %505 = tpu.matmul %504, %7, %cst_232 {dimension_numbers = #tpu.dot_dimension_numbers<[1], [0], [0], [1], [0, 0, 1, 1], [], []>} : vector<16x10xf32>, vector<10x1xf32>, vector<16x1xf32> -> vector<16x1xf32>
    %cst_233 = arith.constant 1.000000e-01 : f32
    %506 = vector.broadcast %cst_233 : f32 to vector<16x1xf32>
    %507 = arith.mulf %505, %506 : vector<16x1xf32>
    %508 = arith.mulf %504, %504 : vector<16x10xf32>
    %cst_234 = arith.constant dense<0.000000e+00> : vector<16x1xf32>
    %509 = tpu.matmul %508, %7, %cst_234 {dimension_numbers = #tpu.dot_dimension_numbers<[1], [0], [0], [1], [0, 0, 1, 1], [], []>} : vector<16x10xf32>, vector<10x1xf32>, vector<16x1xf32> -> vector<16x1xf32>
    %cst_235 = arith.constant 1.000000e-01 : f32
    %510 = vector.broadcast %cst_235 : f32 to vector<16x1xf32>
    %511 = arith.mulf %509, %510 : vector<16x1xf32>
    %512 = arith.mulf %507, %507 : vector<16x1xf32>
    %513 = arith.subf %511, %512 : vector<16x1xf32>
    %514 = vector.broadcast %507 : vector<16x1xf32> to vector<16x10xf32>
    %515 = arith.subf %504, %514 : vector<16x10xf32>
    %cst_236 = arith.constant 9.99999974E-6 : f32
    %516 = vector.broadcast %cst_236 : f32 to vector<16x1xf32>
    %517 = arith.addf %513, %516 : vector<16x1xf32>
    %518 = math.rsqrt %517 : vector<16x1xf32>
    %519 = vector.broadcast %518 : vector<16x1xf32> to vector<16x10xf32>
    %520 = arith.mulf %515, %519 : vector<16x10xf32>
    %c1000 = arith.constant 1000 : index
    %c0_237 = arith.constant 0 : index
    %521 = vector.load %arg3[%c1000, %c0_237] : memref<1480x16xf32, #tpu.memory_space<vmem>>, vector<1x10xf32>
    %522 = vector.broadcast %521 : vector<1x10xf32> to vector<16x10xf32>
    %523 = arith.mulf %520, %522 : vector<16x10xf32>
    %c1008 = arith.constant 1008 : index
    %c0_238 = arith.constant 0 : index
    %524 = vector.load %arg3[%c1008, %c0_238] : memref<1480x16xf32, #tpu.memory_space<vmem>>, vector<1x10xf32>
    %525 = vector.broadcast %524 : vector<1x10xf32> to vector<16x10xf32>
    %526 = arith.addf %523, %525 : vector<16x10xf32>
    %c1016 = arith.constant 1016 : index
    %c0_239 = arith.constant 0 : index
    %527 = vector.load %arg3[%c1016, %c0_239] : memref<1480x16xf32, #tpu.memory_space<vmem>>, vector<10x10xf32>
    %cst_240 = arith.constant dense<0.000000e+00> : vector<16x10xf32>
    %528 = tpu.matmul %526, %527, %cst_240 {dimension_numbers = #tpu.dot_dimension_numbers<[1], [0], [0], [1], [0, 0, 1, 1], [], []>} : vector<16x10xf32>, vector<10x10xf32>, vector<16x10xf32> -> vector<16x10xf32>
    %c1032 = arith.constant 1032 : index
    %c0_241 = arith.constant 0 : index
    %529 = vector.load %arg3[%c1032, %c0_241] : memref<1480x16xf32, #tpu.memory_space<vmem>>, vector<1x10xf32>
    %530 = vector.broadcast %529 : vector<1x10xf32> to vector<16x10xf32>
    %531 = arith.addf %528, %530 : vector<16x10xf32>
    %c1040 = arith.constant 1040 : index
    %c0_242 = arith.constant 0 : index
    %532 = vector.load %arg3[%c1040, %c0_242] : memref<1480x16xf32, #tpu.memory_space<vmem>>, vector<10x10xf32>
    %cst_243 = arith.constant dense<0.000000e+00> : vector<24x10xf32>
    %533 = tpu.matmul %316, %532, %cst_243 {dimension_numbers = #tpu.dot_dimension_numbers<[1], [0], [0], [1], [0, 0, 1, 1], [], []>} : vector<24x10xf32>, vector<10x10xf32>, vector<24x10xf32> -> vector<24x10xf32>
    %c1056 = arith.constant 1056 : index
    %c0_244 = arith.constant 0 : index
    %534 = vector.load %arg3[%c1056, %c0_244] : memref<1480x16xf32, #tpu.memory_space<vmem>>, vector<1x10xf32>
    %535 = vector.broadcast %534 : vector<1x10xf32> to vector<24x10xf32>
    %536 = arith.addf %533, %535 : vector<24x10xf32>
    %537 = arith.mulf %536, %1 : vector<24x10xf32>
    %c1064 = arith.constant 1064 : index
    %c0_245 = arith.constant 0 : index
    %538 = vector.load %arg3[%c1064, %c0_245] : memref<1480x16xf32, #tpu.memory_space<vmem>>, vector<10x10xf32>
    %cst_246 = arith.constant dense<0.000000e+00> : vector<24x10xf32>
    %539 = tpu.matmul %316, %538, %cst_246 {dimension_numbers = #tpu.dot_dimension_numbers<[1], [0], [0], [1], [0, 0, 1, 1], [], []>} : vector<24x10xf32>, vector<10x10xf32>, vector<24x10xf32> -> vector<24x10xf32>
    %c1080 = arith.constant 1080 : index
    %c0_247 = arith.constant 0 : index
    %540 = vector.load %arg3[%c1080, %c0_247] : memref<1480x16xf32, #tpu.memory_space<vmem>>, vector<1x10xf32>
    %541 = vector.broadcast %540 : vector<1x10xf32> to vector<24x10xf32>
    %542 = arith.addf %539, %541 : vector<24x10xf32>
    %543 = arith.mulf %542, %1 : vector<24x10xf32>
    %cst_248 = arith.constant dense<0.000000e+00> : vector<16x24xf32>
    %544 = tpu.matmul %531, %537, %cst_248 {dimension_numbers = #tpu.dot_dimension_numbers<[1], [1], [0], [0], [0, 0, 1, 0], [], []>} : vector<16x10xf32>, vector<24x10xf32>, vector<16x24xf32> -> vector<16x24xf32>
    %cst_249 = arith.constant 0.44721359 : f32
    %545 = vector.broadcast %cst_249 : f32 to vector<16x24xf32>
    %546 = arith.mulf %544, %545 : vector<16x24xf32>
    %cst_250 = arith.constant dense<0xFF800000> : vector<16xf32>
    %547 = vector.multi_reduction <maximumf>, %546, %cst_250 [1] : vector<16x24xf32> to vector<16xf32>
    %548 = vector.shape_cast %547 : vector<16xf32> to vector<16x1xf32>
    %549 = vector.broadcast %548 : vector<16x1xf32> to vector<16x24xf32>
    %550 = arith.subf %546, %549 : vector<16x24xf32>
    %551 = math.exp %550 : vector<16x24xf32>
    %cst_251 = arith.constant dense<0.000000e+00> : vector<16x24xf32>
    %552 = tpu.matmul %551, %2, %cst_251 {dimension_numbers = #tpu.dot_dimension_numbers<[1], [0], [0], [1], [0, 0, 1, 1], [], []>} : vector<16x24xf32>, vector<24x24xf32>, vector<16x24xf32> -> vector<16x24xf32>
    %553 = tpu.reciprocal %552 {approx = true} : vector<16x24xf32> -> vector<16x24xf32>
    %554 = arith.mulf %551, %553 : vector<16x24xf32>
    %cst_252 = arith.constant dense<0.000000e+00> : vector<16x10xf32>
    %555 = tpu.matmul %554, %543, %cst_252 {dimension_numbers = #tpu.dot_dimension_numbers<[1], [0], [0], [1], [0, 0, 1, 1], [], []>} : vector<16x24xf32>, vector<24x10xf32>, vector<16x10xf32> -> vector<16x10xf32>
    %c1088 = arith.constant 1088 : index
    %c0_253 = arith.constant 0 : index
    %556 = vector.load %arg3[%c1088, %c0_253] : memref<1480x16xf32, #tpu.memory_space<vmem>>, vector<10x10xf32>
    %cst_254 = arith.constant dense<0.000000e+00> : vector<16x10xf32>
    %557 = tpu.matmul %555, %556, %cst_254 {dimension_numbers = #tpu.dot_dimension_numbers<[1], [0], [0], [1], [0, 0, 1, 1], [], []>} : vector<16x10xf32>, vector<10x10xf32>, vector<16x10xf32> -> vector<16x10xf32>
    %c1104 = arith.constant 1104 : index
    %c0_255 = arith.constant 0 : index
    %558 = vector.load %arg3[%c1104, %c0_255] : memref<1480x16xf32, #tpu.memory_space<vmem>>, vector<1x10xf32>
    %559 = vector.broadcast %558 : vector<1x10xf32> to vector<16x10xf32>
    %560 = arith.addf %557, %559 : vector<16x10xf32>
    %561 = arith.addf %526, %560 : vector<16x10xf32>
    %cst_256 = arith.constant dense<0.000000e+00> : vector<16x1xf32>
    %562 = tpu.matmul %561, %7, %cst_256 {dimension_numbers = #tpu.dot_dimension_numbers<[1], [0], [0], [1], [0, 0, 1, 1], [], []>} : vector<16x10xf32>, vector<10x1xf32>, vector<16x1xf32> -> vector<16x1xf32>
    %cst_257 = arith.constant 1.000000e-01 : f32
    %563 = vector.broadcast %cst_257 : f32 to vector<16x1xf32>
    %564 = arith.mulf %562, %563 : vector<16x1xf32>
    %565 = arith.mulf %561, %561 : vector<16x10xf32>
    %cst_258 = arith.constant dense<0.000000e+00> : vector<16x1xf32>
    %566 = tpu.matmul %565, %7, %cst_258 {dimension_numbers = #tpu.dot_dimension_numbers<[1], [0], [0], [1], [0, 0, 1, 1], [], []>} : vector<16x10xf32>, vector<10x1xf32>, vector<16x1xf32> -> vector<16x1xf32>
    %cst_259 = arith.constant 1.000000e-01 : f32
    %567 = vector.broadcast %cst_259 : f32 to vector<16x1xf32>
    %568 = arith.mulf %566, %567 : vector<16x1xf32>
    %569 = arith.mulf %564, %564 : vector<16x1xf32>
    %570 = arith.subf %568, %569 : vector<16x1xf32>
    %571 = vector.broadcast %564 : vector<16x1xf32> to vector<16x10xf32>
    %572 = arith.subf %561, %571 : vector<16x10xf32>
    %cst_260 = arith.constant 9.99999974E-6 : f32
    %573 = vector.broadcast %cst_260 : f32 to vector<16x1xf32>
    %574 = arith.addf %570, %573 : vector<16x1xf32>
    %575 = math.rsqrt %574 : vector<16x1xf32>
    %576 = vector.broadcast %575 : vector<16x1xf32> to vector<16x10xf32>
    %577 = arith.mulf %572, %576 : vector<16x10xf32>
    %c1112 = arith.constant 1112 : index
    %c0_261 = arith.constant 0 : index
    %578 = vector.load %arg3[%c1112, %c0_261] : memref<1480x16xf32, #tpu.memory_space<vmem>>, vector<1x10xf32>
    %579 = vector.broadcast %578 : vector<1x10xf32> to vector<16x10xf32>
    %580 = arith.mulf %577, %579 : vector<16x10xf32>
    %c1120 = arith.constant 1120 : index
    %c0_262 = arith.constant 0 : index
    %581 = vector.load %arg3[%c1120, %c0_262] : memref<1480x16xf32, #tpu.memory_space<vmem>>, vector<1x10xf32>
    %582 = vector.broadcast %581 : vector<1x10xf32> to vector<16x10xf32>
    %583 = arith.addf %580, %582 : vector<16x10xf32>
    %c1128 = arith.constant 1128 : index
    %c0_263 = arith.constant 0 : index
    %584 = vector.load %arg3[%c1128, %c0_263] : memref<1480x16xf32, #tpu.memory_space<vmem>>, vector<10x16xf32>
    %cst_264 = arith.constant dense<0.000000e+00> : vector<16x16xf32>
    %585 = tpu.matmul %583, %584, %cst_264 {dimension_numbers = #tpu.dot_dimension_numbers<[1], [0], [0], [1], [0, 0, 1, 1], [], []>} : vector<16x10xf32>, vector<10x16xf32>, vector<16x16xf32> -> vector<16x16xf32>
    %c1144 = arith.constant 1144 : index
    %c0_265 = arith.constant 0 : index
    %586 = vector.load %arg3[%c1144, %c0_265] : memref<1480x16xf32, #tpu.memory_space<vmem>>, vector<1x16xf32>
    %587 = vector.broadcast %586 : vector<1x16xf32> to vector<16x16xf32>
    %588 = arith.addf %585, %587 : vector<16x16xf32>
    %cst_266 = arith.constant 0.000000e+00 : f32
    %589 = vector.broadcast %cst_266 : f32 to vector<16x16xf32>
    %590 = arith.maximumf %588, %589 : vector<16x16xf32>
    %c1152 = arith.constant 1152 : index
    %c0_267 = arith.constant 0 : index
    %591 = vector.load %arg3[%c1152, %c0_267] : memref<1480x16xf32, #tpu.memory_space<vmem>>, vector<16x10xf32>
    %cst_268 = arith.constant dense<0.000000e+00> : vector<16x10xf32>
    %592 = tpu.matmul %590, %591, %cst_268 {dimension_numbers = #tpu.dot_dimension_numbers<[1], [0], [0], [1], [0, 0, 1, 1], [], []>} : vector<16x16xf32>, vector<16x10xf32>, vector<16x10xf32> -> vector<16x10xf32>
    %c1168 = arith.constant 1168 : index
    %c0_269 = arith.constant 0 : index
    %593 = vector.load %arg3[%c1168, %c0_269] : memref<1480x16xf32, #tpu.memory_space<vmem>>, vector<1x10xf32>
    %594 = vector.broadcast %593 : vector<1x10xf32> to vector<16x10xf32>
    %595 = arith.addf %592, %594 : vector<16x10xf32>
    %596 = arith.addf %583, %595 : vector<16x10xf32>
    %cst_270 = arith.constant dense<0.000000e+00> : vector<16x1xf32>
    %597 = tpu.matmul %596, %7, %cst_270 {dimension_numbers = #tpu.dot_dimension_numbers<[1], [0], [0], [1], [0, 0, 1, 1], [], []>} : vector<16x10xf32>, vector<10x1xf32>, vector<16x1xf32> -> vector<16x1xf32>
    %cst_271 = arith.constant 1.000000e-01 : f32
    %598 = vector.broadcast %cst_271 : f32 to vector<16x1xf32>
    %599 = arith.mulf %597, %598 : vector<16x1xf32>
    %600 = arith.mulf %596, %596 : vector<16x10xf32>
    %cst_272 = arith.constant dense<0.000000e+00> : vector<16x1xf32>
    %601 = tpu.matmul %600, %7, %cst_272 {dimension_numbers = #tpu.dot_dimension_numbers<[1], [0], [0], [1], [0, 0, 1, 1], [], []>} : vector<16x10xf32>, vector<10x1xf32>, vector<16x1xf32> -> vector<16x1xf32>
    %cst_273 = arith.constant 1.000000e-01 : f32
    %602 = vector.broadcast %cst_273 : f32 to vector<16x1xf32>
    %603 = arith.mulf %601, %602 : vector<16x1xf32>
    %604 = arith.mulf %599, %599 : vector<16x1xf32>
    %605 = arith.subf %603, %604 : vector<16x1xf32>
    %606 = vector.broadcast %599 : vector<16x1xf32> to vector<16x10xf32>
    %607 = arith.subf %596, %606 : vector<16x10xf32>
    %cst_274 = arith.constant 9.99999974E-6 : f32
    %608 = vector.broadcast %cst_274 : f32 to vector<16x1xf32>
    %609 = arith.addf %605, %608 : vector<16x1xf32>
    %610 = math.rsqrt %609 : vector<16x1xf32>
    %611 = vector.broadcast %610 : vector<16x1xf32> to vector<16x10xf32>
    %612 = arith.mulf %607, %611 : vector<16x10xf32>
    %c1176 = arith.constant 1176 : index
    %c0_275 = arith.constant 0 : index
    %613 = vector.load %arg3[%c1176, %c0_275] : memref<1480x16xf32, #tpu.memory_space<vmem>>, vector<1x10xf32>
    %614 = vector.broadcast %613 : vector<1x10xf32> to vector<16x10xf32>
    %615 = arith.mulf %612, %614 : vector<16x10xf32>
    %c1184 = arith.constant 1184 : index
    %c0_276 = arith.constant 0 : index
    %616 = vector.load %arg3[%c1184, %c0_276] : memref<1480x16xf32, #tpu.memory_space<vmem>>, vector<1x10xf32>
    %617 = vector.broadcast %616 : vector<1x10xf32> to vector<16x10xf32>
    %618 = arith.addf %615, %617 : vector<16x10xf32>
    %cst_277 = arith.constant dense<0.000000e+00> : vector<32x10xf32>
    %619 = tpu.matmul %3, %618, %cst_277 {dimension_numbers = #tpu.dot_dimension_numbers<[1], [0], [0], [1], [0, 0, 1, 1], [], []>} : vector<32x16xf32>, vector<16x10xf32>, vector<32x10xf32> -> vector<32x10xf32>
    %c1192 = arith.constant 1192 : index
    %c0_278 = arith.constant 0 : index
    %620 = vector.load %arg3[%c1192, %c0_278] : memref<1480x16xf32, #tpu.memory_space<vmem>>, vector<10x10xf32>
    %cst_279 = arith.constant dense<0.000000e+00> : vector<16x10xf32>
    %621 = tpu.matmul %618, %620, %cst_279 {dimension_numbers = #tpu.dot_dimension_numbers<[1], [0], [0], [1], [0, 0, 1, 1], [], []>} : vector<16x10xf32>, vector<10x10xf32>, vector<16x10xf32> -> vector<16x10xf32>
    %c1208 = arith.constant 1208 : index
    %c0_280 = arith.constant 0 : index
    %622 = vector.load %arg3[%c1208, %c0_280] : memref<1480x16xf32, #tpu.memory_space<vmem>>, vector<1x10xf32>
    %623 = vector.broadcast %622 : vector<1x10xf32> to vector<16x10xf32>
    %624 = arith.addf %621, %623 : vector<16x10xf32>
    %c1216 = arith.constant 1216 : index
    %c0_281 = arith.constant 0 : index
    %625 = vector.load %arg3[%c1216, %c0_281] : memref<1480x16xf32, #tpu.memory_space<vmem>>, vector<10x10xf32>
    %cst_282 = arith.constant dense<0.000000e+00> : vector<32x10xf32>
    %626 = tpu.matmul %619, %625, %cst_282 {dimension_numbers = #tpu.dot_dimension_numbers<[1], [0], [0], [1], [0, 0, 1, 1], [], []>} : vector<32x10xf32>, vector<10x10xf32>, vector<32x10xf32> -> vector<32x10xf32>
    %c1232 = arith.constant 1232 : index
    %c0_283 = arith.constant 0 : index
    %627 = vector.load %arg3[%c1232, %c0_283] : memref<1480x16xf32, #tpu.memory_space<vmem>>, vector<1x10xf32>
    %628 = vector.broadcast %627 : vector<1x10xf32> to vector<32x10xf32>
    %629 = arith.addf %626, %628 : vector<32x10xf32>
    %630 = arith.mulf %629, %4 : vector<32x10xf32>
    %c1240 = arith.constant 1240 : index
    %c0_284 = arith.constant 0 : index
    %631 = vector.load %arg3[%c1240, %c0_284] : memref<1480x16xf32, #tpu.memory_space<vmem>>, vector<10x10xf32>
    %cst_285 = arith.constant dense<0.000000e+00> : vector<32x10xf32>
    %632 = tpu.matmul %619, %631, %cst_285 {dimension_numbers = #tpu.dot_dimension_numbers<[1], [0], [0], [1], [0, 0, 1, 1], [], []>} : vector<32x10xf32>, vector<10x10xf32>, vector<32x10xf32> -> vector<32x10xf32>
    %c1256 = arith.constant 1256 : index
    %c0_286 = arith.constant 0 : index
    %633 = vector.load %arg3[%c1256, %c0_286] : memref<1480x16xf32, #tpu.memory_space<vmem>>, vector<1x10xf32>
    %634 = vector.broadcast %633 : vector<1x10xf32> to vector<32x10xf32>
    %635 = arith.addf %632, %634 : vector<32x10xf32>
    %636 = arith.mulf %635, %4 : vector<32x10xf32>
    %cst_287 = arith.constant dense<0.000000e+00> : vector<16x32xf32>
    %637 = tpu.matmul %624, %630, %cst_287 {dimension_numbers = #tpu.dot_dimension_numbers<[1], [1], [0], [0], [0, 0, 1, 0], [], []>} : vector<16x10xf32>, vector<32x10xf32>, vector<16x32xf32> -> vector<16x32xf32>
    %cst_288 = arith.constant 0.44721359 : f32
    %638 = vector.broadcast %cst_288 : f32 to vector<16x32xf32>
    %639 = arith.mulf %637, %638 : vector<16x32xf32>
    %640 = arith.addf %639, %6 : vector<16x32xf32>
    %cst_289 = arith.constant dense<0xFF800000> : vector<16xf32>
    %641 = vector.multi_reduction <maximumf>, %640, %cst_289 [1] : vector<16x32xf32> to vector<16xf32>
    %642 = vector.shape_cast %641 : vector<16xf32> to vector<16x1xf32>
    %643 = vector.broadcast %642 : vector<16x1xf32> to vector<16x32xf32>
    %644 = arith.subf %640, %643 : vector<16x32xf32>
    %645 = math.exp %644 : vector<16x32xf32>
    %cst_290 = arith.constant dense<0.000000e+00> : vector<16x32xf32>
    %646 = tpu.matmul %645, %5, %cst_290 {dimension_numbers = #tpu.dot_dimension_numbers<[1], [0], [0], [1], [0, 0, 1, 1], [], []>} : vector<16x32xf32>, vector<32x32xf32>, vector<16x32xf32> -> vector<16x32xf32>
    %647 = tpu.reciprocal %646 {approx = true} : vector<16x32xf32> -> vector<16x32xf32>
    %648 = arith.mulf %645, %647 : vector<16x32xf32>
    %cst_291 = arith.constant dense<0.000000e+00> : vector<16x10xf32>
    %649 = tpu.matmul %648, %636, %cst_291 {dimension_numbers = #tpu.dot_dimension_numbers<[1], [0], [0], [1], [0, 0, 1, 1], [], []>} : vector<16x32xf32>, vector<32x10xf32>, vector<16x10xf32> -> vector<16x10xf32>
    %c1264 = arith.constant 1264 : index
    %c0_292 = arith.constant 0 : index
    %650 = vector.load %arg3[%c1264, %c0_292] : memref<1480x16xf32, #tpu.memory_space<vmem>>, vector<10x10xf32>
    %cst_293 = arith.constant dense<0.000000e+00> : vector<16x10xf32>
    %651 = tpu.matmul %649, %650, %cst_293 {dimension_numbers = #tpu.dot_dimension_numbers<[1], [0], [0], [1], [0, 0, 1, 1], [], []>} : vector<16x10xf32>, vector<10x10xf32>, vector<16x10xf32> -> vector<16x10xf32>
    %c1280 = arith.constant 1280 : index
    %c0_294 = arith.constant 0 : index
    %652 = vector.load %arg3[%c1280, %c0_294] : memref<1480x16xf32, #tpu.memory_space<vmem>>, vector<1x10xf32>
    %653 = vector.broadcast %652 : vector<1x10xf32> to vector<16x10xf32>
    %654 = arith.addf %651, %653 : vector<16x10xf32>
    %655 = arith.addf %618, %654 : vector<16x10xf32>
    %cst_295 = arith.constant dense<0.000000e+00> : vector<16x1xf32>
    %656 = tpu.matmul %655, %7, %cst_295 {dimension_numbers = #tpu.dot_dimension_numbers<[1], [0], [0], [1], [0, 0, 1, 1], [], []>} : vector<16x10xf32>, vector<10x1xf32>, vector<16x1xf32> -> vector<16x1xf32>
    %cst_296 = arith.constant 1.000000e-01 : f32
    %657 = vector.broadcast %cst_296 : f32 to vector<16x1xf32>
    %658 = arith.mulf %656, %657 : vector<16x1xf32>
    %659 = arith.mulf %655, %655 : vector<16x10xf32>
    %cst_297 = arith.constant dense<0.000000e+00> : vector<16x1xf32>
    %660 = tpu.matmul %659, %7, %cst_297 {dimension_numbers = #tpu.dot_dimension_numbers<[1], [0], [0], [1], [0, 0, 1, 1], [], []>} : vector<16x10xf32>, vector<10x1xf32>, vector<16x1xf32> -> vector<16x1xf32>
    %cst_298 = arith.constant 1.000000e-01 : f32
    %661 = vector.broadcast %cst_298 : f32 to vector<16x1xf32>
    %662 = arith.mulf %660, %661 : vector<16x1xf32>
    %663 = arith.mulf %658, %658 : vector<16x1xf32>
    %664 = arith.subf %662, %663 : vector<16x1xf32>
    %665 = vector.broadcast %658 : vector<16x1xf32> to vector<16x10xf32>
    %666 = arith.subf %655, %665 : vector<16x10xf32>
    %cst_299 = arith.constant 9.99999974E-6 : f32
    %667 = vector.broadcast %cst_299 : f32 to vector<16x1xf32>
    %668 = arith.addf %664, %667 : vector<16x1xf32>
    %669 = math.rsqrt %668 : vector<16x1xf32>
    %670 = vector.broadcast %669 : vector<16x1xf32> to vector<16x10xf32>
    %671 = arith.mulf %666, %670 : vector<16x10xf32>
    %c1288 = arith.constant 1288 : index
    %c0_300 = arith.constant 0 : index
    %672 = vector.load %arg3[%c1288, %c0_300] : memref<1480x16xf32, #tpu.memory_space<vmem>>, vector<1x10xf32>
    %673 = vector.broadcast %672 : vector<1x10xf32> to vector<16x10xf32>
    %674 = arith.mulf %671, %673 : vector<16x10xf32>
    %c1296 = arith.constant 1296 : index
    %c0_301 = arith.constant 0 : index
    %675 = vector.load %arg3[%c1296, %c0_301] : memref<1480x16xf32, #tpu.memory_space<vmem>>, vector<1x10xf32>
    %676 = vector.broadcast %675 : vector<1x10xf32> to vector<16x10xf32>
    %677 = arith.addf %674, %676 : vector<16x10xf32>
    %c1304 = arith.constant 1304 : index
    %c0_302 = arith.constant 0 : index
    %678 = vector.load %arg3[%c1304, %c0_302] : memref<1480x16xf32, #tpu.memory_space<vmem>>, vector<10x10xf32>
    %cst_303 = arith.constant dense<0.000000e+00> : vector<16x10xf32>
    %679 = tpu.matmul %677, %678, %cst_303 {dimension_numbers = #tpu.dot_dimension_numbers<[1], [0], [0], [1], [0, 0, 1, 1], [], []>} : vector<16x10xf32>, vector<10x10xf32>, vector<16x10xf32> -> vector<16x10xf32>
    %c1320 = arith.constant 1320 : index
    %c0_304 = arith.constant 0 : index
    %680 = vector.load %arg3[%c1320, %c0_304] : memref<1480x16xf32, #tpu.memory_space<vmem>>, vector<1x10xf32>
    %681 = vector.broadcast %680 : vector<1x10xf32> to vector<16x10xf32>
    %682 = arith.addf %679, %681 : vector<16x10xf32>
    %c1328 = arith.constant 1328 : index
    %c0_305 = arith.constant 0 : index
    %683 = vector.load %arg3[%c1328, %c0_305] : memref<1480x16xf32, #tpu.memory_space<vmem>>, vector<10x10xf32>
    %cst_306 = arith.constant dense<0.000000e+00> : vector<24x10xf32>
    %684 = tpu.matmul %316, %683, %cst_306 {dimension_numbers = #tpu.dot_dimension_numbers<[1], [0], [0], [1], [0, 0, 1, 1], [], []>} : vector<24x10xf32>, vector<10x10xf32>, vector<24x10xf32> -> vector<24x10xf32>
    %c1344 = arith.constant 1344 : index
    %c0_307 = arith.constant 0 : index
    %685 = vector.load %arg3[%c1344, %c0_307] : memref<1480x16xf32, #tpu.memory_space<vmem>>, vector<1x10xf32>
    %686 = vector.broadcast %685 : vector<1x10xf32> to vector<24x10xf32>
    %687 = arith.addf %684, %686 : vector<24x10xf32>
    %688 = arith.mulf %687, %1 : vector<24x10xf32>
    %c1352 = arith.constant 1352 : index
    %c0_308 = arith.constant 0 : index
    %689 = vector.load %arg3[%c1352, %c0_308] : memref<1480x16xf32, #tpu.memory_space<vmem>>, vector<10x10xf32>
    %cst_309 = arith.constant dense<0.000000e+00> : vector<24x10xf32>
    %690 = tpu.matmul %316, %689, %cst_309 {dimension_numbers = #tpu.dot_dimension_numbers<[1], [0], [0], [1], [0, 0, 1, 1], [], []>} : vector<24x10xf32>, vector<10x10xf32>, vector<24x10xf32> -> vector<24x10xf32>
    %c1368 = arith.constant 1368 : index
    %c0_310 = arith.constant 0 : index
    %691 = vector.load %arg3[%c1368, %c0_310] : memref<1480x16xf32, #tpu.memory_space<vmem>>, vector<1x10xf32>
    %692 = vector.broadcast %691 : vector<1x10xf32> to vector<24x10xf32>
    %693 = arith.addf %690, %692 : vector<24x10xf32>
    %694 = arith.mulf %693, %1 : vector<24x10xf32>
    %cst_311 = arith.constant dense<0.000000e+00> : vector<16x24xf32>
    %695 = tpu.matmul %682, %688, %cst_311 {dimension_numbers = #tpu.dot_dimension_numbers<[1], [1], [0], [0], [0, 0, 1, 0], [], []>} : vector<16x10xf32>, vector<24x10xf32>, vector<16x24xf32> -> vector<16x24xf32>
    %cst_312 = arith.constant 0.44721359 : f32
    %696 = vector.broadcast %cst_312 : f32 to vector<16x24xf32>
    %697 = arith.mulf %695, %696 : vector<16x24xf32>
    %cst_313 = arith.constant dense<0xFF800000> : vector<16xf32>
    %698 = vector.multi_reduction <maximumf>, %697, %cst_313 [1] : vector<16x24xf32> to vector<16xf32>
    %699 = vector.shape_cast %698 : vector<16xf32> to vector<16x1xf32>
    %700 = vector.broadcast %699 : vector<16x1xf32> to vector<16x24xf32>
    %701 = arith.subf %697, %700 : vector<16x24xf32>
    %702 = math.exp %701 : vector<16x24xf32>
    %cst_314 = arith.constant dense<0.000000e+00> : vector<16x24xf32>
    %703 = tpu.matmul %702, %2, %cst_314 {dimension_numbers = #tpu.dot_dimension_numbers<[1], [0], [0], [1], [0, 0, 1, 1], [], []>} : vector<16x24xf32>, vector<24x24xf32>, vector<16x24xf32> -> vector<16x24xf32>
    %704 = tpu.reciprocal %703 {approx = true} : vector<16x24xf32> -> vector<16x24xf32>
    %705 = arith.mulf %702, %704 : vector<16x24xf32>
    %cst_315 = arith.constant dense<0.000000e+00> : vector<16x10xf32>
    %706 = tpu.matmul %705, %694, %cst_315 {dimension_numbers = #tpu.dot_dimension_numbers<[1], [0], [0], [1], [0, 0, 1, 1], [], []>} : vector<16x24xf32>, vector<24x10xf32>, vector<16x10xf32> -> vector<16x10xf32>
    %c1376 = arith.constant 1376 : index
    %c0_316 = arith.constant 0 : index
    %707 = vector.load %arg3[%c1376, %c0_316] : memref<1480x16xf32, #tpu.memory_space<vmem>>, vector<10x10xf32>
    %cst_317 = arith.constant dense<0.000000e+00> : vector<16x10xf32>
    %708 = tpu.matmul %706, %707, %cst_317 {dimension_numbers = #tpu.dot_dimension_numbers<[1], [0], [0], [1], [0, 0, 1, 1], [], []>} : vector<16x10xf32>, vector<10x10xf32>, vector<16x10xf32> -> vector<16x10xf32>
    %c1392 = arith.constant 1392 : index
    %c0_318 = arith.constant 0 : index
    %709 = vector.load %arg3[%c1392, %c0_318] : memref<1480x16xf32, #tpu.memory_space<vmem>>, vector<1x10xf32>
    %710 = vector.broadcast %709 : vector<1x10xf32> to vector<16x10xf32>
    %711 = arith.addf %708, %710 : vector<16x10xf32>
    %712 = arith.addf %677, %711 : vector<16x10xf32>
    %cst_319 = arith.constant dense<0.000000e+00> : vector<16x1xf32>
    %713 = tpu.matmul %712, %7, %cst_319 {dimension_numbers = #tpu.dot_dimension_numbers<[1], [0], [0], [1], [0, 0, 1, 1], [], []>} : vector<16x10xf32>, vector<10x1xf32>, vector<16x1xf32> -> vector<16x1xf32>
    %cst_320 = arith.constant 1.000000e-01 : f32
    %714 = vector.broadcast %cst_320 : f32 to vector<16x1xf32>
    %715 = arith.mulf %713, %714 : vector<16x1xf32>
    %716 = arith.mulf %712, %712 : vector<16x10xf32>
    %cst_321 = arith.constant dense<0.000000e+00> : vector<16x1xf32>
    %717 = tpu.matmul %716, %7, %cst_321 {dimension_numbers = #tpu.dot_dimension_numbers<[1], [0], [0], [1], [0, 0, 1, 1], [], []>} : vector<16x10xf32>, vector<10x1xf32>, vector<16x1xf32> -> vector<16x1xf32>
    %cst_322 = arith.constant 1.000000e-01 : f32
    %718 = vector.broadcast %cst_322 : f32 to vector<16x1xf32>
    %719 = arith.mulf %717, %718 : vector<16x1xf32>
    %720 = arith.mulf %715, %715 : vector<16x1xf32>
    %721 = arith.subf %719, %720 : vector<16x1xf32>
    %722 = vector.broadcast %715 : vector<16x1xf32> to vector<16x10xf32>
    %723 = arith.subf %712, %722 : vector<16x10xf32>
    %cst_323 = arith.constant 9.99999974E-6 : f32
    %724 = vector.broadcast %cst_323 : f32 to vector<16x1xf32>
    %725 = arith.addf %721, %724 : vector<16x1xf32>
    %726 = math.rsqrt %725 : vector<16x1xf32>
    %727 = vector.broadcast %726 : vector<16x1xf32> to vector<16x10xf32>
    %728 = arith.mulf %723, %727 : vector<16x10xf32>
    %c1400 = arith.constant 1400 : index
    %c0_324 = arith.constant 0 : index
    %729 = vector.load %arg3[%c1400, %c0_324] : memref<1480x16xf32, #tpu.memory_space<vmem>>, vector<1x10xf32>
    %730 = vector.broadcast %729 : vector<1x10xf32> to vector<16x10xf32>
    %731 = arith.mulf %728, %730 : vector<16x10xf32>
    %c1408 = arith.constant 1408 : index
    %c0_325 = arith.constant 0 : index
    %732 = vector.load %arg3[%c1408, %c0_325] : memref<1480x16xf32, #tpu.memory_space<vmem>>, vector<1x10xf32>
    %733 = vector.broadcast %732 : vector<1x10xf32> to vector<16x10xf32>
    %734 = arith.addf %731, %733 : vector<16x10xf32>
    %c1416 = arith.constant 1416 : index
    %c0_326 = arith.constant 0 : index
    %735 = vector.load %arg3[%c1416, %c0_326] : memref<1480x16xf32, #tpu.memory_space<vmem>>, vector<10x16xf32>
    %cst_327 = arith.constant dense<0.000000e+00> : vector<16x16xf32>
    %736 = tpu.matmul %734, %735, %cst_327 {dimension_numbers = #tpu.dot_dimension_numbers<[1], [0], [0], [1], [0, 0, 1, 1], [], []>} : vector<16x10xf32>, vector<10x16xf32>, vector<16x16xf32> -> vector<16x16xf32>
    %c1432 = arith.constant 1432 : index
    %c0_328 = arith.constant 0 : index
    %737 = vector.load %arg3[%c1432, %c0_328] : memref<1480x16xf32, #tpu.memory_space<vmem>>, vector<1x16xf32>
    %738 = vector.broadcast %737 : vector<1x16xf32> to vector<16x16xf32>
    %739 = arith.addf %736, %738 : vector<16x16xf32>
    %cst_329 = arith.constant 0.000000e+00 : f32
    %740 = vector.broadcast %cst_329 : f32 to vector<16x16xf32>
    %741 = arith.maximumf %739, %740 : vector<16x16xf32>
    %c1440 = arith.constant 1440 : index
    %c0_330 = arith.constant 0 : index
    %742 = vector.load %arg3[%c1440, %c0_330] : memref<1480x16xf32, #tpu.memory_space<vmem>>, vector<16x10xf32>
    %cst_331 = arith.constant dense<0.000000e+00> : vector<16x10xf32>
    %743 = tpu.matmul %741, %742, %cst_331 {dimension_numbers = #tpu.dot_dimension_numbers<[1], [0], [0], [1], [0, 0, 1, 1], [], []>} : vector<16x16xf32>, vector<16x10xf32>, vector<16x10xf32> -> vector<16x10xf32>
    %c1456 = arith.constant 1456 : index
    %c0_332 = arith.constant 0 : index
    %744 = vector.load %arg3[%c1456, %c0_332] : memref<1480x16xf32, #tpu.memory_space<vmem>>, vector<1x10xf32>
    %745 = vector.broadcast %744 : vector<1x10xf32> to vector<16x10xf32>
    %746 = arith.addf %743, %745 : vector<16x10xf32>
    %747 = arith.addf %734, %746 : vector<16x10xf32>
    %cst_333 = arith.constant dense<0.000000e+00> : vector<16x1xf32>
    %748 = tpu.matmul %747, %7, %cst_333 {dimension_numbers = #tpu.dot_dimension_numbers<[1], [0], [0], [1], [0, 0, 1, 1], [], []>} : vector<16x10xf32>, vector<10x1xf32>, vector<16x1xf32> -> vector<16x1xf32>
    %cst_334 = arith.constant 1.000000e-01 : f32
    %749 = vector.broadcast %cst_334 : f32 to vector<16x1xf32>
    %750 = arith.mulf %748, %749 : vector<16x1xf32>
    %751 = arith.mulf %747, %747 : vector<16x10xf32>
    %cst_335 = arith.constant dense<0.000000e+00> : vector<16x1xf32>
    %752 = tpu.matmul %751, %7, %cst_335 {dimension_numbers = #tpu.dot_dimension_numbers<[1], [0], [0], [1], [0, 0, 1, 1], [], []>} : vector<16x10xf32>, vector<10x1xf32>, vector<16x1xf32> -> vector<16x1xf32>
    %cst_336 = arith.constant 1.000000e-01 : f32
    %753 = vector.broadcast %cst_336 : f32 to vector<16x1xf32>
    %754 = arith.mulf %752, %753 : vector<16x1xf32>
    %755 = arith.mulf %750, %750 : vector<16x1xf32>
    %756 = arith.subf %754, %755 : vector<16x1xf32>
    %757 = vector.broadcast %750 : vector<16x1xf32> to vector<16x10xf32>
    %758 = arith.subf %747, %757 : vector<16x10xf32>
    %cst_337 = arith.constant 9.99999974E-6 : f32
    %759 = vector.broadcast %cst_337 : f32 to vector<16x1xf32>
    %760 = arith.addf %756, %759 : vector<16x1xf32>
    %761 = math.rsqrt %760 : vector<16x1xf32>
    %762 = vector.broadcast %761 : vector<16x1xf32> to vector<16x10xf32>
    %763 = arith.mulf %758, %762 : vector<16x10xf32>
    %c1464 = arith.constant 1464 : index
    %c0_338 = arith.constant 0 : index
    %764 = vector.load %arg3[%c1464, %c0_338] : memref<1480x16xf32, #tpu.memory_space<vmem>>, vector<1x10xf32>
    %765 = vector.broadcast %764 : vector<1x10xf32> to vector<16x10xf32>
    %766 = arith.mulf %763, %765 : vector<16x10xf32>
    %c1472 = arith.constant 1472 : index
    %c0_339 = arith.constant 0 : index
    %767 = vector.load %arg3[%c1472, %c0_339] : memref<1480x16xf32, #tpu.memory_space<vmem>>, vector<1x10xf32>
    %768 = vector.broadcast %767 : vector<1x10xf32> to vector<16x10xf32>
    %769 = arith.addf %766, %768 : vector<16x10xf32>
    %cst_340 = arith.constant dense<0.000000e+00> : vector<1x10xf32>
    %770 = tpu.matmul %8, %769, %cst_340 {dimension_numbers = #tpu.dot_dimension_numbers<[1], [0], [0], [1], [0, 0, 1, 1], [], []>} : vector<1x16xf32>, vector<16x10xf32>, vector<1x10xf32> -> vector<1x10xf32>
    %c0_341 = arith.constant 0 : index
    %c0_342 = arith.constant 0 : index
    %771 = vector.load %arg4[%c0_341, %c0_342] : memref<200x128xf32, #tpu.memory_space<vmem>>, vector<10x80xf32>
    %cst_343 = arith.constant dense<0.000000e+00> : vector<1x80xf32>
    %772 = tpu.matmul %770, %771, %cst_343 {dimension_numbers = #tpu.dot_dimension_numbers<[1], [0], [0], [1], [0, 0, 1, 1], [], []>} : vector<1x10xf32>, vector<10x80xf32>, vector<1x80xf32> -> vector<1x80xf32>
    %c16_344 = arith.constant 16 : index
    %c0_345 = arith.constant 0 : index
    %773 = vector.load %arg4[%c16_344, %c0_345] : memref<200x128xf32, #tpu.memory_space<vmem>>, vector<1x80xf32>
    %774 = arith.addf %772, %773 : vector<1x80xf32>
    %cst_346 = arith.constant 0.000000e+00 : f32
    %775 = vector.broadcast %cst_346 : f32 to vector<1x80xf32>
    %776 = arith.maximumf %774, %775 : vector<1x80xf32>
    %c24_347 = arith.constant 24 : index
    %c0_348 = arith.constant 0 : index
    %777 = vector.load %arg4[%c24_347, %c0_348] : memref<200x128xf32, #tpu.memory_space<vmem>>, vector<80x48xf32>
    %cst_349 = arith.constant dense<0.000000e+00> : vector<1x48xf32>
    %778 = tpu.matmul %776, %777, %cst_349 {dimension_numbers = #tpu.dot_dimension_numbers<[1], [0], [0], [1], [0, 0, 1, 1], [], []>} : vector<1x80xf32>, vector<80x48xf32>, vector<1x48xf32> -> vector<1x48xf32>
    %c104_350 = arith.constant 104 : index
    %c0_351 = arith.constant 0 : index
    %779 = vector.load %arg4[%c104_350, %c0_351] : memref<200x128xf32, #tpu.memory_space<vmem>>, vector<1x48xf32>
    %780 = arith.addf %778, %779 : vector<1x48xf32>
    %cst_352 = arith.constant 0.000000e+00 : f32
    %781 = vector.broadcast %cst_352 : f32 to vector<1x48xf32>
    %782 = arith.maximumf %780, %781 : vector<1x48xf32>
    %c112_353 = arith.constant 112 : index
    %c0_354 = arith.constant 0 : index
    %783 = vector.load %arg4[%c112_353, %c0_354] : memref<200x128xf32, #tpu.memory_space<vmem>>, vector<48x21xf32>
    %cst_355 = arith.constant dense<0.000000e+00> : vector<1x21xf32>
    %784 = tpu.matmul %782, %783, %cst_355 {dimension_numbers = #tpu.dot_dimension_numbers<[1], [0], [0], [1], [0, 0, 1, 1], [], []>} : vector<1x48xf32>, vector<48x21xf32>, vector<1x21xf32> -> vector<1x21xf32>
    %c160_356 = arith.constant 160 : index
    %c0_357 = arith.constant 0 : index
    %785 = vector.load %arg4[%c160_356, %c0_357] : memref<200x128xf32, #tpu.memory_space<vmem>>, vector<1x21xf32>
    %786 = arith.addf %784, %785 : vector<1x21xf32>
    %787 = tpu.iota {dimensions = array<i32: 1>} : vector<1x21xi32>
    %c16_i32 = arith.constant 16 : i32
    %788 = vector.broadcast %c16_i32 : i32 to vector<1x21xi32>
    %789 = arith.cmpi slt, %787, %788 : vector<1x21xi32>
    %cst_358 = arith.constant 0.000000e+00 : f32
    %790 = vector.broadcast %cst_358 : f32 to vector<1x21xf32>
    %791 = arith.maximumf %786, %790 : vector<1x21xf32>
    %792 = arith.select %789, %791, %786 : vector<1x21xi1>, vector<1x21xf32>
    %c168_359 = arith.constant 168 : index
    %c0_360 = arith.constant 0 : index
    %793 = vector.load %arg4[%c168_359, %c0_360] : memref<200x128xf32, #tpu.memory_space<vmem>>, vector<21x128xf32>
    %cst_361 = arith.constant dense<0.000000e+00> : vector<1x128xf32>
    %794 = tpu.matmul %792, %793, %cst_361 {dimension_numbers = #tpu.dot_dimension_numbers<[1], [0], [0], [1], [0, 0, 1, 1], [], []>} : vector<1x21xf32>, vector<21x128xf32>, vector<1x128xf32> -> vector<1x128xf32>
    %c192_362 = arith.constant 192 : index
    %c0_363 = arith.constant 0 : index
    %795 = vector.load %arg4[%c192_362, %c0_363] : memref<200x128xf32, #tpu.memory_space<vmem>>, vector<1x128xf32>
    %796 = arith.addf %794, %795 : vector<1x128xf32>
    %c0_364 = arith.constant 0 : index
    %c0_365 = arith.constant 0 : index
    %c0_366 = arith.constant 0 : index
    %797 = vector.load %arg6[%c0_364, %c0_365, %c0_366] : memref<1x1x128xf32, #tpu.memory_space<vmem>>, vector<1x1x128xf32>
    %798 = vector.shape_cast %797 : vector<1x1x128xf32> to vector<1x128xf32>
    %799 = vector.shape_cast %796 : vector<1x128xf32> to vector<1x1x128xf32>
    tpu.vector_store %arg6[%c0_364, %c0_365, %c0_366], %799 {strides = array<i32>} : memref<1x1x128xf32, #tpu.memory_space<vmem>>, vector<1x1x128xf32>,
    return
  }
  func.func @transform_0(%arg0: i32) -> (i32, i32, i32) {
    %c0_i32 = arith.constant 0 : i32
    %c0_i32_0 = arith.constant 0 : i32
    %c0_i32_1 = arith.constant 0 : i32
    return %arg0, %c0_i32, %c0_i32_0 : i32, i32, i32
  }
  func.func @transform_1(%arg0: i32) -> (i32, i32, i32) {
    %c0_i32 = arith.constant 0 : i32
    %c0_i32_0 = arith.constant 0 : i32
    %c0_i32_1 = arith.constant 0 : i32
    return %arg0, %c0_i32, %c0_i32_0 : i32, i32, i32
  }
  func.func @transform_2(%arg0: i32) -> (i32, i32) {
    %c0_i32 = arith.constant 0 : i32
    %c0_i32_0 = arith.constant 0 : i32
    %c0_i32_1 = arith.constant 0 : i32
    return %c0_i32, %c0_i32_0 : i32, i32
  }
  func.func @transform_3(%arg0: i32) -> (i32, i32) {
    %c0_i32 = arith.constant 0 : i32
    %c0_i32_0 = arith.constant 0 : i32
    %c0_i32_1 = arith.constant 0 : i32
    return %c0_i32, %c0_i32_0 : i32, i32
  }
  func.func @transform_4(%arg0: i32) -> (i32, i32) {
    %c0_i32 = arith.constant 0 : i32
    %c0_i32_0 = arith.constant 0 : i32
    %c0_i32_1 = arith.constant 0 : i32
    return %c0_i32, %c0_i32_0 : i32, i32
  }
  func.func @transform_5(%arg0: i32) -> (i32, i32, i32) {
    %c0_i32 = arith.constant 0 : i32
    %c0_i32_0 = arith.constant 0 : i32
    %c0_i32_1 = arith.constant 0 : i32
    return %arg0, %c0_i32, %c0_i32_0 : i32, i32, i32
  }
}

</mosaic_0001>

<bundles_post_ra>
// kernel: _lambda_.1
= control target key start
LH: loop header
LB: loop body
LE: loop exit
PB: predicated region body
PF: predicated region fallthrough
CT: control target
= control target key end

     0   :  { %10 = vsyncpa [#allocation3], 0  ;;  %s16413_s0 = inlined_call_operand.vmem [shape: f32[2,12,6], index: 0, kind: input, shape index: {}]   ;;  %s16414_s1 = inlined_call_operand.vmem [shape: f32[2,16,9], index: 1, kind: input, shape index: {}]   ;;  %s16415_s2 = inlined_call_operand.hbm [shape: f32[1480,16], index: 2, kind: input, shape index: {}]   ;;  %s16416_s3 = inlined_call_operand.hbm [shape: f32[200,128], index: 3, kind: input, shape index: {}]   ;;  %s16417_s4 = inlined_call_operand.hbm [shape: f32[208,32], index: 4, kind: input, shape index: {}]   ;;  %s16418_s5 = inlined_call_operand.vmem [shape: f32[2,1,128], index: 5, kind: output, shape index: {}]  }
   0x1   :  { %11 = vsyncpa [#allocation5], 0  ;;  %s15111_s18 = smov 0  }
   0x2 LB: > { %s15117_s19 = sadd.s32 4294967295, %s15069_s18   ;;  %p11987_p0 = scmp.ge.s32.totalorder %s15069_s18, 1  ;;  %s15069_s18 = sphi %s15111_s18, %s17_s18  }
   0x3   : > { %p163_p1 = scmp.lt.s32.totalorder %s15069_s18, 3  ;;  %p16419_p2 = scmp.eq.s32.totalorder %s15117_s19, 0 }
   0x4   : > { %s15071_s21 = smov [#allocation4]   ;;  %s15072_s23 = smov [#allocation2]  }
   0x5   : > { %p15122_p3 = pnand %p11987_p0, %p163_p1  ;;  %s188_s22 = sshll.u32 %s15071_s21, 4  ;;  %s189_s22 = int_to_ptr.vmem [resolvable:$true] %s188_s22 }
   0x6   : > { %s175_s24 = sshll.u32 %s15072_s23, 4  ;;  %s15073_s26 = smov [#allocation6]   ;;  %s15134_s24 = int_to_ptr.vmem [resolvable:$true] %s175_s24 }
   0x7   : > { %s16421_s20 = scalar_select %p15122_p3, 1, 0 }
   0x8   : > { %p14782_p4 = pneg %p15122_p3  ;;  %s201_s27 = sshll.u32 %s15073_s26, 4  ;;  %s15136_s27 = int_to_ptr.vmem [resolvable:$true] %s201_s27 }
   0x9   : > { %s14971_s30 = scalar_lea.hbm %s16416_s3, 3200 }
   0xa   : > { %p15130_p5 = pnand %p16419_p2, %p14782_p4  ;;  %p14972_p6 = scmp.ne.s32.totalorder %s16416_s3, %s14971_s30 }
   0xb   : > { %p14978_p10 = scmp.lt.u32.totalorder %s14971_s30, %s16416_s3 }
   0xc   : > { %p15146_p7 = pneg %p15130_p5 }
   0xe   : > { %p14974_p8 = pnand %p15146_p7, %p14972_p6 }
  0x10   : > { %p14975_p9 = pneg %p14974_p8 }
  0x12   : > { %p14980_p11 = pnand %p14978_p10, %p14975_p9 }
  0x14   : > { %14983 = shalt.err (!%p14980_p11)
}
  0x15   : > { %s14984_s11 = scalar_lea.vmem %s189_s22, 3200  ;;  %p14992_p1 = scmp.lt.s32.totalorder %s189_s22, %s189_s22 }
  0x16   : > { %p14985_p12 = scmp.ne.s32.totalorder %s189_s22, %s14984_s11  ;;  %p14993_p4 = scmp.lt.s32.totalorder %s14984_s11, %s14984_s11 }
  0x18   : > { %p14987_p13 = pnand %p14985_p12, %p15146_p7  ;;  %p14994_p2 = por %p14993_p4, %p14992_p1 }
  0x1a   : > { %p14988_p0 = pneg %p14987_p13 }
  0x1c   : > { %p14995_p3 = pnand %p14994_p2, %p14988_p0 }
  0x1e   : > { %14998 = shalt.err (!%p14995_p3)
}
  0x1f   : > { %s15074_s12 = smov 128   ;;  %s15075_s13 = smov 8  }
  0x20   : > { %14788 = dma.hbm_to_vmem [thread:$0]  (!%p15130_p5), %s16416_s3, 3200, %s189_s22, [#allocation5], %s15074_s12, %s15074_s12, %s15075_s13  }
  0x21   : > { %s14999_s21 = scalar_lea.hbm %s16415_s2, 23680 }
  0x22   : > { %p15000_p2 = scmp.ne.s32.totalorder %s16415_s2, %s14999_s21  ;;  %p15006_p8 = scmp.lt.u32.totalorder %s14999_s21, %s16415_s2 }
  0x24   : > { %p15002_p3 = pnand %p15000_p2, %p15146_p7 }
  0x26   : > { %p15003_p6 = pneg %p15002_p3 }
  0x28   : > { %p15008_p9 = pnand %p15006_p8, %p15003_p6 }
  0x2a   : > { %15011 = shalt.err (!%p15008_p9)
}
  0x2b   : > { %s15012_s22 = scalar_lea.vmem %s15134_s24, 23680  ;;  %p15020_p13 = scmp.lt.s32.totalorder %s15134_s24, %s15134_s24 }
  0x2c   : > { %p15013_p10 = scmp.ne.s32.totalorder %s15134_s24, %s15012_s22  ;;  %p15021_p0 = scmp.lt.s32.totalorder %s15012_s22, %s15012_s22 }
  0x2e   : > { %p15015_p11 = pnand %p15013_p10, %p15146_p7  ;;  %p15022_p1 = por %p15021_p0, %p15020_p13 }
  0x30   : > { %p15016_p12 = pneg %p15015_p11 }
  0x32   : > { %p15023_p4 = pnand %p15022_p1, %p15016_p12 }
  0x34   : > { %15026 = shalt.err (!%p15023_p4)
}
  0x35   : > { %14785 = dma.hbm_to_vmem [thread:$0]  (!%p15130_p5), %s16415_s2, 23680, %s15134_s24, [#allocation3], %s15074_s12, %s15074_s12, %s15075_s13  }
  0x36   : > { %s15027_s10 = scalar_lea.hbm %s16417_s4, 3328 }
  0x37   : > { %p15028_p2 = scmp.ne.s32.totalorder %s16417_s4, %s15027_s10  ;;  %p15034_p8 = scmp.lt.u32.totalorder %s15027_s10, %s16417_s4 }
  0x39   : > { %p15030_p3 = pnand %p15028_p2, %p15146_p7 }
  0x3b   : > { %p15031_p6 = pneg %p15030_p3 }
  0x3d   : > { %p15036_p9 = pnand %p15034_p8, %p15031_p6 }
  0x3f   : > { %15039 = shalt.err (!%p15036_p9)
}
  0x40   : > { %s15040_s24 = scalar_lea.vmem %s15136_s27, 3328  ;;  %p15048_p13 = scmp.lt.s32.totalorder %s15136_s27, %s15136_s27 }
  0x41   : > { %p15041_p10 = scmp.ne.s32.totalorder %s15136_s27, %s15040_s24  ;;  %p15049_p0 = scmp.lt.s32.totalorder %s15040_s24, %s15040_s24 }
  0x43   : > { %p15043_p11 = pnand %p15041_p10, %p15146_p7  ;;  %p15050_p1 = por %p15049_p0, %p15048_p13 }
  0x45   : > { %p15044_p12 = pneg %p15043_p11 }
  0x47   : > { %p15051_p4 = pnand %p15050_p1, %p15044_p12 }
  0x49   : > { %15054 = shalt.err (!%p15051_p4)
}
  0x4a   : > { %14791 = dma.hbm_to_vmem [thread:$0]  (!%p15130_p5), %s16417_s4, 3328, %s15136_s27, [#allocation5], %s15074_s12, %s15074_s12, %s15075_s13  }
  0x4b   : > { %p16424_p2 = scmp.ne.s32.totalorder %s16421_s20, 0 }
  0x4c   : > { %p16425_p7 = scmp.eq.s32.totalorder (!%p16424_p2), %s15117_s19, 0 }
  0x4d   : > { %233 = sbr.rel (%p16424_p2) target bundleno = 22202 (0x56ba), region = 40 }
  0x54   : > { %15060 = dma.done.wait (%p16425_p7), [#allocation3], 23680   ;;  %p16426_p3 = pmov %p16425_p7 }
  0x56   : > { %15062 = vsyncadd (%p16426_p3), [#allocation3], 4294943616  ;;  %p16427_p6 = pmov %p16426_p3 }
  0x57   : > { %p16428_p8 = pmov %p16426_p3 }
  0x58   : > { %15064 = dma.done.wait (%p16427_p6), [#allocation5], 6528  }
  0x59   : > { %15066 = vsyncadd (%p16428_p8), [#allocation5], 4294960768  ;;  %p272_p9 = scmp.lt.s32.totalorder %s15117_s19, 1  ;;  %vm326_vm0 = vcmask 1045504   ;;  %vm319_vm1 = vcmask 48128   ;;  %vm512_vm2 = vcmask 1040384  }
  0x5a   : > { %v313_v0 = vld [vmem:[#allocation2] sm:$0x3f]  ;;  %v498_v3 = vld [vmem:[#allocation2 + $0x28] sm:$0xff]  ;;  %v499_v4 = vld [vmem:[#allocation2 + $0x30] sm:$0x1]  ;;  %vm15076_vm3 = vmmov 1  }
  0x5b   : > { %s16436_s19 = smov (!%p272_p9, %s15117_s19), 1  ;;  %13028 = vmatprep.subr.msk.mxu0 %vm326_vm0, %v313_v0  ;;  %vm14099_vm4 = vmpackc.low %vm512_vm2, %vm15076_vm3  ;;  %v14098_v5 = vpack.c.bf16 %v499_v4, %v498_v3  ;;  %vm505_vm5 = vcmask 72704   ;;  %v407_v8 = vld [vmem:[#allocation2 + $0x10] sm:$0xff]  ;;  %v408_v9 = vld [vmem:[#allocation2 + $0x18] sm:$0xff]  ;;  %vm414_vm6 = vcmask 130048   ;;  %vm788_vm7 = vcmask 1041408  }
  0x5c   : > { %s12465_s20 = sshll.u32 %s16436_s19, 4  ;;  %13029 = vmatpush3.msk.msra.mxu0 %vm326_vm0, %v313_v0  ;;  %v14094_v10 = vpack.c.bf16 %v408_v9, %v407_v8  ;;  %v593_v11 = vld [vmem:[#allocation2 + $0x40] sm:$0xff]  ;;  %v594_v12 = vld [vmem:[#allocation2 + $0x48] sm:$0xff]  ;;  %v12007_v21 = vld [vmem:[#allocation2 + $0x38] ss:$0 sm:$0xff]  ;;  %v15077_v32 = vmov 0.0|0.0   ;;  %s284_s29 = scalar_lea.vmem %s16418_s5, %s16436_s19 }
  0x5d   : > { %s276_s8 = scalar_lea.vmem %s16413_s0, %s12465_s20  ;;  %14100 = vmatprep.subr.msk.bf16.mxu0 %vm14099_vm4, %v14098_v5  ;;  %s281_s23 = scalar_lea.vmem %s16414_s1, %s12465_s20  ;;  %v14104_v13 = vpack.c.bf16 %v594_v12, %v593_v11  ;;  %v12000_v14 = vld [vmem:[#allocation2 + $0x8] ss:$0 sm:$0xff]  ;;  %vm15242_vm8 = vmpackc.low %vm788_vm7, %vm15076_vm3  ;;  %v775_v29 = vld [vmem:[#allocation2 + $0x58] sm:$0xff]  ;;  %vm15078_vm9 = vmmov 0   ;;  %v15079_v33 = vmov 0.0   ;;  %vm691_vm10 = vcmask 1043456  }
  0x5e   : > { %v311_v1 = vld [vmem:[%s276_s8] sm:$0xff]  ;;  %v312_v2 = vld [vmem:[%s276_s8 + $0x8] sm:$0xf]  ;;  %14095 = vmatprep.subr.bf16.mxu1 %v14094_v10  ;;  %vm782_vm11 = vcmask 80896   ;;  %vm15261_vm12 = vmpackc.low %vm691_vm10, %vm15076_vm3  ;;  %vm681_vm13 = vcmask 97280   ;;  %vm1154_vm15 = vcmask 195584  }
  0x5f   : > { %13030 = vmatprep.mubr.msk.f32.mxu0 %vm319_vm1, %v311_v1  ;;  %v497_v6 = vld [vmem:[%s281_s23 + $0x8] sm:$0xff]  ;;  %v496_v7 = vld [vmem:[%s281_s23] sm:$0xff]  ;;  %14097 = vmatpush3.bf16.msra.mxu1 %v14094_v10  ;;  %v15273_v41 = vld [vmem:[#allocation6] sm:$0xff]  ;;  %vm1158_vm0 = vcmask 191488   ;;  %vm11651_vm2 = vcmask 654336   ;;  %vm11733_vm3 = vcmask 392192  }
  0x60   : > { %13031 = vmatmul.mubr.msk.f32.vlgmr.msra.gmra.mrb[0].mxu0 %vm319_vm1, %v312_v2  ;;  %14105 = vmatprep.subr.bf16.mxu1 %v14104_v13  ;;  %v776_v30 = vld [vmem:[#allocation2 + $0x60] sm:$0x3]  ;;  %v15282_v42 = vld [vmem:[#allocation6 + $0x8] sm:$0xff]  ;;  %v867_v46 = vld [vmem:[#allocation2 + $0x70] sm:$0xff]  ;;  %vm5303_vm1 = vcmask 261120  }
  0x61   : > { %14103 = vmatpush3.bf16.msk.msra.mxu0 %vm14099_vm4, %v14098_v5  ;;  %13044 = vmatprep.mubr.msk.f32.mxu0 %vm505_vm5, %v496_v7  ;;  %v14112_v31 = vpack.c.bf16 %v776_v30, %v775_v29  ;;  %v12004_v34 = vld [vmem:[#allocation2 + $0x20] ss:$0 sm:$0xff]  ;;  %v868_v47 = vld [vmem:[#allocation2 + $0x78] sm:$0x3]  ;;  %v969_v48 = vld [vmem:[#allocation2 + $0x88] sm:$0xff]  ;;  %vm11820_vm4 = vcmask 1044480  }
  0x62   : > { %14108 = vmatprep.subr.bf16.mxu0 %v15077_v32  ;;  %v15288_v43 = vld [vmem:[#allocation6 + $0x10] sm:$0xff]  ;;  %v14119_v49 = vpack.c.bf16 %v868_v47, %v867_v46  ;;  %v970_v50 = vld [vmem:[#allocation2 + $0x90] sm:$0x3]  ;;  %v12018_v52 = vld [vmem:[#allocation2 + $0x68] ss:$0 sm:$0xff] }
  0x63   : > { %v14123_v51 = vpack.c.bf16 %v970_v50, %v969_v48  ;;  %v12022_v63 = vld [vmem:[#allocation2 + $0x80] ss:$0 sm:$0xff]  ;;  %v12027_v1 = vld [vmem:[#allocation2 + $0x98] ss:$0 sm:$0xff]  ;;  %v15317_v7 = vld [vmem:[#allocation6 + $0x18] sm:$0xff] }
  0x64   : > { %13045 = vmatmul.mubr.msk.f32.vlgmr.msra.gmra.mrb[2].mxu0 %vm505_vm5, %v497_v6  ;;  %v15319_v8 = vld [vmem:[#allocation6 + $0x20] sm:$0xff]  ;;  %vm15327_vm14 = vmpackc.low %vm782_vm11, %vm782_vm11  ;;  %v291_v48 = vld [vmem:[#allocation6 + $0x30] sm:$0xff] }
  0x65   : > { %13058 = vmatprep.mubr.msk.f32.mxu0 %vm15078_vm9, %v15079_v33  ;;  %v310_v27 = vld [vmem:[#allocation6 + $0xc8] sm:$0x1] }
 0x133   : > { %v13032_v15 = vpop.f32.mrb[0].mxu0 }
 0x134   : > { %v402_v16 = vadd.f32 %v13032_v15, %v12000_v14  ;;  %v396_v17 = vpop.f32.mrb[1].mxu0 }
 0x135   : > { %v397_v18 = vadd.f32 %v12000_v14, %v396_v17 }
 0x136   : > { %v406_v20 = vmax.f32 %v402_v16, 0.0 }
 0x137   : > { %v405_v19 = vmax.f32 %v397_v18, 0.0  ;;  %v13046_v22 = vpop.f32.mrb[2].mxu0 }
 0x138   : > { %v588_v23 = vadd.f32 %v13046_v22, %v12007_v21  ;;  %v582_v24 = vpop.f32.mrb[3].mxu0 }
 0x139   : > { %13037 = vmatprep.mubr.msk.f32.mxu1 %vm414_vm6, %v405_v19  ;;  %v583_v25 = vadd.f32 %v12007_v21, %v582_v24 }
 0x13a   : > { %13038 = vmatmul.mubr.msk.f32.vlgmr.msra.gmra.mrb[0].mxu1 %vm414_vm6, %v406_v20  ;;  %v592_v26 = vmax.f32 %v588_v23, 0.0  ;;  %v15331_v20 = vld [vmem:[#allocation6 + $0x28] sm:$0xff] }
 0x13b   : > { %14107 = vmatpush3.bf16.msra.mxu1 %v14104_v13  ;;  %v591_v28 = vmax.f32 %v583_v25, 0.0 }
 0x13c   : > { %14114 = vmatprep.subr.msk.bf16.mxu1 %vm15242_vm8, %v14112_v31 }
 0x13d   : > { %13051 = vmatprep.mubr.msk.f32.mxu1 %vm414_vm6, %v591_v28 }
 0x13e   : > { %13052 = vmatmul.mubr.msk.f32.vlgmr.msra.gmra.mrb[2].mxu1 %vm414_vm6, %v592_v26 }
 0x13f   : > { %14117 = vmatpush3.bf16.msk.msra.mxu1 %vm15242_vm8, %v14112_v31 }
 0x140   : > { %14118 = vmatprep.subr.bf16.mxu1 %v15077_v32 }
 0x20d   : > { %v13039_v35 = vpop.f32.mrb[0].mxu1 }
 0x20e   : > { %v15256_v36 = vadd.f32 %v13039_v35, %v12004_v34  ;;  %v487_v37 = vpop.f32.mrb[1].mxu1 }
 0x20f   : > { %v15258_v38 = vadd.f32 %v12004_v34, %v487_v37 }
 0x211   : > { %v14109_v40 = vpack.c.bf16 %v15256_v36, %v15258_v38  ;;  %13071 = vmatprep.mubr.msk.f32.mxu1 %vm782_vm11, %v15258_v38  ;;  %v15294_v44 = vpop.f32.mrb[2].mxu1 }
 0x212   : > { %13072 = vmatmul.mubr.msk.f32.vlgmr.msra.gmra.mrb[4].mxu1 %vm782_vm11, %v15256_v36  ;;  %v15296_v45 = vpop.f32.mrb[3].mxu1 }
 0x213   : > { %14111 = vmatpush3.bf16.msk.msra.mxu0 %vm15261_vm12, %v14109_v40  ;;  %13078 = vmatprep.mubr.msk.f32.mxu1 %vm15078_vm9, %v15079_v33 }
 0x214   : > { %14122 = vmatprep.subr.bf16.mxu0 %v15077_v32  ;;  %14121 = vmatpush3.bf16.msk.msra.mxu1 %vm15242_vm8, %v14119_v49  ;;  %v292_v49 = vld [vmem:[#allocation6 + $0x38] sm:$0xff] }
 0x215   : > { %v15344_v50 = vpack.c.bf16 %v292_v49, %v291_v48  ;;  %v1644_v49 = vld [vmem:[#allocation2 + $0xc8] sm:$0xff] }
 0x216   : > { %13059 = vmatmul.mubr.msk.f32.vlgmr.msra.gmra.mrb[4].mxu0 %vm681_vm13, %v15273_v41 }
 0x217   : > { %13061 = vmatprep.mubr.msk.f32.mxu0 %vm15078_vm9, %v15079_v33  ;;  %14125 = vmatpush3.bf16.msk.msra.mxu0 %vm15242_vm8, %v14123_v51  ;;  %v15346_v51 = vld [vmem:[#allocation6 + $0x40] sm:$0xff] }
 0x218   : > { %14133 = vmatprep.subr.bf16.mxu0 %v15344_v50 }
 0x21a   : > { %13062 = vmatmul.mubr.msk.f32.gmra.mrb[6].mxu0 %vm681_vm13, %v15282_v42 }
 0x21b   : > { %13064 = vmatprep.mubr.msk.f32.mxu0 %vm15078_vm9, %v15079_v33 }
 0x21e   : > { %13065 = vmatmul.mubr.msk.f32.gmra.mrb[8].mxu0 %vm681_vm13, %v15288_v43 }
 0x21f   : > { %13091 = vmatprep.mubr.msk.f32.mxu0 %vm15078_vm9, %v15079_v33 }
 0x2e5   : > { %v13073_v53 = vpop.f32.mrb[4].mxu1 }
 0x2e6   : > { %v864_v54 = vadd.f32 %v13073_v53, %v12018_v52  ;;  %v858_v55 = vpop.f32.mrb[5].mxu1 }
 0x2e7   : > { %v859_v60 = vadd.f32 %v12018_v52, %v858_v55 }
 0x2e9   : > { %v761_v56 = vpop.f32.mrb[4].mxu0 }
 0x2ea   : > { %v13060_v57 = vpop.f32.mrb[5].mxu0  ;;  %13079 = vmatmul.mubr.msk.f32.vlgmr.msra.gmra.mrb[6].mxu1 %vm782_vm11, %v761_v56  ;;  %13092 = vmatmul.mubr.msk.f32.vlgmr.msra.gmra.mrb[10].mxu0 %vm782_vm11, %v761_v56 }
 0x2eb   : > { %13081 = vmatprep.mubr.msk.f32.mxu1 %vm15078_vm9, %v15079_v33  ;;  %13094 = vmatprep.mubr.msk.f32.mxu0 %vm15078_vm9, %v15079_v33 }
 0x2ec   : > { %14135 = vmatpush3.bf16.msra.mxu0 %v15344_v50 }
 0x2ed   : > { %v766_v58 = vpop.f32.mrb[6].mxu0  ;;  %13113 = vmatprep.subr.mxu0 %v15346_v51 }
 0x2ee   : > { %v13063_v59 = vpop.f32.mrb[7].mxu0  ;;  %13082 = vmatmul.mubr.msk.f32.gmra.mrb[8].mxu1 %vm782_vm11, %v766_v58  ;;  %13095 = vmatmul.mubr.msk.f32.gmra.mrb[12].mxu0 %vm782_vm11, %v766_v58 }
 0x2ef   : > { %13084 = vmatprep.mubr.msk.f32.mxu1 %vm15078_vm9, %v15079_v33  ;;  %13097 = vmatprep.mubr.msk.f32.mxu0 %vm15078_vm9, %v15079_v33 }
 0x2f0   : > { %13114 = vmatpush3.msra.mxu0 %v15346_v51 }
 0x2f1   : > { %v771_v61 = vpop.f32.mrb[8].mxu0 }
 0x2f2   : > { %13085 = vmatmul.mubr.msk.f32.gmra.mrb[10].mxu1 %vm782_vm11, %v771_v61  ;;  %v13066_v62 = vpop.f32.mrb[9].mxu0  ;;  %13098 = vmatmul.mubr.msk.f32.gmra.mrb[14].mxu0 %vm782_vm11, %v771_v61  ;;  %v1335_v61 = vld [vmem:[#allocation2 + $0xa8] sm:$0x3] }
 0x2f3   : > { %13106 = vmatprep.mubr.msk.f32.mxu1 %vm782_vm11, %v859_v60  ;;  %v1334_v60 = vld [vmem:[#allocation2 + $0xa0] sm:$0xff] }
 0x2f4   : > { %v14140_v62 = vpack.c.bf16 %v1335_v61, %v1334_v60 }
 0x2f6   : > { %14142 = vmatprep.subr.msk.bf16.mxu0 %vm15242_vm8, %v14140_v62 }
 0x3bd   : > { %v952_v0 = vpop.f32.mrb[6].mxu1  ;;  %v1045_v2 = vpop.f32.mrb[10].mxu0 }
 0x3be   : > { %v13080_v3 = vpop.f32.mrb[7].mxu1  ;;  %v13093_v4 = vpop.f32.mrb[11].mxu0  ;;  %v953_v5 = vadd.f32 %v12022_v63, %v952_v0  ;;  %v1046_v6 = vadd.f32 %v12027_v1, %v1045_v2 }
 0x3c0   : > { %v966_v15 = vmul.f32 %v953_v5, %v15317_v7  ;;  %v1059_v16 = vmul.f32 %v1046_v6, %v15317_v7 }
 0x3c1   : > { %v957_v9 = vpop.f32.mrb[8].mxu1  ;;  %v1050_v10 = vpop.f32.mrb[12].mxu0 }
 0x3c2   : > { %v958_v11 = vadd.f32 %v12022_v63, %v957_v9  ;;  %v1051_v12 = vadd.f32 %v12027_v1, %v1050_v10  ;;  %v13083_v13 = vpop.f32.mrb[9].mxu1  ;;  %v13096_v14 = vpop.f32.mrb[13].mxu0  ;;  %v308_v9 = vld [vmem:[#allocation6 + $0xb8] sm:$0xff]  ;;  %v309_v10 = vld [vmem:[#allocation6 + $0xc0] sm:$0x3] }
 0x3c4   : > { %v967_v17 = vmul.f32 %v958_v11, %v15319_v8  ;;  %v1060_v18 = vmul.f32 %v1051_v12, %v15319_v8  ;;  %v15362_v11 = vpack.c.bf16 %v309_v10, %v308_v9  ;;  %v12041_v12 = vld [vmem:[#allocation2 + $0xb0] ss:$0 sm:$0xff]  ;;  %v12053_v9 = vld [vmem:[#allocation2 + $0xd8] ss:$0 sm:$0xff] }
 0x3c5   : > { %v962_v21 = vpop.f32.mrb[10].mxu1  ;;  %v1055_v22 = vpop.f32.mrb[14].mxu0 }
 0x3c6   : > { %v14126_v23 = vpack.c.bf16 %v967_v17, %v966_v15  ;;  %v963_v24 = vadd.f32 %v12022_v63, %v962_v21  ;;  %v13086_v25 = vpop.f32.mrb[11].mxu1  ;;  %v13099_v26 = vpop.f32.mrb[15].mxu0  ;;  %v14136_v28 = vpack.c.bf16 %v1060_v18, %v1059_v16  ;;  %v1056_v30 = vadd.f32 %v12027_v1, %v1055_v22 }
 0x3c8   : > { %14128 = vmatprep.subr.msk.bf16.mxu1 %vm15327_vm14, %v14126_v23  ;;  %v968_v29 = vmul.f32 %v963_v24, %v15331_v20  ;;  %v1061_v31 = vmul.f32 %v1056_v30, %v15331_v20 }
 0x3c9   : > { %14131 = vmatpush3.bf16.xpose.msk.msra.mxu1 %vm15327_vm14, %v14126_v23  ;;  %v15080_v23 = vmov 0  }
 0x3ca   : > { %13104 = vmatprep.subr.msk.mxu1 %vm782_vm11, %v968_v29  ;;  %14816 = vset.pattern.permute.xlu1 %v15080_v23 }
 0x3cb   : > { %14817 = vset.pattern.permute.xlu0 %v15080_v23 }
 0x3d1   : > { %13105 = vmatpush3.xpose.msk.msra.mxu1 %vm782_vm11, %v968_v29 }
 0x3d2   : > { %14137 = vmatprep.subr.bf16.mxu1 %v14136_v28 }
 0x3d4   : > { %13107 = vmatmul.mubr.msk.f32.vlgmr.msra.gmra.mrb[12].mxu1 %vm782_vm11, %v864_v54 }
 0x3d5   : > { %14139 = vmatpush3.bf16.msra.mxu1 %v14136_v28 }
 0x3d6   : > { %13122 = vmatprep.subr.mxu1 %v1061_v31 }
 0x3d9   : > { %13123 = vmatpush3.msra.mxu1 %v1061_v31 }
 0x3da   : > { %14148 = vmatprep.subr.msk.bf16.mxu1 %vm15242_vm8, %v15362_v11 }
 0x4a7   : > { %v13108_v34 = vpop.f32.mrb[12].mxu1 }
 0x4a8   : > { %v1143_v35 = vpop.f32.mrb[13].mxu1  ;;  %v1153_v40 = vmul.f32 0.4472136, %v13108_v34 }
 0x4a9   : > { %v1152_v37 = vmul.f32 0.4472136, %v1143_v35 }
 0x4aa   : > { %v1159_v47 = vsel %vm1158_vm0, %v1153_v40, -inf }
 0x4ab   : > { %v1155_v46 = vsel %vm1154_vm15, %v1152_v37, -inf }
 0x4ac   : > { %1156 = vmax.xlane.f32.xlu0 %v1155_v46 }
 0x4b0   : > { %1160 = vmax.xlane.f32.xlu0 %v1159_v47 }
 0x539   : > { %v1157_v52 = vpop.xlane.xlu0 %1156 }
 0x53a   : > { %v1162_v53 = vsub.f32 %v1152_v37, %v1157_v52  ;;  %v1645_v52 = vld [vmem:[#allocation2 + $0xd0] sm:$0x3] }
 0x53c   : > { %v1164_v54 = vmul.f32 1.442695, %v1162_v53  ;;  %v14158_v53 = vpack.c.bf16 %v1645_v52, %v1644_v49 }
 0x53d   : > { %v1161_v55 = vpop.xlane.xlu0 %1160 }
 0x53e   : > { %14818 = vpow2.f32 %v1164_v54  ;;  %v1163_v56 = vsub.f32 %v1153_v40, %v1161_v55 }
 0x540   : > { %v1166_v57 = vmul.f32 1.442695, %v1163_v56 }
 0x542   : > { %14820 = vpow2.f32 %v1166_v57 }
 0x548   : > { %v14819_v58 = vpop.eup %14818 }
 0x549   : > { %13115 = vmatprep.mubr.msk.f32.mxu0 %vm1154_vm15, %v14819_v58 }
 0x54c   : > { %v14821_v59 = vpop.eup %14820 }
 0x54d   : > { %13116 = vmatmul.mubr.msk.f32.vlgmr.msra.gmra.mrb[16].mxu0 %vm1154_vm15, %v14821_v59 }
 0x54e   : > { %14145 = vmatpush3.bf16.msk.msra.mxu0 %vm15242_vm8, %v14140_v62 }
 0x54f   : > { %14154 = vmatprep.subr.msk.bf16.mxu0 %vm15242_vm8, %v15362_v11 }
 0x620   : > { %v13117_v63 = vpop.f32.mrb[16].mxu0 }
 0x621   : > { %14822 = vrcp.f32 %v13117_v63  ;;  %v1240_v0 = vpop.f32.mrb[17].mxu0  ;;  %v12052_v63 = vld [vmem:[#allocation2 + $0xc0] ss:$0 sm:$0xff] }
 0x622   : > { %14824 = vrcp.f32 %v1240_v0 }
 0x62b   : > { %v14823_v1 = vpop.eup %14822 }
 0x62c   : > { %v14825_v2 = vpop.eup %14824  ;;  %v1252_v4 = vmul.f32 %v14823_v1, %v14821_v59 }
 0x62d   : > { %v1251_v3 = vmul.f32 %v14825_v2, %v14819_v58  ;;  %v12051_v58 = vld [vmem:[#allocation2 + $0xb8] ss:$0 sm:$0xff] }
 0x62f   : > { %13124 = vmatprep.mubr.msk.f32.mxu1 %vm1154_vm15, %v1251_v3 }
 0x630   : > { %13125 = vmatmul.mubr.msk.f32.vlgmr.msra.gmra.mrb[14].mxu1 %vm1154_vm15, %v1252_v4  ;;  %v1737_v4 = vld [vmem:[#allocation2 + $0xe0] sm:$0xff] }
 0x631   : > { %14151 = vmatpush3.bf16.msk.msra.mxu1 %vm15242_vm8, %v15362_v11 }
 0x632   : > { %14160 = vmatprep.subr.msk.bf16.mxu1 %vm15242_vm8, %v14158_v53 }
 0x703   : > { %v13126_v5 = vpop.f32.mrb[14].mxu1 }
 0x704   : > { %v1325_v6 = vpop.f32.mrb[15].mxu1 }
 0x705   : > { %13131 = vmatprep.mubr.msk.f32.mxu0 %vm782_vm11, %v1325_v6 }
 0x706   : > { %13132 = vmatmul.mubr.msk.f32.vlgmr.msra.gmra.mrb[18].mxu0 %vm782_vm11, %v13126_v5  ;;  %v1738_v5 = vld [vmem:[#allocation2 + $0xe8] sm:$0xff] }
 0x707   : > { %14157 = vmatpush3.bf16.msk.msra.mxu0 %vm15242_vm8, %v15362_v11  ;;  %v14164_v6 = vpack.c.bf16 %v1738_v5, %v1737_v4 }
 0x709   : > { %14165 = vmatprep.subr.bf16.mxu0 %v14164_v6 }
 0x7d9   : > { %v13133_v13 = vpop.f32.mrb[18].mxu0 }
 0x7da   : > { %v1422_v14 = vadd.f32 %v13133_v13, %v12041_v12  ;;  %v1416_v15 = vpop.f32.mrb[19].mxu0 }
 0x7db   : > { %v1417_v16 = vadd.f32 %v12041_v12, %v1416_v15 }
 0x7dc   : > { %v1426_v17 = vadd.f32 %v1422_v14, %v15256_v36 }
 0x7dd   : > { %v1425_v18 = vadd.f32 %v1417_v16, %v15258_v38 }
 0x7de   : > { %v1514_v22 = vmul.f32 %v1426_v17, %v1426_v17 }
 0x7df   : > { %v1513_v21 = vmul.f32 %v1425_v18, %v1425_v18  ;;  %13138 = vmatprep.mubr.msk.f32.mxu1 %vm782_vm11, %v1425_v18 }
 0x7e0   : > { %13139 = vmatmul.mubr.msk.f32.vlgmr.msra.gmra.mrb[16].mxu1 %vm782_vm11, %v1426_v17 }
 0x7e1   : > { %13145 = vmatprep.mubr.msk.f32.mxu0 %vm782_vm11, %v1513_v21  ;;  %14163 = vmatpush3.bf16.msk.msra.mxu1 %vm15242_vm8, %v14158_v53 }
 0x7e2   : > { %13146 = vmatmul.mubr.msk.f32.vlgmr.msra.gmra.mrb[20].mxu0 %vm782_vm11, %v1514_v22  ;;  %14170 = vmatprep.subr.msk.bf16.mxu1 %vm15242_vm8, %v15362_v11 }
 0x7e3   : > { %14167 = vmatpush3.bf16.msra.mxu0 %v14164_v6 }
 0x7e4   : > { %14176 = vmatprep.subr.msk.bf16.mxu0 %vm15242_vm8, %v15362_v11 }
 0x8b3   : > { %v13140_v24 = vpop.f32.mrb[16].mxu1 }
 0x8b4   : > { %v1512_v25 = vmul.f32 0.1, %v13140_v24  ;;  %v1502_v26 = vpop.f32.mrb[17].mxu1 }
 0x8b5   : > { %v1511_v28 = vmul.f32 0.1, %v1502_v26  ;;  %v13147_v36 = vpop.f32.mrb[20].mxu0 }
 0x8b6   : > { %v1599_v29 = vmul.f32 %v1512_v25, %v1512_v25  ;;  %v1597_v38 = vmul.f32 0.1, %v13147_v36  ;;  %v1587_v30 = vpop.f32.mrb[21].mxu0  ;;  %1609 = vperm.xlu1 %14816, %v1512_v25  }
 0x8b7   : > { %v1598_v31 = vmul.f32 %v1511_v28, %v1511_v28  ;;  %v1596_v34 = vmul.f32 0.1, %v1587_v30 }
 0x8b8   : > { %v1601_v35 = vsub.f32 %v1597_v38, %v1599_v29 }
 0x8b9   : > { %v1600_v37 = vsub.f32 %v1596_v34, %v1598_v31 }
 0x8ba   : > { %v1615_v40 = vadd.f32 1e-05, %v1601_v35  ;;  %1604 = vperm.xlu1 %14816, %v1511_v28  }
 0x8bb   : > { %v1614_v46 = vadd.f32 1e-05, %v1600_v37 }
 0x8bc   : > { %14826 = vrsqrt.f32 %v1615_v40 }
 0x8bd   : > { %14828 = vrsqrt.f32 %v1614_v46 }
 0x8c6   : > { %v14827_v47 = vpop.eup %14826 }
 0x8c7   : > { %v14829_v48 = vpop.eup %14828  ;;  %1625 = vperm.xlu1 %14816, %v14827_v47  }
 0x8c8   : > { %1620 = vperm.xlu0 %14817, %v14829_v48  }
 0x935   : > { %v1610_v54 = vpop.permute.xlu1 %1609 }
 0x936   : > { %v1613_v56 = vsub.f32 %v1426_v17, %v1610_v54  ;;  %v12057_v17 = vld [vmem:[#allocation2 + $0xf0] ss:$0 sm:$0xff] }
 0x939   : > { %v1605_v55 = vpop.permute.xlu1 %1604 }
 0x93a   : > { %v1612_v57 = vsub.f32 %v1425_v18, %v1605_v55  ;;  %v2124_v55 = vld [vmem:[#allocation2 + $0x108] sm:$0xff] }
 0x946   : > { %v1626_v59 = vpop.permute.xlu1 %1625 }
 0x947   : > { %v1629_v60 = vmul.f32 %v1626_v59, %v1613_v56  ;;  %v1621_v61 = vpop.permute.xlu0 %1620  ;;  %v2125_v56 = vld [vmem:[#allocation2 + $0x110] sm:$0x3] }
 0x948   : > { %v1628_v62 = vmul.f32 %v1621_v61, %v1612_v57  ;;  %v14184_v57 = vpack.c.bf16 %v2125_v56, %v2124_v55  ;;  %v12066_v61 = vld [vmem:[#allocation2 + $0xf8] ss:$0 sm:$0xff] }
 0x949   : > { %v1636_v0 = vmul.f32 %v12051_v58, %v1629_v60 }
 0x94a   : > { %v1635_v1 = vmul.f32 %v12051_v58, %v1628_v62 }
 0x94b   : > { %v1643_v3 = vadd.f32 %v12052_v63, %v1636_v0  ;;  %v12067_v0 = vld [vmem:[#allocation2 + $0x100] ss:$0 sm:$0xff] }
 0x94c   : > { %v1642_v2 = vadd.f32 %v12052_v63, %v1635_v1 }
 0x94e   : > { %13152 = vmatprep.mubr.msk.f32.mxu1 %vm782_vm11, %v1642_v2 }
 0x94f   : > { %13153 = vmatmul.mubr.msk.f32.vlgmr.msra.gmra.mrb[18].mxu1 %vm782_vm11, %v1643_v3 }
 0x950   : > { %14173 = vmatpush3.bf16.msk.msra.mxu1 %vm15242_vm8, %v15362_v11 }
 0x951   : > { %14180 = vmatprep.subr.bf16.mxu1 %v15077_v32 }
 0xa22   : > { %v13154_v10 = vpop.f32.mrb[18].mxu1 }
 0xa23   : > { %v1732_v12 = vadd.f32 %v13154_v10, %v12053_v9  ;;  %v1726_v13 = vpop.f32.mrb[19].mxu1 }
 0xa24   : > { %v1727_v14 = vadd.f32 %v12053_v9, %v1726_v13  ;;  %v2215_v13 = vld [vmem:[#allocation2 + $0x128] sm:$0x3] }
 0xa25   : > { %v1736_v16 = vmax.f32 %v1732_v12, 0.0  ;;  %v2214_v12 = vld [vmem:[#allocation2 + $0x120] sm:$0xff] }
 0xa26   : > { %v1735_v15 = vmax.f32 %v1727_v14, 0.0  ;;  %v14191_v14 = vpack.c.bf16 %v2215_v13, %v2214_v12 }
 0xa28   : > { %13159 = vmatprep.mubr.msk.f32.mxu0 %vm414_vm6, %v1735_v15  ;;  %v2316_v15 = vld [vmem:[#allocation2 + $0x138] sm:$0xff] }
 0xa29   : > { %13160 = vmatmul.mubr.msk.f32.vlgmr.msra.gmra.mrb[22].mxu0 %vm414_vm6, %v1736_v16 }
 0xa2a   : > { %14179 = vmatpush3.bf16.msk.msra.mxu0 %vm15242_vm8, %v15362_v11 }
 0xa2b   : > { %14186 = vmatprep.subr.msk.bf16.mxu0 %vm15242_vm8, %v14184_v57 }
 0xafc   : > { %v13161_v18 = vpop.f32.mrb[22].mxu0 }
 0xafd   : > { %v1822_v21 = vadd.f32 %v13161_v18, %v12057_v17  ;;  %v1816_v22 = vpop.f32.mrb[23].mxu0 }
 0xafe   : > { %v1817_v23 = vadd.f32 %v12057_v17, %v1816_v22 }
 0xaff   : > { %v1826_v24 = vadd.f32 %v1822_v21, %v1643_v3 }
 0xb00   : > { %v1825_v25 = vadd.f32 %v1817_v23, %v1642_v2 }
 0xb01   : > { %v1911_v28 = vmul.f32 %v1826_v24, %v1826_v24 }
 0xb02   : > { %v1910_v26 = vmul.f32 %v1825_v25, %v1825_v25  ;;  %13166 = vmatprep.mubr.msk.f32.mxu1 %vm782_vm11, %v1825_v25 }
 0xb03   : > { %13167 = vmatmul.mubr.msk.f32.vlgmr.msra.gmra.mrb[20].mxu1 %vm782_vm11, %v1826_v24 }
 0xb04   : > { %13173 = vmatprep.mubr.msk.f32.mxu0 %vm782_vm11, %v1910_v26  ;;  %13180 = vmatprep.mubr.msk.f32.mxu1 %vm15078_vm9, %v15079_v33 }
 0xb05   : > { %13174 = vmatmul.mubr.msk.f32.vlgmr.msra.gmra.mrb[24].mxu0 %vm782_vm11, %v1911_v28 }
 0xb06   : > { %14189 = vmatpush3.bf16.msk.msra.mxu0 %vm15242_vm8, %v14184_v57 }
 0xb07   : > { %14190 = vmatprep.subr.bf16.mxu0 %v15077_v32 }
 0xbd6   : > { %v13168_v36 = vpop.f32.mrb[20].mxu1 }
 0xbd7   : > { %v1909_v29 = vmul.f32 0.1, %v13168_v36  ;;  %v1899_v38 = vpop.f32.mrb[21].mxu1  ;;  %v12076_v36 = vld [vmem:[#allocation2 + $0x130] ss:$0 sm:$0xff] }
 0xbd8   : > { %v1908_v30 = vmul.f32 0.1, %v1899_v38  ;;  %v13175_v31 = vpop.f32.mrb[24].mxu0  ;;  %v12081_v38 = vld [vmem:[#allocation2 + $0x148] ss:$0 sm:$0xff] }
 0xbd9   : > { %v1996_v34 = vmul.f32 %v1909_v29, %v1909_v29  ;;  %v1994_v35 = vmul.f32 0.1, %v13175_v31  ;;  %v1984_v37 = vpop.f32.mrb[25].mxu0  ;;  %2006 = vperm.xlu1 %14816, %v1909_v29  }
 0xbda   : > { %v1995_v40 = vmul.f32 %v1908_v30, %v1908_v30  ;;  %v1993_v46 = vmul.f32 0.1, %v1984_v37 }
 0xbdb   : > { %v1998_v47 = vsub.f32 %v1994_v35, %v1996_v34 }
 0xbdc   : > { %v1997_v48 = vsub.f32 %v1993_v46, %v1995_v40 }
 0xbdd   : > { %2001 = vperm.xlu1 %14816, %v1908_v30   ;;  %v2012_v52 = vadd.f32 1e-05, %v1998_v47 }
 0xbde   : > { %v2011_v49 = vadd.f32 1e-05, %v1997_v48 }
 0xbe0   : > { %14830 = vrsqrt.f32 %v2011_v49 }
 0xbe1   : > { %14832 = vrsqrt.f32 %v2012_v52 }
 0xbea   : > { %v14831_v53 = vpop.eup %14830 }
 0xbeb   : > { %2017 = vperm.xlu1 %14816, %v14831_v53   ;;  %v14833_v54 = vpop.eup %14832 }
 0xbef   : > { %2022 = vperm.xlu1 %14816, %v14833_v54  }
 0xc58   : > { %v2007_v58 = vpop.permute.xlu1 %2006 }
 0xc59   : > { %v2010_v1 = vsub.f32 %v1826_v24, %v2007_v58 }
 0xc5c   : > { %v2002_v59 = vpop.permute.xlu1 %2001 }
 0xc5d   : > { %v2009_v60 = vsub.f32 %v1825_v25, %v2002_v59 }
 0xc6a   : > { %v2018_v62 = vpop.permute.xlu1 %2017 }
 0xc6b   : > { %v2025_v63 = vmul.f32 %v2018_v62, %v2009_v60 }
 0xc6d   : > { %v2032_v2 = vmul.f32 %v12066_v61, %v2025_v63 }
 0xc6e   : > { %v2023_v3 = vpop.permute.xlu1 %2022 }
 0xc6f   : > { %v15414_v4 = vadd.f32 %v12067_v0, %v2032_v2  ;;  %v2026_v5 = vmul.f32 %v2023_v3, %v2010_v1 }
 0xc71   : > { %v2033_v6 = vmul.f32 %v12066_v61, %v2026_v5  ;;  %13193 = vmatprep.mubr.msk.f32.mxu0 %vm782_vm11, %v15414_v4 }
 0xc73   : > { %v15418_v9 = vadd.f32 %v12067_v0, %v2033_v6 }
 0xc75   : > { %v14181_v10 = vpack.c.bf16 %v15418_v9, %v15414_v4  ;;  %13194 = vmatmul.mubr.msk.f32.vlgmr.msra.gmra.mrb[26].mxu0 %vm782_vm11, %v15418_v9 }
 0xc76   : > { %13200 = vmatprep.mubr.msk.f32.mxu0 %vm15078_vm9, %v15079_v33  ;;  %14193 = vmatpush3.bf16.msk.msra.mxu0 %vm15242_vm8, %v14191_v14 }
 0xc77   : > { %14183 = vmatpush3.bf16.msk.msra.mxu1 %vm15261_vm12, %v14181_v10 }
 0xc78   : > { %14194 = vmatprep.subr.bf16.mxu1 %v15077_v32 }
 0xc7a   : > { %13181 = vmatmul.mubr.msk.f32.vlgmr.msra.gmra.mrb[22].mxu1 %vm681_vm13, %v15273_v41  ;;  %v2317_v41 = vld [vmem:[#allocation2 + $0x140] sm:$0x3] }
 0xc7b   : > { %13183 = vmatprep.mubr.msk.f32.mxu1 %vm15078_vm9, %v15079_v33  ;;  %v14195_v16 = vpack.c.bf16 %v2317_v41, %v2316_v15 }
 0xc7d   : > { %14197 = vmatpush3.bf16.msk.msra.mxu1 %vm15242_vm8, %v14195_v16 }
 0xc7e   : > { %13184 = vmatmul.mubr.msk.f32.gmra.mrb[24].mxu1 %vm681_vm13, %v15282_v42  ;;  %14205 = vmatprep.subr.bf16.mxu1 %v15344_v50  ;;  %v12072_v42 = vld [vmem:[#allocation2 + $0x118] ss:$0 sm:$0xff] }
 0xc7f   : > { %13186 = vmatprep.mubr.msk.f32.mxu1 %vm15078_vm9, %v15079_v33 }
 0xc82   : > { %13187 = vmatmul.mubr.msk.f32.gmra.mrb[26].mxu1 %vm681_vm13, %v15288_v43 }
 0xc83   : > { %13213 = vmatprep.mubr.msk.f32.mxu1 %vm15078_vm9, %v15079_v33 }
 0xd48   : > { %v13195_v17 = vpop.f32.mrb[26].mxu0 }
 0xd49   : > { %v2211_v43 = vadd.f32 %v13195_v17, %v12072_v42  ;;  %v2205_v18 = vpop.f32.mrb[27].mxu0  ;;  %v2679_v17 = vld [vmem:[#allocation2 + $0x150] sm:$0xff] }
 0xd4a   : > { %v2206_v25 = vadd.f32 %v12072_v42, %v2205_v18 }
 0xd4d   : > { %v2110_v21 = vpop.f32.mrb[22].mxu1 }
 0xd4e   : > { %v13182_v22 = vpop.f32.mrb[23].mxu1  ;;  %13201 = vmatmul.mubr.msk.f32.vlgmr.msra.gmra.mrb[28].mxu0 %vm782_vm11, %v2110_v21  ;;  %13214 = vmatmul.mubr.msk.f32.vlgmr.msra.gmra.mrb[28].mxu1 %vm782_vm11, %v2110_v21 }
 0xd4f   : > { %13203 = vmatprep.mubr.msk.f32.mxu0 %vm15078_vm9, %v15079_v33  ;;  %13216 = vmatprep.mubr.msk.f32.mxu1 %vm15078_vm9, %v15079_v33 }
 0xd50   : > { %14207 = vmatpush3.bf16.msra.mxu1 %v15344_v50 }
 0xd51   : > { %v2115_v23 = vpop.f32.mrb[24].mxu1  ;;  %13235 = vmatprep.subr.mxu1 %v15346_v51 }
 0xd52   : > { %v13185_v24 = vpop.f32.mrb[25].mxu1  ;;  %13204 = vmatmul.mubr.msk.f32.gmra.mrb[30].mxu0 %vm782_vm11, %v2115_v23  ;;  %13217 = vmatmul.mubr.msk.f32.gmra.mrb[30].mxu1 %vm782_vm11, %v2115_v23 }
 0xd53   : > { %13206 = vmatprep.mubr.msk.f32.mxu0 %vm15078_vm9, %v15079_v33  ;;  %13219 = vmatprep.mubr.msk.f32.mxu1 %vm15078_vm9, %v15079_v33 }
 0xd54   : > { %13236 = vmatpush3.msra.mxu1 %v15346_v51 }
 0xd55   : > { %v2120_v26 = vpop.f32.mrb[26].mxu1 }
 0xd56   : > { %13207 = vmatmul.mubr.msk.f32.gmra.mrb[32].mxu0 %vm782_vm11, %v2120_v26  ;;  %v13188_v28 = vpop.f32.mrb[27].mxu1  ;;  %13220 = vmatmul.mubr.msk.f32.gmra.mrb[32].mxu1 %vm782_vm11, %v2120_v26 }
 0xd57   : > { %13228 = vmatprep.mubr.msk.f32.mxu0 %vm782_vm11, %v2206_v25 }
 0xe21   : > { %v2299_v29 = vpop.f32.mrb[28].mxu0  ;;  %v2392_v30 = vpop.f32.mrb[28].mxu1 }
 0xe22   : > { %v13202_v31 = vpop.f32.mrb[29].mxu0  ;;  %v13215_v34 = vpop.f32.mrb[29].mxu1  ;;  %v2300_v35 = vadd.f32 %v12076_v36, %v2299_v29  ;;  %v2393_v37 = vadd.f32 %v12081_v38, %v2392_v30  ;;  %v12095_v29 = vld [vmem:[#allocation2 + $0x160] ss:$0 sm:$0xff] }
 0xe24   : > { %v2313_v53 = vmul.f32 %v2300_v35, %v15317_v7  ;;  %v2406_v54 = vmul.f32 %v2393_v37, %v15317_v7 }
 0xe25   : > { %v2304_v40 = vpop.f32.mrb[30].mxu0  ;;  %v2397_v46 = vpop.f32.mrb[30].mxu1 }
 0xe26   : > { %v2305_v47 = vadd.f32 %v12076_v36, %v2304_v40  ;;  %v2398_v48 = vadd.f32 %v12081_v38, %v2397_v46  ;;  %v13205_v49 = vpop.f32.mrb[31].mxu0  ;;  %v13218_v52 = vpop.f32.mrb[31].mxu1 }
 0xe28   : > { %v2314_v55 = vmul.f32 %v2305_v47, %v15319_v8  ;;  %v2407_v56 = vmul.f32 %v2398_v48, %v15319_v8 }
 0xe29   : > { %v2309_v57 = vpop.f32.mrb[32].mxu0  ;;  %v2402_v58 = vpop.f32.mrb[32].mxu1 }
 0xe2a   : > { %v14198_v59 = vpack.c.bf16 %v2314_v55, %v2313_v53  ;;  %v2310_v60 = vadd.f32 %v12076_v36, %v2309_v57  ;;  %v13208_v61 = vpop.f32.mrb[33].mxu0  ;;  %v13221_v62 = vpop.f32.mrb[33].mxu1  ;;  %v14208_v63 = vpack.c.bf16 %v2407_v56, %v2406_v54  ;;  %v2403_v7 = vadd.f32 %v12081_v38, %v2402_v58 }
 0xe2c   : > { %14200 = vmatprep.subr.msk.bf16.mxu0 %vm15327_vm14, %v14198_v59  ;;  %v2315_v0 = vmul.f32 %v2310_v60, %v15331_v20  ;;  %v2408_v8 = vmul.f32 %v2403_v7, %v15331_v20 }
 0xe2d   : > { %14203 = vmatpush3.bf16.xpose.msk.msra.mxu0 %vm15327_vm14, %v14198_v59 }
 0xe2e   : > { %13226 = vmatprep.subr.msk.mxu0 %vm782_vm11, %v2315_v0 }
 0xe35   : > { %13227 = vmatpush3.xpose.msk.msra.mxu0 %vm782_vm11, %v2315_v0  ;;  %v2987_v0 = vld [vmem:[#allocation2 + $0x180] sm:$0x3] }
 0xe36   : > { %14209 = vmatprep.subr.bf16.mxu0 %v14208_v63 }
 0xe38   : > { %13229 = vmatmul.mubr.msk.f32.vlgmr.msra.gmra.mrb[34].mxu0 %vm782_vm11, %v2211_v43  ;;  %v2680_v43 = vld [vmem:[#allocation2 + $0x158] sm:$0x3] }
 0xe39   : > { %14211 = vmatpush3.bf16.msra.mxu0 %v14208_v63  ;;  %v14212_v18 = vpack.c.bf16 %v2680_v43, %v2679_v17  ;;  %v2986_v63 = vld [vmem:[#allocation2 + $0x178] sm:$0xff] }
 0xe3a   : > { %13244 = vmatprep.subr.mxu0 %v2408_v8  ;;  %v14230_v7 = vpack.c.bf16 %v2987_v0, %v2986_v63  ;;  %v3080_v17 = vld [vmem:[#allocation2 + $0x198] sm:$0xff] }
 0xe3b   : > { %14214 = vmatprep.subr.msk.bf16.mxu1 %vm15242_vm8, %v14212_v18 }
 0xe3d   : > { %13245 = vmatpush3.msra.mxu0 %v2408_v8 }
 0xe3e   : > { %14220 = vmatprep.subr.msk.bf16.mxu0 %vm15242_vm8, %v15362_v11 }
 0xf0b   : > { %v13230_v1 = vpop.f32.mrb[34].mxu0 }
 0xf0c   : > { %v2500_v2 = vmul.f32 0.4472136, %v13230_v1  ;;  %v2490_v3 = vpop.f32.mrb[35].mxu0 }
 0xf0d   : > { %v2499_v5 = vmul.f32 0.4472136, %v2490_v3 }
 0xf0e   : > { %v2504_v6 = vsel %vm1158_vm0, %v2500_v2, -inf }
 0xf0f   : > { %2505 = vmax.xlane.f32.xlu0 %v2504_v6  ;;  %v2501_v10 = vsel %vm1154_vm15, %v2499_v5, -inf }
 0xf10   : > { %2502 = vmax.xlane.f32.xlu1 %v2501_v10 }
 0xf9c   : > { %v2506_v20 = vpop.xlane.xlu0 %2505 }
 0xf9d   : > { %v2508_v12 = vsub.f32 %v2500_v2, %v2506_v20  ;;  %v2503_v13 = vpop.xlane.xlu1 %2502 }
 0xf9e   : > { %v2507_v14 = vsub.f32 %v2499_v5, %v2503_v13  ;;  %v12105_v5 = vld [vmem:[#allocation2 + $0x168] ss:$0 sm:$0xff]  ;;  %v12106_v13 = vld [vmem:[#allocation2 + $0x170] ss:$0 sm:$0xff] }
 0xf9f   : > { %v2511_v15 = vmul.f32 1.442695, %v2508_v12 }
 0xfa0   : > { %v2509_v41 = vmul.f32 1.442695, %v2507_v14 }
 0xfa2   : > { %14834 = vpow2.f32 %v2509_v41 }
 0xfa3   : > { %14836 = vpow2.f32 %v2511_v15 }
 0xfac   : > { %v14835_v16 = vpop.eup %14834 }
 0xfad   : > { %v14837_v42 = vpop.eup %14836  ;;  %13237 = vmatprep.mubr.msk.f32.mxu1 %vm1154_vm15, %v14835_v16 }
 0xfae   : > { %13238 = vmatmul.mubr.msk.f32.vlgmr.msra.gmra.mrb[34].mxu1 %vm1154_vm15, %v14837_v42 }
 0xfaf   : > { %14217 = vmatpush3.bf16.msk.msra.mxu1 %vm15242_vm8, %v14212_v18  ;;  %v12107_v18 = vld [vmem:[#allocation2 + $0x188] ss:$0 sm:$0xff] }
 0xfb0   : > { %14226 = vmatprep.subr.msk.bf16.mxu1 %vm15242_vm8, %v15362_v11 }
0x1081   : > { %v13239_v21 = vpop.f32.mrb[34].mxu1 }
0x1082   : > { %14838 = vrcp.f32 %v13239_v21  ;;  %v2585_v22 = vpop.f32.mrb[35].mxu1 }
0x1083   : > { %14840 = vrcp.f32 %v2585_v22 }
0x108c   : > { %v14839_v23 = vpop.eup %14838 }
0x108d   : > { %v14841_v24 = vpop.eup %14840  ;;  %v2597_v26 = vmul.f32 %v14839_v23, %v14837_v42  ;;  %v3079_v42 = vld [vmem:[#allocation2 + $0x190] sm:$0xff] }
0x108e   : > { %v2596_v25 = vmul.f32 %v14841_v24, %v14835_v16  ;;  %v14236_v43 = vpack.c.bf16 %v3080_v17, %v3079_v42  ;;  %v15560_v42 = vld [vmem:[#allocation6 + $0x8] sm:$0xff]  ;;  %v15566_v17 = vld [vmem:[#allocation6 + $0x10] sm:$0xff] }
0x1090   : > { %13246 = vmatprep.mubr.msk.f32.mxu0 %vm1154_vm15, %v2596_v25 }
0x1091   : > { %13247 = vmatmul.mubr.msk.f32.vlgmr.msra.gmra.mrb[36].mxu0 %vm1154_vm15, %v2597_v26 }
0x1092   : > { %14223 = vmatpush3.bf16.msk.msra.mxu0 %vm15242_vm8, %v15362_v11 }
0x1093   : > { %14232 = vmatprep.subr.msk.bf16.mxu0 %vm15242_vm8, %v14230_v7 }
0x1164   : > { %v13248_v28 = vpop.f32.mrb[36].mxu0 }
0x1165   : > { %v2670_v36 = vpop.f32.mrb[37].mxu0 }
0x1166   : > { %13253 = vmatprep.mubr.msk.f32.mxu1 %vm782_vm11, %v2670_v36 }
0x1167   : > { %13254 = vmatmul.mubr.msk.f32.vlgmr.msra.gmra.mrb[36].mxu1 %vm782_vm11, %v13248_v28  ;;  %v12111_v28 = vld [vmem:[#allocation2 + $0x1a0] ss:$0 sm:$0xff] }
0x1168   : > { %14229 = vmatpush3.bf16.msk.msra.mxu1 %vm15242_vm8, %v15362_v11 }
0x1169   : > { %14237 = vmatprep.subr.bf16.mxu1 %v14236_v43 }
0x123a   : > { %v13255_v38 = vpop.f32.mrb[36].mxu1 }
0x123b   : > { %v2767_v30 = vadd.f32 %v13255_v38, %v12095_v29  ;;  %v2761_v31 = vpop.f32.mrb[37].mxu1 }
0x123c   : > { %v2762_v34 = vadd.f32 %v12095_v29, %v2761_v31 }
0x123d   : > { %v2771_v35 = vadd.f32 %v2767_v30, %v15418_v9 }
0x123e   : > { %v2770_v37 = vadd.f32 %v2762_v34, %v15414_v4 }
0x123f   : > { %v2856_v46 = vmul.f32 %v2771_v35, %v2771_v35 }
0x1240   : > { %v2855_v40 = vmul.f32 %v2770_v37, %v2770_v37  ;;  %13260 = vmatprep.mubr.msk.f32.mxu0 %vm782_vm11, %v2770_v37 }
0x1241   : > { %13261 = vmatmul.mubr.msk.f32.vlgmr.msra.gmra.mrb[38].mxu0 %vm782_vm11, %v2771_v35 }
0x1242   : > { %13267 = vmatprep.mubr.msk.f32.mxu1 %vm782_vm11, %v2855_v40  ;;  %14235 = vmatpush3.bf16.msk.msra.mxu0 %vm15242_vm8, %v14230_v7 }
0x1243   : > { %13268 = vmatmul.mubr.msk.f32.vlgmr.msra.gmra.mrb[38].mxu1 %vm782_vm11, %v2856_v46  ;;  %14242 = vmatprep.subr.msk.bf16.mxu0 %vm15242_vm8, %v15362_v11 }
0x1244   : > { %14239 = vmatpush3.bf16.msra.mxu1 %v14236_v43  ;;  %v3556_v43 = vld [vmem:[#allocation2 + $0x1d0] sm:$0xff] }
0x1245   : > { %14248 = vmatprep.subr.msk.bf16.mxu1 %vm15242_vm8, %v15362_v11 }
0x1314   : > { %v13262_v47 = vpop.f32.mrb[38].mxu0 }
0x1315   : > { %v2854_v48 = vmul.f32 0.1, %v13262_v47  ;;  %v2844_v49 = vpop.f32.mrb[39].mxu0 }
0x1316   : > { %v2853_v52 = vmul.f32 0.1, %v2844_v49  ;;  %v13269_v53 = vpop.f32.mrb[38].mxu1 }
0x1317   : > { %v2941_v54 = vmul.f32 %v2854_v48, %v2854_v48  ;;  %v2939_v55 = vmul.f32 0.1, %v13269_v53  ;;  %v2929_v9 = vpop.f32.mrb[39].mxu1  ;;  %2951 = vperm.xlu1 %14816, %v2854_v48  }
0x1318   : > { %v2940_v4 = vmul.f32 %v2853_v52, %v2853_v52  ;;  %v2938_v56 = vmul.f32 0.1, %v2929_v9 }
0x1319   : > { %v2943_v57 = vsub.f32 %v2939_v55, %v2941_v54 }
0x131a   : > { %v2942_v58 = vsub.f32 %v2938_v56, %v2940_v4 }
0x131b   : > { %v2957_v59 = vadd.f32 1e-05, %v2943_v57  ;;  %2946 = vperm.xlu1 %14816, %v2853_v52  }
0x131c   : > { %v2956_v60 = vadd.f32 1e-05, %v2942_v58 }
0x131d   : > { %14842 = vrsqrt.f32 %v2957_v59 }
0x131e   : > { %14844 = vrsqrt.f32 %v2956_v60 }
0x1327   : > { %v14843_v61 = vpop.eup %14842 }
0x1328   : > { %v14845_v62 = vpop.eup %14844  ;;  %2967 = vperm.xlu1 %14816, %v14843_v61   ;;  %v3466_v61 = vld [vmem:[#allocation2 + $0x1b8] sm:$0xff] }
0x1329   : > { %2962 = vperm.xlu0 %14817, %v14845_v62   ;;  %v3467_v62 = vld [vmem:[#allocation2 + $0x1c0] sm:$0x3] }
0x132a   : > { %v14256_v63 = vpack.c.bf16 %v3467_v62, %v3466_v61  ;;  %v15599_v61 = vld [vmem:[#allocation6 + $0x20] sm:$0xff] }
0x1396   : > { %v2952_v8 = vpop.permute.xlu1 %2951 }
0x1397   : > { %v2955_v2 = vsub.f32 %v2771_v35, %v2952_v8 }
0x139a   : > { %v2947_v1 = vpop.permute.xlu1 %2946 }
0x139b   : > { %v2954_v3 = vsub.f32 %v2770_v37, %v2947_v1  ;;  %v12120_v1 = vld [vmem:[#allocation2 + $0x1a8] ss:$0 sm:$0xff] }
0x13a7   : > { %v2968_v6 = vpop.permute.xlu1 %2967 }
0x13a8   : > { %v2971_v10 = vmul.f32 %v2968_v6, %v2955_v2  ;;  %v2963_v20 = vpop.permute.xlu0 %2962 }
0x13a9   : > { %v2970_v12 = vmul.f32 %v2963_v20, %v2954_v3 }
0x13aa   : > { %v2978_v14 = vmul.f32 %v12105_v5, %v2971_v10 }
0x13ab   : > { %v2977_v15 = vmul.f32 %v12105_v5, %v2970_v12  ;;  %v12121_v5 = vld [vmem:[#allocation2 + $0x1b0] ss:$0 sm:$0xff] }
0x13ac   : > { %v2985_v16 = vadd.f32 %v12106_v13, %v2978_v14 }
0x13ad   : > { %v2984_v41 = vadd.f32 %v12106_v13, %v2977_v15 }
0x13af   : > { %13274 = vmatprep.mubr.msk.f32.mxu0 %vm782_vm11, %v2984_v41 }
0x13b0   : > { %13275 = vmatmul.mubr.msk.f32.vlgmr.msra.gmra.mrb[40].mxu0 %vm782_vm11, %v2985_v16 }
0x13b1   : > { %14245 = vmatpush3.bf16.msk.msra.mxu0 %vm15242_vm8, %v15362_v11 }
0x13b2   : > { %14252 = vmatprep.subr.bf16.mxu0 %v15077_v32 }
0x1483   : > { %v13276_v21 = vpop.f32.mrb[40].mxu0 }
0x1484   : > { %v3074_v22 = vadd.f32 %v13276_v21, %v12107_v18  ;;  %v3068_v23 = vpop.f32.mrb[41].mxu0 }
0x1485   : > { %v3069_v24 = vadd.f32 %v12107_v18, %v3068_v23  ;;  %v3557_v18 = vld [vmem:[#allocation2 + $0x1d8] sm:$0x3]  ;;  %v3659_v23 = vld [vmem:[#allocation2 + $0x1f0] sm:$0x3] }
0x1486   : > { %v3078_v26 = vmax.f32 %v3074_v22, 0.0  ;;  %v14263_v21 = vpack.c.bf16 %v3557_v18, %v3556_v43  ;;  %v3658_v22 = vld [vmem:[#allocation2 + $0x1e8] sm:$0xff] }
0x1487   : > { %v3077_v25 = vmax.f32 %v3069_v24, 0.0  ;;  %v14267_v24 = vpack.c.bf16 %v3659_v23, %v3658_v22 }
0x1489   : > { %13281 = vmatprep.mubr.msk.f32.mxu1 %vm414_vm6, %v3077_v25  ;;  %v12126_v25 = vld [vmem:[#allocation2 + $0x1c8] ss:$0 sm:$0xff] }
0x148a   : > { %13282 = vmatmul.mubr.msk.f32.vlgmr.msra.gmra.mrb[40].mxu1 %vm414_vm6, %v3078_v26 }
0x148b   : > { %14251 = vmatpush3.bf16.msk.msra.mxu1 %vm15242_vm8, %v15362_v11 }
0x148c   : > { %14258 = vmatprep.subr.msk.bf16.mxu1 %vm15242_vm8, %v14256_v63 }
0x155d   : > { %v13283_v36 = vpop.f32.mrb[40].mxu1 }
0x155e   : > { %v3164_v29 = vadd.f32 %v13283_v36, %v12111_v28  ;;  %v3158_v38 = vpop.f32.mrb[41].mxu1 }
0x155f   : > { %v3159_v30 = vadd.f32 %v12111_v28, %v3158_v38 }
0x1560   : > { %v3168_v31 = vadd.f32 %v3164_v29, %v2985_v16  ;;  %v15554_v16 = vld [vmem:[#allocation6] sm:$0xff] }
0x1561   : > { %v3167_v34 = vadd.f32 %v3159_v30, %v2984_v41 }
0x1562   : > { %v3253_v37 = vmul.f32 %v3168_v31, %v3168_v31 }
0x1563   : > { %v3252_v35 = vmul.f32 %v3167_v34, %v3167_v34  ;;  %13288 = vmatprep.mubr.msk.f32.mxu0 %vm782_vm11, %v3167_v34 }
0x1564   : > { %13289 = vmatmul.mubr.msk.f32.vlgmr.msra.gmra.mrb[42].mxu0 %vm782_vm11, %v3168_v31 }
0x1565   : > { %13295 = vmatprep.mubr.msk.f32.mxu1 %vm782_vm11, %v3252_v35  ;;  %13302 = vmatprep.mubr.msk.f32.mxu0 %vm15078_vm9, %v15079_v33 }
0x1566   : > { %13296 = vmatmul.mubr.msk.f32.vlgmr.msra.gmra.mrb[42].mxu1 %vm782_vm11, %v3253_v37 }
0x1567   : > { %14261 = vmatpush3.bf16.msk.msra.mxu1 %vm15242_vm8, %v14256_v63 }
0x1568   : > { %14262 = vmatprep.subr.bf16.mxu1 %v15077_v32 }
0x1637   : > { %v13290_v40 = vpop.f32.mrb[42].mxu0 }
0x1638   : > { %v3251_v46 = vmul.f32 0.1, %v13290_v40  ;;  %v3241_v47 = vpop.f32.mrb[43].mxu0  ;;  %v12130_v40 = vld [vmem:[#allocation2 + $0x1e0] ss:$0 sm:$0xff] }
0x1639   : > { %v3250_v48 = vmul.f32 0.1, %v3241_v47  ;;  %v13297_v49 = vpop.f32.mrb[42].mxu1  ;;  %v12135_v47 = vld [vmem:[#allocation2 + $0x1f8] ss:$0 sm:$0xff] }
0x163a   : > { %v3338_v52 = vmul.f32 %v3251_v46, %v3251_v46  ;;  %v3336_v53 = vmul.f32 0.1, %v13297_v49  ;;  %v3326_v54 = vpop.f32.mrb[43].mxu1  ;;  %3348 = vperm.xlu1 %14816, %v3251_v46  }
0x163b   : > { %v3337_v55 = vmul.f32 %v3250_v48, %v3250_v48  ;;  %v3335_v9 = vmul.f32 0.1, %v3326_v54 }
0x163c   : > { %v3340_v4 = vsub.f32 %v3336_v53, %v3338_v52 }
0x163d   : > { %v3339_v56 = vsub.f32 %v3335_v9, %v3337_v55 }
0x163e   : > { %3343 = vperm.xlu1 %14816, %v3250_v48   ;;  %v3354_v58 = vadd.f32 1e-05, %v3340_v4 }
0x163f   : > { %v3353_v57 = vadd.f32 1e-05, %v3339_v56 }
0x1641   : > { %14846 = vrsqrt.f32 %v3353_v57 }
0x1642   : > { %14848 = vrsqrt.f32 %v3354_v58  ;;  %v15595_v58 = vld [vmem:[#allocation6 + $0x18] sm:$0xff] }
0x164b   : > { %v14847_v59 = vpop.eup %14846 }
0x164c   : > { %3359 = vperm.xlu1 %14816, %v14847_v59   ;;  %v14849_v60 = vpop.eup %14848 }
0x1650   : > { %3364 = vperm.xlu1 %14816, %v14849_v60  }
0x16b9   : > { %v3349_v0 = vpop.permute.xlu1 %3348 }
0x16ba   : > { %v3352_v6 = vsub.f32 %v3168_v31, %v3349_v0 }
0x16bd   : > { %v3344_v7 = vpop.permute.xlu1 %3343 }
0x16be   : > { %v3351_v8 = vsub.f32 %v3167_v34, %v3344_v7 }
0x16cb   : > { %v3360_v2 = vpop.permute.xlu1 %3359 }
0x16cc   : > { %v3367_v3 = vmul.f32 %v3360_v2, %v3351_v8 }
0x16ce   : > { %v3374_v10 = vmul.f32 %v12120_v1, %v3367_v3 }
0x16cf   : > { %v3365_v20 = vpop.permute.xlu1 %3364 }
0x16d0   : > { %v15539_v12 = vadd.f32 %v12121_v5, %v3374_v10  ;;  %v3368_v13 = vmul.f32 %v3365_v20, %v3352_v6  ;;  %v15605_v6 = vld [vmem:[#allocation6 + $0x28] sm:$0xff] }
0x16d2   : > { %v3375_v14 = vmul.f32 %v12120_v1, %v3368_v13  ;;  %13315 = vmatprep.mubr.msk.f32.mxu1 %vm782_vm11, %v15539_v12 }
0x16d4   : > { %v15543_v15 = vadd.f32 %v12121_v5, %v3375_v14 }
0x16d6   : > { %v14253_v41 = vpack.c.bf16 %v15543_v15, %v15539_v12  ;;  %13316 = vmatmul.mubr.msk.f32.vlgmr.msra.gmra.mrb[44].mxu1 %vm782_vm11, %v15543_v15 }
0x16d7   : > { %13322 = vmatprep.mubr.msk.f32.mxu1 %vm15078_vm9, %v15079_v33  ;;  %14265 = vmatpush3.bf16.msk.msra.mxu1 %vm15242_vm8, %v14263_v21 }
0x16d8   : > { %14255 = vmatpush3.bf16.msk.msra.mxu0 %vm15261_vm12, %v14253_v41 }
0x16d9   : > { %14266 = vmatprep.subr.bf16.mxu0 %v15077_v32 }
0x16db   : > { %13303 = vmatmul.mubr.msk.f32.vlgmr.msra.gmra.mrb[44].mxu0 %vm681_vm13, %v15554_v16 }
0x16dc   : > { %13305 = vmatprep.mubr.msk.f32.mxu0 %vm15078_vm9, %v15079_v33  ;;  %14269 = vmatpush3.bf16.msk.msra.mxu0 %vm15242_vm8, %v14267_v24 }
0x16dd   : > { %14277 = vmatprep.subr.bf16.mxu0 %v15344_v50 }
0x16df   : > { %13306 = vmatmul.mubr.msk.f32.gmra.mrb[46].mxu0 %vm681_vm13, %v15560_v42 }
0x16e0   : > { %13308 = vmatprep.mubr.msk.f32.mxu0 %vm15078_vm9, %v15079_v33 }
0x16e3   : > { %13309 = vmatmul.mubr.msk.f32.gmra.mrb[48].mxu0 %vm681_vm13, %v15566_v17 }
0x16e4   : > { %13335 = vmatprep.mubr.msk.f32.mxu0 %vm15078_vm9, %v15079_v33 }
0x17a9   : > { %v13317_v26 = vpop.f32.mrb[44].mxu1 }
0x17aa   : > { %v3553_v28 = vadd.f32 %v13317_v26, %v12126_v25  ;;  %v3547_v36 = vpop.f32.mrb[45].mxu1 }
0x17ab   : > { %v3548_v34 = vadd.f32 %v12126_v25, %v3547_v36 }
0x17ae   : > { %v3452_v29 = vpop.f32.mrb[44].mxu0 }
0x17af   : > { %v13304_v38 = vpop.f32.mrb[45].mxu0  ;;  %13323 = vmatmul.mubr.msk.f32.vlgmr.msra.gmra.mrb[46].mxu1 %vm782_vm11, %v3452_v29  ;;  %13336 = vmatmul.mubr.msk.f32.vlgmr.msra.gmra.mrb[50].mxu0 %vm782_vm11, %v3452_v29 }
0x17b0   : > { %13325 = vmatprep.mubr.msk.f32.mxu1 %vm15078_vm9, %v15079_v33  ;;  %13338 = vmatprep.mubr.msk.f32.mxu0 %vm15078_vm9, %v15079_v33 }
0x17b1   : > { %14279 = vmatpush3.bf16.msra.mxu0 %v15344_v50 }
0x17b2   : > { %v3457_v30 = vpop.f32.mrb[46].mxu0  ;;  %13357 = vmatprep.subr.mxu0 %v15346_v51 }
0x17b3   : > { %v13307_v31 = vpop.f32.mrb[47].mxu0  ;;  %13326 = vmatmul.mubr.msk.f32.gmra.mrb[48].mxu1 %vm782_vm11, %v3457_v30  ;;  %13339 = vmatmul.mubr.msk.f32.gmra.mrb[52].mxu0 %vm782_vm11, %v3457_v30  ;;  %v4021_v30 = vld [vmem:[#allocation2 + $0x200] sm:$0xff] }
0x17b4   : > { %13328 = vmatprep.mubr.msk.f32.mxu1 %vm15078_vm9, %v15079_v33  ;;  %13341 = vmatprep.mubr.msk.f32.mxu0 %vm15078_vm9, %v15079_v33  ;;  %v4022_v31 = vld [vmem:[#allocation2 + $0x208] sm:$0x3] }
0x17b5   : > { %13358 = vmatpush3.msra.mxu0 %v15346_v51 }
0x17b6   : > { %v3462_v35 = vpop.f32.mrb[48].mxu0 }
0x17b7   : > { %13329 = vmatmul.mubr.msk.f32.gmra.mrb[50].mxu1 %vm782_vm11, %v3462_v35  ;;  %v13310_v37 = vpop.f32.mrb[49].mxu0  ;;  %13342 = vmatmul.mubr.msk.f32.gmra.mrb[54].mxu0 %vm782_vm11, %v3462_v35 }
0x17b8   : > { %13350 = vmatprep.mubr.msk.f32.mxu1 %vm782_vm11, %v3548_v34  ;;  %v14284_v34 = vpack.c.bf16 %v4022_v31, %v4021_v30 }
0x17ba   : > { %14286 = vmatprep.subr.msk.bf16.mxu0 %vm15242_vm8, %v14284_v34 }
0x1882   : > { %v3641_v46 = vpop.f32.mrb[46].mxu1  ;;  %v3734_v48 = vpop.f32.mrb[50].mxu0 }
0x1883   : > { %v13324_v49 = vpop.f32.mrb[47].mxu1  ;;  %v13337_v52 = vpop.f32.mrb[51].mxu0  ;;  %v3642_v53 = vadd.f32 %v12130_v40, %v3641_v46  ;;  %v3735_v54 = vadd.f32 %v12135_v47, %v3734_v48 }
0x1885   : > { %v3655_v59 = vmul.f32 %v15595_v58, %v3642_v53  ;;  %v3748_v60 = vmul.f32 %v15595_v58, %v3735_v54  ;;  %v12149_v53 = vld [vmem:[#allocation2 + $0x210] ss:$0 sm:$0xff] }
0x1886   : > { %v3646_v55 = vpop.f32.mrb[48].mxu1  ;;  %v3739_v9 = vpop.f32.mrb[52].mxu0 }
0x1887   : > { %v3647_v51 = vadd.f32 %v12130_v40, %v3646_v55  ;;  %v3740_v4 = vadd.f32 %v12135_v47, %v3739_v9  ;;  %v13327_v56 = vpop.f32.mrb[49].mxu1  ;;  %v13340_v57 = vpop.f32.mrb[53].mxu0 }
0x1889   : > { %v3656_v62 = vmul.f32 %v15599_v61, %v3647_v51  ;;  %v3749_v63 = vmul.f32 %v15599_v61, %v3740_v4 }
0x188a   : > { %v3651_v0 = vpop.f32.mrb[50].mxu1  ;;  %v3744_v7 = vpop.f32.mrb[54].mxu0 }
0x188b   : > { %v14270_v8 = vpack.c.bf16 %v3656_v62, %v3655_v59  ;;  %v3652_v1 = vadd.f32 %v12130_v40, %v3651_v0  ;;  %v13330_v2 = vpop.f32.mrb[51].mxu1  ;;  %v13343_v3 = vpop.f32.mrb[55].mxu0  ;;  %v14280_v5 = vpack.c.bf16 %v3749_v63, %v3748_v60  ;;  %v3745_v20 = vadd.f32 %v12135_v47, %v3744_v7 }
0x188d   : > { %14272 = vmatprep.subr.msk.bf16.mxu1 %vm15327_vm14, %v14270_v8  ;;  %v3657_v10 = vmul.f32 %v15605_v6, %v3652_v1  ;;  %v3750_v13 = vmul.f32 %v15605_v6, %v3745_v20 }
0x188e   : > { %14275 = vmatpush3.bf16.xpose.msk.msra.mxu1 %vm15327_vm14, %v14270_v8 }
0x188f   : > { %13348 = vmatprep.subr.msk.mxu1 %vm782_vm11, %v3657_v10 }
0x1896   : > { %13349 = vmatpush3.xpose.msk.msra.mxu1 %vm782_vm11, %v3657_v10 }
0x1897   : > { %14281 = vmatprep.subr.bf16.mxu1 %v14280_v5 }
0x1899   : > { %13351 = vmatmul.mubr.msk.f32.vlgmr.msra.gmra.mrb[52].mxu1 %vm782_vm11, %v3553_v28 }
0x189a   : > { %14283 = vmatpush3.bf16.msra.mxu1 %v14280_v5 }
0x189b   : > { %13366 = vmatprep.subr.mxu1 %v3750_v13 }
0x189e   : > { %13367 = vmatpush3.msra.mxu1 %v3750_v13 }
0x189f   : > { %14292 = vmatprep.subr.msk.bf16.mxu1 %vm15242_vm8, %v15362_v11 }
0x196c   : > { %v13352_v14 = vpop.f32.mrb[52].mxu1 }
0x196d   : > { %v3842_v41 = vmul.f32 0.4472136, %v13352_v14  ;;  %v3832_v43 = vpop.f32.mrb[53].mxu1 }
0x196e   : > { %v3841_v18 = vmul.f32 0.4472136, %v3832_v43  ;;  %v4329_v43 = vld [vmem:[#allocation2 + $0x230] sm:$0x3] }
0x196f   : > { %v3846_v21 = vsel %vm1158_vm0, %v3842_v41, -inf }
0x1970   : > { %3847 = vmax.xlane.f32.xlu1 %v3846_v21  ;;  %v3843_v22 = vsel %vm1154_vm15, %v3841_v18, -inf }
0x1971   : > { %3844 = vmax.xlane.f32.xlu0 %v3843_v22 }
0x19fd   : > { %v3848_v23 = vpop.xlane.xlu1 %3847 }
0x19fe   : > { %v3850_v24 = vsub.f32 %v3842_v41, %v3848_v23  ;;  %v3845_v25 = vpop.xlane.xlu0 %3844  ;;  %v4328_v41 = vld [vmem:[#allocation2 + $0x228] sm:$0xff] }
0x19ff   : > { %v3849_v26 = vsub.f32 %v3841_v18, %v3845_v25  ;;  %v14302_v18 = vpack.c.bf16 %v4329_v43, %v4328_v41  ;;  %v12159_v25 = vld [vmem:[#allocation2 + $0x218] ss:$0 sm:$0xff] }
0x1a00   : > { %v3853_v28 = vmul.f32 1.442695, %v3850_v24 }
0x1a01   : > { %v3851_v36 = vmul.f32 1.442695, %v3849_v26 }
0x1a03   : > { %14850 = vpow2.f32 %v3851_v36 }
0x1a04   : > { %14852 = vpow2.f32 %v3853_v28 }
0x1a0d   : > { %v14851_v29 = vpop.eup %14850 }
0x1a0e   : > { %v14853_v38 = vpop.eup %14852  ;;  %13359 = vmatprep.mubr.msk.f32.mxu0 %vm1154_vm15, %v14851_v29 }
0x1a0f   : > { %13360 = vmatmul.mubr.msk.f32.vlgmr.msra.gmra.mrb[56].mxu0 %vm1154_vm15, %v14853_v38 }
0x1a10   : > { %14289 = vmatpush3.bf16.msk.msra.mxu0 %vm15242_vm8, %v14284_v34 }
0x1a11   : > { %14298 = vmatprep.subr.msk.bf16.mxu0 %vm15242_vm8, %v15362_v11 }
0x1ae2   : > { %v13361_v35 = vpop.f32.mrb[56].mxu0 }
0x1ae3   : > { %14854 = vrcp.f32 %v13361_v35  ;;  %v3927_v37 = vpop.f32.mrb[57].mxu0 }
0x1ae4   : > { %14856 = vrcp.f32 %v3927_v37  ;;  %v4421_v37 = vld [vmem:[#allocation2 + $0x240] sm:$0xff] }
0x1aed   : > { %v14855_v40 = vpop.eup %14854 }
0x1aee   : > { %v14857_v46 = vpop.eup %14856  ;;  %v3939_v48 = vmul.f32 %v14855_v40, %v14853_v38  ;;  %v12160_v38 = vld [vmem:[#allocation2 + $0x220] ss:$0 sm:$0xff]  ;;  %v4422_v40 = vld [vmem:[#allocation2 + $0x248] sm:$0xff] }
0x1aef   : > { %v3938_v47 = vmul.f32 %v14857_v46, %v14851_v29  ;;  %v14308_v46 = vpack.c.bf16 %v4422_v40, %v4421_v37 }
0x1af1   : > { %13368 = vmatprep.mubr.msk.f32.mxu1 %vm1154_vm15, %v3938_v47  ;;  %v12161_v47 = vld [vmem:[#allocation2 + $0x238] ss:$0 sm:$0xff] }
0x1af2   : > { %13369 = vmatmul.mubr.msk.f32.vlgmr.msra.gmra.mrb[54].mxu1 %vm1154_vm15, %v3939_v48  ;;  %v12011_v48 = vld [vmem:[#allocation2 + $0x50] ss:$0 sm:$0xff] }
0x1af3   : > { %14295 = vmatpush3.bf16.msk.msra.mxu1 %vm15242_vm8, %v15362_v11 }
0x1af4   : > { %14304 = vmatprep.subr.msk.bf16.mxu1 %vm15242_vm8, %v14302_v18 }
0x1bc5   : > { %v13370_v49 = vpop.f32.mrb[54].mxu1 }
0x1bc6   : > { %v4012_v52 = vpop.f32.mrb[55].mxu1 }
0x1bc7   : > { %13375 = vmatprep.mubr.msk.f32.mxu0 %vm782_vm11, %v4012_v52 }
0x1bc8   : > { %13376 = vmatmul.mubr.msk.f32.vlgmr.msra.gmra.mrb[58].mxu0 %vm782_vm11, %v13370_v49 }
0x1bc9   : > { %14301 = vmatpush3.bf16.msk.msra.mxu0 %vm15242_vm8, %v15362_v11 }
0x1bca   : > { %14309 = vmatprep.subr.bf16.mxu0 %v14308_v46 }
0x1c9b   : > { %v13377_v54 = vpop.f32.mrb[58].mxu0 }
0x1c9c   : > { %v4109_v55 = vadd.f32 %v13377_v54, %v12149_v53  ;;  %v4103_v9 = vpop.f32.mrb[59].mxu0 }
0x1c9d   : > { %v4104_v51 = vadd.f32 %v12149_v53, %v4103_v9  ;;  %v15664_v9 = vadd.f32 %v12011_v48, %v15296_v45 }
0x1c9e   : > { %v4113_v4 = vadd.f32 %v4109_v55, %v15543_v15  ;;  %v15661_v55 = vadd.f32 %v15294_v44, %v12011_v48  ;;  %v5108_v48 = vld [vmem:[#allocation2 + $0x2a0] sm:$0x3] }
0x1c9f   : > { %v4112_v56 = vadd.f32 %v4104_v51, %v15539_v12 }
0x1ca0   : > { %v4198_v59 = vmul.f32 %v4113_v4, %v4113_v4 }
0x1ca1   : > { %v4197_v57 = vmul.f32 %v4112_v56, %v4112_v56  ;;  %13382 = vmatprep.mubr.msk.f32.mxu1 %vm782_vm11, %v4112_v56 }
0x1ca2   : > { %13383 = vmatmul.mubr.msk.f32.vlgmr.msra.gmra.mrb[56].mxu1 %vm782_vm11, %v4113_v4 }
0x1ca3   : > { %13389 = vmatprep.mubr.msk.f32.mxu0 %vm782_vm11, %v4197_v57  ;;  %14307 = vmatpush3.bf16.msk.msra.mxu1 %vm15242_vm8, %v14302_v18  ;;  %v12165_v57 = vld [vmem:[#allocation2 + $0x250] ss:$0 sm:$0xff] }
0x1ca4   : > { %13390 = vmatmul.mubr.msk.f32.vlgmr.msra.gmra.mrb[60].mxu0 %vm782_vm11, %v4198_v59  ;;  %14314 = vmatprep.subr.msk.bf16.mxu1 %vm15242_vm8, %v15362_v11 }
0x1ca5   : > { %14311 = vmatpush3.bf16.msra.mxu0 %v14308_v46 }
0x1ca6   : > { %14320 = vmatprep.subr.msk.bf16.mxu0 %vm15242_vm8, %v15362_v11 }
0x1d75   : > { %v13384_v60 = vpop.f32.mrb[56].mxu1 }
0x1d76   : > { %v4196_v62 = vmul.f32 0.1, %v13384_v60  ;;  %v4186_v63 = vpop.f32.mrb[57].mxu1 }
0x1d77   : > { %v4195_v0 = vmul.f32 0.1, %v4186_v63  ;;  %v13391_v7 = vpop.f32.mrb[60].mxu0 }
0x1d78   : > { %v4283_v8 = vmul.f32 %v4196_v62, %v4196_v62  ;;  %v4281_v1 = vmul.f32 0.1, %v13391_v7  ;;  %v4271_v15 = vpop.f32.mrb[61].mxu0  ;;  %4293 = vperm.xlu1 %14816, %v4196_v62   ;;  %v4906_v7 = vld [vmem:[#allocation2 + $0x270] sm:$0x3] }
0x1d79   : > { %v4282_v12 = vmul.f32 %v4195_v0, %v4195_v0  ;;  %v4280_v2 = vmul.f32 0.1, %v4271_v15  ;;  %4288 = vperm.xlu0 %14817, %v4195_v0   ;;  %v4905_v0 = vld [vmem:[#allocation2 + $0x268] sm:$0xff]  ;;  %v15685_v15 = vld [vmem:[#allocation6 + $0x48] sm:$0xff] }
0x1d7a   : > { %v4285_v3 = vsub.f32 %v4281_v1, %v4283_v8 }
0x1d7b   : > { %v4284_v5 = vsub.f32 %v4280_v2, %v4282_v12  ;;  %v14332_v12 = vpack.c.bf16 %v4906_v7, %v4905_v0  ;;  %v15693_v2 = vld [vmem:[#allocation6 + $0x50] sm:$0xff] }
0x1d7c   : > { %v4299_v10 = vadd.f32 1e-05, %v4285_v3  ;;  %v15695_v3 = vld [vmem:[#allocation6 + $0x58] sm:$0xff]  ;;  %v4996_v7 = vld [vmem:[#allocation2 + $0x280] sm:$0xff] }
0x1d7d   : > { %v4298_v20 = vadd.f32 1e-05, %v4284_v5  ;;  %v15703_v5 = vld [vmem:[#allocation6 + $0x60] sm:$0xff] }
0x1d7e   : > { %14858 = vrsqrt.f32 %v4299_v10 }
0x1d7f   : > { %14860 = vrsqrt.f32 %v4298_v20 }
0x1d88   : > { %v14859_v13 = vpop.eup %14858 }
0x1d89   : > { %v14861_v14 = vpop.eup %14860  ;;  %4309 = vperm.xlu1 %14816, %v14859_v13  }
0x1d8a   : > { %4304 = vperm.xlu0 %14817, %v14861_v14  }
0x1df7   : > { %v4294_v21 = vpop.permute.xlu1 %4293 }
0x1df8   : > { %v4289_v22 = vpop.permute.xlu0 %4288  ;;  %v4297_v23 = vsub.f32 %v4113_v4, %v4294_v21 }
0x1df9   : > { %v4296_v24 = vsub.f32 %v4112_v56, %v4289_v22  ;;  %v14328_v56 = vpack.c.bf16 %v15661_v55, %v15664_v9 }
0x1e08   : > { %v4310_v26 = vpop.permute.xlu1 %4309 }
0x1e09   : > { %v4313_v28 = vmul.f32 %v4310_v26, %v4297_v23  ;;  %v4305_v36 = vpop.permute.xlu0 %4304 }
0x1e0a   : > { %v4312_v29 = vmul.f32 %v4305_v36, %v4296_v24 }
0x1e0b   : > { %v4320_v30 = vmul.f32 %v12159_v25, %v4313_v28 }
0x1e0c   : > { %v4319_v31 = vmul.f32 %v12159_v25, %v4312_v29 }
0x1e0d   : > { %v4327_v35 = vadd.f32 %v12160_v38, %v4320_v30 }
0x1e0e   : > { %v4326_v34 = vadd.f32 %v12160_v38, %v4319_v31  ;;  %v12184_v31 = vld [vmem:[#allocation2 + $0x278] ss:$0 sm:$0xff] }
0x1e10   : > { %13396 = vmatprep.mubr.msk.f32.mxu1 %vm782_vm11, %v4326_v34 }
0x1e11   : > { %13397 = vmatmul.mubr.msk.f32.vlgmr.msra.gmra.mrb[58].mxu1 %vm782_vm11, %v4327_v35 }
0x1e12   : > { %14317 = vmatpush3.bf16.msk.msra.mxu1 %vm15242_vm8, %v15362_v11 }
0x1e13   : > { %14324 = vmatprep.subr.bf16.mxu1 %v15077_v32 }
0x1ee4   : > { %v13398_v49 = vpop.f32.mrb[58].mxu1 }
0x1ee5   : > { %v4416_v52 = vadd.f32 %v13398_v49, %v12161_v47  ;;  %v4410_v53 = vpop.f32.mrb[59].mxu1 }
0x1ee6   : > { %v4411_v54 = vadd.f32 %v12161_v47, %v4410_v53  ;;  %v5107_v47 = vld [vmem:[#allocation2 + $0x298] sm:$0xff] }
0x1ee7   : > { %v4420_v4 = vmax.f32 %v4416_v52, 0.0  ;;  %v14344_v49 = vpack.c.bf16 %v5108_v48, %v5107_v47 }
0x1ee8   : > { %v4419_v51 = vmax.f32 %v4411_v54, 0.0 }
0x1eea   : > { %13403 = vmatprep.mubr.msk.f32.mxu0 %vm414_vm6, %v4419_v51 }
0x1eeb   : > { %13404 = vmatmul.mubr.msk.f32.vlgmr.msra.gmra.mrb[62].mxu0 %vm414_vm6, %v4420_v4  ;;  %v12174_v4 = vld [vmem:[#allocation2 + $0x258] ss:$0 sm:$0xff] }
0x1eec   : > { %14323 = vmatpush3.bf16.msk.msra.mxu0 %vm15242_vm8, %v15362_v11 }
0x1eed   : > { %14329 = vmatprep.subr.bf16.mxu0 %v14328_v56 }
0x1fbe   : > { %v13405_v44 = vpop.f32.mrb[62].mxu0 }
0x1fbf   : > { %v4506_v59 = vadd.f32 %v13405_v44, %v12165_v57  ;;  %v4500_v60 = vpop.f32.mrb[63].mxu0 }
0x1fc0   : > { %v4501_v45 = vadd.f32 %v12165_v57, %v4500_v60 }
0x1fc1   : > { %v15673_v62 = vadd.f32 %v4506_v59, %v4327_v35  ;;  %v12175_v59 = vld [vmem:[#allocation2 + $0x260] ss:$0 sm:$0xff] }
0x1fc2   : > { %v15675_v63 = vadd.f32 %v4501_v45, %v4326_v34 }
0x1fc3   : > { %v4595_v1 = vmul.f32 %v15673_v62, %v15673_v62 }
0x1fc4   : > { %v4594_v8 = vmul.f32 %v15675_v63, %v15675_v63  ;;  %13410 = vmatprep.mubr.msk.f32.mxu1 %vm782_vm11, %v15675_v63 }
0x1fc5   : > { %13411 = vmatmul.mubr.msk.f32.vlgmr.msra.gmra.mrb[60].mxu1 %vm782_vm11, %v15673_v62 }
0x1fc6   : > { %13417 = vmatprep.mubr.msk.f32.mxu0 %vm782_vm11, %v4594_v8  ;;  %13424 = vmatprep.mubr.msk.f32.mxu1 %vm15078_vm9, %v15079_v33  ;;  %v4997_v8 = vld [vmem:[#allocation2 + $0x288] sm:$0x3] }
0x1fc7   : > { %13418 = vmatmul.mubr.msk.f32.vlgmr.msra.gmra.mrb[64].mxu0 %vm782_vm11, %v4595_v1 }
0x1fc8   : > { %14331 = vmatpush3.bf16.msra.mxu0 %v14328_v56  ;;  %13437 = vmatprep.mubr.msk.f32.mxu0 %vm414_vm6, %v15685_v15 }
0x1fc9   : > { %14334 = vmatprep.subr.msk.bf16.mxu0 %vm15242_vm8, %v14332_v12 }
0x1fcb   : > { %13438 = vmatmul.mubr.msk.f32.vlgmr.msra.gmra.mrb[66].mxu0 %vm414_vm6, %v15693_v2 }
0x1fcc   : > { %13440 = vmatprep.mubr.msk.f32.mxu0 %vm414_vm6, %v15695_v3  ;;  %14337 = vmatpush3.bf16.msk.msra.mxu0 %vm15242_vm8, %v14332_v12 }
0x1fcd   : > { %14346 = vmatprep.subr.msk.bf16.mxu0 %vm15242_vm8, %v14344_v49 }
0x1fcf   : > { %13441 = vmatmul.mubr.msk.f32.gmra.mrb[68].mxu0 %vm414_vm6, %v15703_v5 }
0x1fd0   : > { %13447 = vmatprep.mubr.msk.f32.mxu0 %vm782_vm11, %v15664_v9 }
0x1fd3   : > { %13448 = vmatmul.mubr.msk.f32.vlgmr.msra.gmra.mrb[70].mxu0 %vm782_vm11, %v15661_v55 }
0x1fd4   : > { %14349 = vmatpush3.bf16.msk.msra.mxu0 %vm15242_vm8, %v14344_v49 }
0x2098   : > { %v13412_v10 = vpop.f32.mrb[60].mxu1 }
0x2099   : > { %v4593_v20 = vmul.f32 0.1, %v13412_v10  ;;  %v4583_v13 = vpop.f32.mrb[61].mxu1  ;;  %v14338_v10 = vpack.c.bf16 %v4997_v8, %v4996_v7 }
0x209a   : > { %v4592_v14 = vmul.f32 0.1, %v4583_v13  ;;  %v13419_v41 = vpop.f32.mrb[64].mxu0  ;;  %v303_v13 = vld [vmem:[#allocation6 + $0x90] sm:$0xff] }
0x209b   : > { %v4680_v43 = vmul.f32 %v4593_v20, %v4593_v20  ;;  %v4678_v18 = vmul.f32 0.1, %v13419_v41  ;;  %v4668_v21 = vpop.f32.mrb[65].mxu0  ;;  %4690 = vperm.xlu1 %14816, %v4593_v20  }
0x209c   : > { %v4679_v22 = vmul.f32 %v4592_v14, %v4592_v14  ;;  %v4677_v23 = vmul.f32 0.1, %v4668_v21  ;;  %4685 = vperm.xlu0 %14817, %v4592_v14   ;;  %v15751_v21 = vld [vmem:[#allocation6 + $0x68] sm:$0xff] }
0x209d   : > { %v4682_v24 = vsub.f32 %v4678_v18, %v4680_v43 }
0x209e   : > { %v4681_v25 = vsub.f32 %v4677_v23, %v4679_v22  ;;  %v13439_v26 = vpop.f32.mrb[66].mxu0  ;;  %v304_v22 = vld [vmem:[#allocation6 + $0x98] sm:$0xff]  ;;  %v305_v23 = vld [vmem:[#allocation6 + $0xa0] sm:$0xff] }
0x209f   : > { %v4696_v28 = vadd.f32 1e-05, %v4682_v24  ;;  %v4886_v36 = vpop.f32.mrb[67].mxu0 }
0x20a0   : > { %v4695_v29 = vadd.f32 1e-05, %v4681_v25  ;;  %13464 = vmatprep.mubr.msk.f32.mxu0 %vm782_vm11, %v4886_v36  ;;  %v15756_v25 = vpack.c.bf16 %v305_v23, %v304_v22 }
0x20a1   : > { %14862 = vrsqrt.f32 %v4696_v28  ;;  %13465 = vmatmul.mubr.msk.f32.vlgmr.msra.gmra.mrb[72].mxu0 %vm782_vm11, %v13439_v26  ;;  %v15762_v28 = vld [vmem:[#allocation6 + $0x80] sm:$0xff] }
0x20a2   : > { %14864 = vrsqrt.f32 %v4695_v29  ;;  %v13442_v38 = vpop.f32.mrb[68].mxu0 }
0x20a3   : > { %v4896_v30 = vpop.f32.mrb[69].mxu0 }
0x20a4   : > { %13467 = vmatprep.mubr.msk.f32.mxu0 %vm782_vm11, %v4896_v30 }
0x20a5   : > { %13468 = vmatmul.mubr.msk.f32.gmra.mrb[74].mxu0 %vm782_vm11, %v13442_v38 }
0x20a6   : > { %v13449_v34 = vpop.f32.mrb[70].mxu0 }
0x20a7   : > { %v15714_v35 = vadd.f32 %v13449_v34, %v12184_v31  ;;  %v4987_v37 = vpop.f32.mrb[71].mxu0 }
0x20a8   : > { %v4988_v39 = vadd.f32 %v12184_v31, %v4987_v37 }
0x20ab   : > { %v14863_v40 = vpop.eup %14862 }
0x20ac   : > { %v14865_v46 = vpop.eup %14864  ;;  %4706 = vperm.xlu1 %14816, %v14863_v40  }
0x20ad   : > { %4701 = vperm.xlu0 %14817, %v14865_v46  }
0x211a   : > { %v4691_v52 = vpop.permute.xlu1 %4690 }
0x211b   : > { %v4686_v53 = vpop.permute.xlu0 %4685  ;;  %v4694_v54 = vsub.f32 %v15673_v62, %v4691_v52  ;;  %v302_v62 = vld [vmem:[#allocation6 + $0x88] sm:$0xff] }
0x211c   : > { %v4693_v51 = vsub.f32 %v15675_v63, %v4686_v53 }
0x212b   : > { %v4707_v56 = vpop.permute.xlu1 %4706 }
0x212c   : > { %v4710_v57 = vmul.f32 %v4707_v56, %v4694_v54  ;;  %v4702_v44 = vpop.permute.xlu0 %4701  ;;  %v12188_v54 = vld [vmem:[#allocation2 + $0x290] ss:$0 sm:$0xff] }
0x212d   : > { %v4709_v60 = vmul.f32 %v4702_v44, %v4693_v51 }
0x212e   : > { %v4717_v45 = vmul.f32 %v12174_v4, %v4710_v57 }
0x212f   : > { %v4716_v0 = vmul.f32 %v12174_v4, %v4709_v60 }
0x2130   : > { %v4724_v1 = vadd.f32 %v12175_v59, %v4717_v45 }
0x2131   : > { %v4723_v12 = vadd.f32 %v12175_v59, %v4716_v0 }
0x2133   : > { %v14325_v20 = vpack.c.bf16 %v4724_v1, %v4723_v12 }
0x2135   : > { %14327 = vmatpush3.bf16.msk.msra.mxu1 %vm15261_vm12, %v14325_v20 }
0x2136   : > { %14340 = vmatprep.subr.msk.bf16.mxu1 %vm15242_vm8, %v14338_v10 }
0x2138   : > { %13425 = vmatmul.mubr.msk.f32.vlgmr.msra.gmra.mrb[62].mxu1 %vm681_vm13, %v15554_v16  ;;  %v12194_v16 = vld [vmem:[#allocation2 + $0x2a8] ss:$0 sm:$0xff] }
0x2139   : > { %13427 = vmatprep.mubr.msk.f32.mxu1 %vm15078_vm9, %v15079_v33  ;;  %14343 = vmatpush3.bf16.msk.msra.mxu1 %vm15242_vm8, %v14338_v10 }
0x213c   : > { %13428 = vmatmul.mubr.msk.f32.gmra.mrb[64].mxu1 %vm681_vm13, %v15560_v42  ;;  %v15746_v42 = vld [vmem:[#allocation6 + $0x70] sm:$0xff] }
0x213d   : > { %13430 = vmatprep.mubr.msk.f32.mxu1 %vm15078_vm9, %v15079_v33 }
0x2140   : > { %13431 = vmatmul.mubr.msk.f32.gmra.mrb[66].mxu1 %vm681_vm13, %v15566_v17  ;;  %v15748_v17 = vpack.c.bf16 %v303_v13, %v302_v62 }
0x2141   : > { %13454 = vmatprep.mubr.msk.f32.mxu1 %vm782_vm11, %v4886_v36 }
0x2142   : > { %14363 = vmatprep.subr.bf16.mxu0 %v15748_v17 }
0x2143   : > { %14365 = vmatpush3.bf16.msra.mxu0 %v15748_v17 }
0x2144   : > { %13455 = vmatmul.mubr.msk.f32.vlgmr.msra.gmra.mrb[68].mxu1 %vm782_vm11, %v13439_v26  ;;  %14367 = vmatprep.subr.bf16.mxu0 %v15756_v25 }
0x2145   : > { %13457 = vmatprep.mubr.msk.f32.mxu1 %vm782_vm11, %v4896_v30 }
0x2147   : > { %14369 = vmatpush3.bf16.msra.mxu0 %v15756_v25 }
0x2148   : > { %13458 = vmatmul.mubr.msk.f32.gmra.mrb[70].mxu1 %vm782_vm11, %v13442_v38  ;;  %v15765_v38 = vld [vmem:[#allocation6 + $0x78] sm:$0xff] }
0x2149   : > { %13478 = vmatprep.mubr.msk.f32.mxu1 %vm782_vm11, %v4988_v39  ;;  %v15789_v39 = vld [vmem:[#allocation6 + $0xb0] sm:$0xff] }
0x2174   : > { %v13466_v63 = vpop.f32.mrb[72].mxu0 }
0x2175   : > { %v5189_v14 = vadd.f32 %v13466_v63, %v12194_v16  ;;  %v5183_v41 = vpop.f32.mrb[73].mxu0  ;;  %v15791_v63 = vld [vmem:[#allocation6 + $0xa8] sm:$0xff] }
0x2176   : > { %v5184_v43 = vadd.f32 %v12194_v16, %v5183_v41 }
0x2177   : > { %v5203_v18 = vmul.f32 %v5189_v14, %v15746_v42 }
0x2178   : > { %v5202_v24 = vmul.f32 %v5184_v43, %v15751_v21  ;;  %v13469_v36 = vpop.f32.mrb[74].mxu0 }
0x2179   : > { %v5199_v29 = vadd.f32 %v13469_v36, %v12194_v16  ;;  %v5193_v30 = vpop.f32.mrb[75].mxu0 }
0x217a   : > { %v15759_v26 = vpack.c.bf16 %v5203_v18, %v5202_v24  ;;  %v5194_v31 = vadd.f32 %v12194_v16, %v5193_v30 }
0x217b   : > { %v5205_v34 = vmul.f32 %v5199_v29, %v15762_v28 }
0x217c   : > { %14371 = vmatprep.subr.bf16.mxu0 %v15759_v26  ;;  %v5204_v37 = vmul.f32 %v5194_v31, %v15765_v38 }
0x217e   : > { %v14374_v40 = vpack.c.bf16 %v5205_v34, %v5204_v37  ;;  %v5482_v34 = vld [vmem:[#allocation2 + $0x2b0] sm:$0xff]  ;;  %v5483_v37 = vld [vmem:[#allocation2 + $0x2b8] sm:$0x3] }
0x220b   : > { %v15769_v46 = vpop.f32.mrb[62].mxu1 }
0x220c   : > { %v13426_v47 = vpop.f32.mrb[63].mxu1 }
0x220d   : > { %v14378_v47 = vpack.c.bf16 %v5483_v37, %v5482_v34 }
0x220f   : > { %v15771_v48 = vpop.f32.mrb[64].mxu1 }
0x2210   : > { %v13429_v49 = vpop.f32.mrb[65].mxu1 }
0x2213   : > { %v15773_v52 = vpop.f32.mrb[66].mxu1 }
0x2214   : > { %v13432_v53 = vpop.f32.mrb[67].mxu1 }
0x2217   : > { %v13456_v51 = vpop.f32.mrb[68].mxu1 }
0x2218   : > { %v5090_v4 = vadd.f32 %v13456_v51, %v12188_v54  ;;  %v5084_v56 = vpop.f32.mrb[69].mxu1 }
0x2219   : > { %v5085_v57 = vadd.f32 %v12188_v54, %v5084_v56 }
0x221a   : > { %v5104_v44 = vmul.f32 %v5090_v4, %v15746_v42 }
0x221b   : > { %v5103_v59 = vmul.f32 %v5085_v57, %v15751_v21  ;;  %v13459_v60 = vpop.f32.mrb[70].mxu1  ;;  %v12210_v57 = vld [vmem:[#allocation2 + $0x2c0] ss:$0 sm:$0xff] }
0x221c   : > { %v5100_v45 = vadd.f32 %v13459_v60, %v12188_v54  ;;  %v5094_v0 = vpop.f32.mrb[71].mxu1 }
0x221d   : > { %v14350_v7 = vpack.c.bf16 %v5104_v44, %v5103_v59  ;;  %v5095_v8 = vadd.f32 %v12188_v54, %v5094_v0 }
0x221e   : > { %v5106_v1 = vmul.f32 %v5100_v45, %v15762_v28 }
0x221f   : > { %v5105_v12 = vmul.f32 %v5095_v8, %v15765_v38  ;;  %14352 = vmatprep.subr.msk.bf16.mxu1 %vm15327_vm14, %v14350_v7  ;;  %v5881_v8 = vld [vmem:[#allocation2 + $0x2f8] sm:$0x3] }
0x2220   : > { %14355 = vmatpush3.bf16.xpose.msk.msra.mxu1 %vm15327_vm14, %v14350_v7  ;;  %v5880_v7 = vld [vmem:[#allocation2 + $0x2f0] sm:$0xff] }
0x2221   : > { %v14356_v10 = vpack.c.bf16 %v5106_v1, %v5105_v12 }
0x2223   : > { %14358 = vmatprep.subr.msk.bf16.mxu1 %vm15327_vm14, %v14356_v10 }
0x2228   : > { %14361 = vmatpush3.bf16.xpose.msk.msra.mxu1 %vm15327_vm14, %v14356_v10  ;;  %v14403_v10 = vpack.c.bf16 %v5881_v8, %v5880_v7 }
0x2229   : > { %14380 = vmatprep.subr.msk.bf16.mxu1 %vm15242_vm8, %v14378_v47 }
0x222f   : > { %13479 = vmatmul.mubr.msk.f32.vlgmr.msra.gmra.mrb[72].mxu1 %vm782_vm11, %v15714_v35 }
0x2230   : > { %14383 = vmatpush3.bf16.msk.msra.mxu1 %vm15242_vm8, %v14378_v47 }
0x2231   : > { %14392 = vmatprep.subr.msk.bf16.mxu1 %vm15242_vm8, %v15362_v11 }
0x2302   : > { %v13480_v20 = vpop.f32.mrb[72].mxu1 }
0x2303   : > { %v5300_v16 = vmul.f32 0.4472136, %v13480_v20  ;;  %v5290_v62 = vpop.f32.mrb[73].mxu1 }
0x2304   : > { %v5299_v13 = vmul.f32 0.4472136, %v5290_v62 }
0x2305   : > { %v5302_v14 = vadd.f32 %v5300_v16, %v15789_v39 }
0x2306   : > { %v5301_v41 = vadd.f32 %v5299_v13, %v15791_v63 }
0x2307   : > { %v5307_v43 = vsel %vm5303_vm1, %v5302_v14, -inf }
0x2308   : > { %5308 = vmax.xlane.f32.xlu1 %v5307_v43  ;;  %v5304_v18 = vsel %vm5303_vm1, %v5301_v41, -inf }
0x2309   : > { %5305 = vmax.xlane.f32.xlu0 %v5304_v18 }
0x2395   : > { %v5309_v35 = vpop.xlane.xlu1 %5308 }
0x2396   : > { %v5311_v22 = vsub.f32 %v5302_v14, %v5309_v35  ;;  %v5306_v23 = vpop.xlane.xlu0 %5305 }
0x2397   : > { %v5310_v24 = vsub.f32 %v5301_v41, %v5306_v23 }
0x2398   : > { %v5314_v36 = vmul.f32 1.442695, %v5311_v22 }
0x2399   : > { %v5312_v29 = vmul.f32 1.442695, %v5310_v24  ;;  %v12226_v24 = vld [vmem:[#allocation2 + $0x300] ss:$0 sm:$0xff] }
0x239b   : > { %14866 = vpow2.f32 %v5312_v29 }
0x239c   : > { %14868 = vpow2.f32 %v5314_v36 }
0x23a5   : > { %v14867_v30 = vpop.eup %14866 }
0x23a6   : > { %v14869_v31 = vpop.eup %14868  ;;  %13489 = vmatprep.mubr.msk.f32.mxu0 %vm5303_vm1, %v14867_v30 }
0x23a7   : > { %13490 = vmatmul.mubr.msk.f32.vlgmr.msra.gmra.mrb[76].mxu0 %vm5303_vm1, %v14869_v31 }
0x23a8   : > { %14373 = vmatpush3.bf16.msra.mxu0 %v15759_v26 }
0x23a9   : > { %14375 = vmatprep.subr.bf16.mxu0 %v14374_v40 }
0x23ac   : > { %14377 = vmatpush3.bf16.msra.mxu0 %v14374_v40 }
0x23ad   : > { %14386 = vmatprep.subr.msk.bf16.mxu0 %vm15242_vm8, %v15362_v11 }
0x247a   : > { %v13491_v26 = vpop.f32.mrb[76].mxu0 }
0x247b   : > { %14870 = vrcp.f32 %v13491_v26  ;;  %v5388_v40 = vpop.f32.mrb[77].mxu0 }
0x247c   : > { %14872 = vrcp.f32 %v5388_v40 }
0x2485   : > { %v14871_v49 = vpop.eup %14870 }
0x2486   : > { %v14873_v53 = vpop.eup %14872  ;;  %v5400_v51 = vmul.f32 %v14871_v49, %v14869_v31 }
0x2487   : > { %v5399_v54 = vmul.f32 %v14873_v53, %v14867_v30 }
0x2489   : > { %13500 = vmatprep.mubr.msk.f32.mxu0 %vm5303_vm1, %v5399_v54 }
0x248a   : > { %13501 = vmatmul.mubr.msk.f32.vlgmr.msra.gmra.mrb[78].mxu0 %vm5303_vm1, %v5400_v51 }
0x248b   : > { %14389 = vmatpush3.bf16.msk.msra.mxu0 %vm15242_vm8, %v15362_v11 }
0x255d   : > { %v13502_v4 = vpop.f32.mrb[78].mxu0 }
0x255e   : > { %v5473_v56 = vpop.f32.mrb[79].mxu0 }
0x255f   : > { %13507 = vmatprep.mubr.msk.f32.mxu1 %vm782_vm11, %v5473_v56 }
0x2560   : > { %13508 = vmatmul.mubr.msk.f32.vlgmr.msra.gmra.mrb[74].mxu1 %vm782_vm11, %v13502_v4 }
0x2561   : > { %14395 = vmatpush3.bf16.msk.msra.mxu1 %vm15242_vm8, %v15362_v11 }
0x2562   : > { %14402 = vmatprep.subr.bf16.mxu1 %v15077_v32 }
0x2633   : > { %v13509_v44 = vpop.f32.mrb[74].mxu1 }
0x2634   : > { %v5570_v59 = vadd.f32 %v13509_v44, %v12210_v57  ;;  %v5564_v60 = vpop.f32.mrb[75].mxu1 }
0x2635   : > { %v5565_v45 = vadd.f32 %v12210_v57, %v5564_v60  ;;  %v5790_v60 = vld [vmem:[#allocation2 + $0x2e0] sm:$0x3] }
0x2636   : > { %v15822_v0 = vadd.f32 %v5570_v59, %v15661_v55  ;;  %v5789_v59 = vld [vmem:[#allocation2 + $0x2d8] sm:$0xff] }
0x2637   : > { %v15825_v1 = vadd.f32 %v5565_v45, %v15664_v9  ;;  %v14396_v45 = vpack.c.bf16 %v5790_v60, %v5789_v59 }
0x2638   : > { %v5659_v20 = vmul.f32 %v15822_v0, %v15822_v0 }
0x2639   : > { %v5658_v12 = vmul.f32 %v15825_v1, %v15825_v1  ;;  %13514 = vmatprep.mubr.msk.f32.mxu0 %vm782_vm11, %v15825_v1  ;;  %14398 = vmatprep.subr.msk.bf16.mxu0 %vm15242_vm8, %v14396_v45 }
0x263a   : > { %13515 = vmatmul.mubr.msk.f32.vlgmr.msra.gmra.mrb[80].mxu0 %vm782_vm11, %v15822_v0 }
0x263b   : > { %13521 = vmatprep.mubr.msk.f32.mxu1 %vm782_vm11, %v5658_v12  ;;  %14401 = vmatpush3.bf16.msk.msra.mxu0 %vm15242_vm8, %v14396_v45 }
0x263c   : > { %13522 = vmatmul.mubr.msk.f32.vlgmr.msra.gmra.mrb[76].mxu1 %vm782_vm11, %v5659_v20  ;;  %14406 = vmatprep.subr.bf16.mxu0 %v15077_v32  ;;  %v12220_v20 = vld [vmem:[#allocation2 + $0x2c8] ss:$0 sm:$0xff] }
0x263d   : > { %14405 = vmatpush3.bf16.msk.msra.mxu1 %vm15242_vm8, %v14403_v10  ;;  %13535 = vmatprep.mubr.msk.f32.mxu1 %vm15078_vm9, %v15079_v33 }
0x2640   : > { %13536 = vmatmul.mubr.msk.f32.vlgmr.msra.gmra.mrb[78].mxu1 %vm782_vm11, %v15769_v46 }
0x2641   : > { %13538 = vmatprep.mubr.msk.f32.mxu1 %vm15078_vm9, %v15079_v33 }
0x2644   : > { %13539 = vmatmul.mubr.msk.f32.gmra.mrb[80].mxu1 %vm782_vm11, %v15771_v48 }
0x2645   : > { %13541 = vmatprep.mubr.msk.f32.mxu1 %vm15078_vm9, %v15079_v33 }
0x2648   : > { %13542 = vmatmul.mubr.msk.f32.gmra.mrb[82].mxu1 %vm782_vm11, %v15773_v52 }
0x270d   : > { %v13516_v55 = vpop.f32.mrb[80].mxu0 }
0x270e   : > { %v5657_v9 = vmul.f32 0.1, %v13516_v55  ;;  %v5647_v16 = vpop.f32.mrb[81].mxu0 }
0x270f   : > { %v5656_v62 = vmul.f32 0.1, %v5647_v16  ;;  %v13523_v13 = vpop.f32.mrb[76].mxu1 }
0x2710   : > { %v5744_v14 = vmul.f32 %v5657_v9, %v5657_v9  ;;  %v5742_v41 = vmul.f32 0.1, %v13523_v13  ;;  %v5732_v43 = vpop.f32.mrb[77].mxu1  ;;  %5754 = vperm.xlu1 %14816, %v5657_v9   ;;  %v12221_v13 = vld [vmem:[#allocation2 + $0x2d0] ss:$0 sm:$0xff] }
0x2711   : > { %v5743_v18 = vmul.f32 %v5656_v62, %v5656_v62  ;;  %v5741_v35 = vmul.f32 0.1, %v5732_v43  ;;  %5749 = vperm.xlu0 %14817, %v5656_v62   ;;  %v5983_v43 = vld [vmem:[#allocation2 + $0x310] sm:$0x3] }
0x2712   : > { %v5746_v22 = vsub.f32 %v5742_v41, %v5744_v14  ;;  %v5982_v41 = vld [vmem:[#allocation2 + $0x308] sm:$0xff] }
0x2713   : > { %v5745_v23 = vsub.f32 %v5741_v35, %v5743_v18  ;;  %v5965_v36 = vpop.f32.mrb[78].mxu1 }
0x2714   : > { %v5760_v29 = vadd.f32 1e-05, %v5746_v22  ;;  %v13537_v30 = vpop.f32.mrb[79].mxu1  ;;  %v5966_v34 = vadd.f32 %v12226_v24, %v5965_v36  ;;  %v14407_v22 = vpack.c.bf16 %v5983_v43, %v5982_v41 }
0x2715   : > { %v5759_v31 = vadd.f32 1e-05, %v5745_v23 }
0x2716   : > { %14874 = vrsqrt.f32 %v5760_v29  ;;  %v5979_v40 = vmul.f32 %v15595_v58, %v5966_v34 }
0x2717   : > { %14876 = vrsqrt.f32 %v5759_v31  ;;  %v5970_v37 = vpop.f32.mrb[80].mxu1  ;;  %v12231_v31 = vld [vmem:[#allocation2 + $0x318] ss:$0 sm:$0xff] }
0x2718   : > { %v5971_v47 = vadd.f32 %v12226_v24, %v5970_v37  ;;  %v13540_v26 = vpop.f32.mrb[81].mxu1 }
0x271a   : > { %v5980_v49 = vmul.f32 %v15599_v61, %v5971_v47 }
0x271b   : > { %v5975_v53 = vpop.f32.mrb[82].mxu1 }
0x271c   : > { %v14410_v54 = vpack.c.bf16 %v5980_v49, %v5979_v40  ;;  %v5976_v51 = vadd.f32 %v12226_v24, %v5975_v53  ;;  %v13543_v4 = vpop.f32.mrb[83].mxu1 }
0x271e   : > { %v5981_v56 = vmul.f32 %v15605_v6, %v5976_v51  ;;  %14412 = vmatprep.subr.msk.bf16.mxu1 %vm15327_vm14, %v14410_v54 }
0x271f   : > { %14415 = vmatpush3.bf16.xpose.msk.msra.mxu1 %vm15327_vm14, %v14410_v54 }
0x2720   : > { %v14875_v57 = vpop.eup %14874  ;;  %13561 = vmatprep.subr.msk.mxu1 %vm782_vm11, %v5981_v56 }
0x2721   : > { %v14877_v44 = vpop.eup %14876  ;;  %5770 = vperm.xlu1 %14816, %v14875_v57  }
0x2722   : > { %5765 = vperm.xlu0 %14817, %v14877_v44  }
0x2727   : > { %13562 = vmatpush3.xpose.msk.msra.mxu1 %vm782_vm11, %v5981_v56 }
0x278f   : > { %v5755_v7 = vpop.permute.xlu1 %5754 }
0x2790   : > { %v5750_v8 = vpop.permute.xlu0 %5749  ;;  %v5758_v12 = vsub.f32 %v15822_v0, %v5755_v7  ;;  %v15885_v0 = vld [vmem:[#allocation6 + $0x40] sm:$0xff] }
0x2791   : > { %v5757_v10 = vsub.f32 %v15825_v1, %v5750_v8  ;;  %v12222_v1 = vld [vmem:[#allocation2 + $0x2e8] ss:$0 sm:$0xff] }
0x27a0   : > { %v5771_v55 = vpop.permute.xlu1 %5770 }
0x27a1   : > { %v5774_v9 = vmul.f32 %v5771_v55, %v5758_v12  ;;  %v5766_v16 = vpop.permute.xlu0 %5765 }
0x27a2   : > { %v5773_v62 = vmul.f32 %v5766_v16, %v5757_v10 }
0x27a3   : > { %v5781_v14 = vmul.f32 %v12220_v20, %v5774_v9 }
0x27a4   : > { %v5780_v18 = vmul.f32 %v12220_v20, %v5773_v62  ;;  %v6345_v62 = vld [vmem:[#allocation2 + $0x320] sm:$0xff] }
0x27a5   : > { %v15869_v23 = vadd.f32 %v12221_v13, %v5781_v14 }
0x27a6   : > { %v15867_v35 = vadd.f32 %v12221_v13, %v5780_v18  ;;  %v6346_v13 = vld [vmem:[#allocation2 + $0x328] sm:$0x3] }
0x27a7   : > { %v14424_v14 = vpack.c.bf16 %v6346_v13, %v6345_v62  ;;  %v12255_v13 = vld [vmem:[#allocation2 + $0x338] ss:$0 sm:$0xff] }
0x27a8   : > { %13528 = vmatprep.mubr.msk.f32.mxu0 %vm782_vm11, %v15867_v35 }
0x27a9   : > { %13529 = vmatmul.mubr.msk.f32.vlgmr.msra.gmra.mrb[82].mxu0 %vm782_vm11, %v15869_v23 }
0x27aa   : > { %14409 = vmatpush3.bf16.msk.msra.mxu0 %vm15242_vm8, %v14407_v22  ;;  %13548 = vmatprep.mubr.msk.f32.mxu0 %vm15078_vm9, %v15079_v33 }
0x27ab   : > { %14417 = vmatprep.subr.bf16.mxu0 %v15344_v50 }
0x27ad   : > { %13549 = vmatmul.mubr.msk.f32.vlgmr.msra.gmra.mrb[84].mxu0 %vm782_vm11, %v15769_v46 }
0x27ae   : > { %13551 = vmatprep.mubr.msk.f32.mxu0 %vm15078_vm9, %v15079_v33  ;;  %14419 = vmatpush3.bf16.msra.mxu0 %v15344_v50 }
0x27af   : > { %13570 = vmatprep.subr.mxu0 %v15885_v0 }
0x27b1   : > { %13552 = vmatmul.mubr.msk.f32.gmra.mrb[86].mxu0 %vm782_vm11, %v15771_v48 }
0x27b2   : > { %13554 = vmatprep.mubr.msk.f32.mxu0 %vm15078_vm9, %v15079_v33  ;;  %13571 = vmatpush3.msra.mxu0 %v15885_v0 }
0x27b3   : > { %14426 = vmatprep.subr.msk.bf16.mxu0 %vm15242_vm8, %v14424_v14 }
0x27b5   : > { %13555 = vmatmul.mubr.msk.f32.gmra.mrb[88].mxu0 %vm782_vm11, %v15773_v52 }
0x287c   : > { %v13530_v24 = vpop.f32.mrb[82].mxu0 }
0x287d   : > { %v5871_v36 = vpop.f32.mrb[83].mxu0  ;;  %v5877_v30 = vadd.f32 %v13530_v24, %v12222_v1 }
0x287e   : > { %v5872_v29 = vadd.f32 %v12222_v1, %v5871_v36 }
0x2880   : > { %v6058_v34 = vpop.f32.mrb[84].mxu0  ;;  %13563 = vmatprep.mubr.msk.f32.mxu1 %vm782_vm11, %v5872_v29 }
0x2881   : > { %v13550_v37 = vpop.f32.mrb[85].mxu0  ;;  %13564 = vmatmul.mubr.msk.f32.vlgmr.msra.gmra.mrb[84].mxu1 %vm782_vm11, %v5877_v30  ;;  %v6059_v47 = vadd.f32 %v12231_v31, %v6058_v34  ;;  %v12245_v30 = vld [vmem:[#allocation2 + $0x330] ss:$0 sm:$0xff] }
0x2883   : > { %v6072_v53 = vmul.f32 %v15595_v58, %v6059_v47 }
0x2884   : > { %v6063_v26 = vpop.f32.mrb[86].mxu0 }
0x2885   : > { %v6064_v40 = vadd.f32 %v12231_v31, %v6063_v26  ;;  %v13553_v49 = vpop.f32.mrb[87].mxu0 }
0x2887   : > { %v6073_v54 = vmul.f32 %v15599_v61, %v6064_v40 }
0x2888   : > { %v6068_v51 = vpop.f32.mrb[88].mxu0 }
0x2889   : > { %v6069_v4 = vadd.f32 %v12231_v31, %v6068_v51  ;;  %v13556_v56 = vpop.f32.mrb[89].mxu0  ;;  %v14420_v57 = vpack.c.bf16 %v6073_v54, %v6072_v53 }
0x288b   : > { %v6074_v44 = vmul.f32 %v15605_v6, %v6069_v4  ;;  %14421 = vmatprep.subr.bf16.mxu1 %v14420_v57 }
0x288c   : > { %14423 = vmatpush3.bf16.msra.mxu1 %v14420_v57 }
0x288d   : > { %13579 = vmatprep.subr.mxu1 %v6074_v44 }
0x2890   : > { %13580 = vmatpush3.msra.mxu1 %v6074_v44 }
0x2891   : > { %14432 = vmatprep.subr.msk.bf16.mxu1 %vm15242_vm8, %v15362_v11 }
0x2954   : > { %v13565_v59 = vpop.f32.mrb[84].mxu1 }
0x2955   : > { %v6166_v60 = vmul.f32 0.4472136, %v13565_v59  ;;  %v6156_v45 = vpop.f32.mrb[85].mxu1 }
0x2956   : > { %v6165_v58 = vmul.f32 0.4472136, %v6156_v45 }
0x2957   : > { %v6170_v61 = vsel %vm1154_vm15, %v6166_v60, -inf }
0x2958   : > { %6171 = vmax.xlane.f32.xlu1 %v6170_v61  ;;  %v6167_v7 = vsel %vm1154_vm15, %v6165_v58, -inf }
0x2959   : > { %6168 = vmax.xlane.f32.xlu0 %v6167_v7 }
0x29e5   : > { %v6172_v8 = vpop.xlane.xlu1 %6171 }
0x29e6   : > { %v6174_v6 = vsub.f32 %v6166_v60, %v6172_v8  ;;  %v6169_v12 = vpop.xlane.xlu0 %6168 }
0x29e7   : > { %v6173_v10 = vsub.f32 %v6165_v58, %v6169_v12  ;;  %v6652_v12 = vld [vmem:[#allocation2 + $0x348] sm:$0xff] }
0x29e8   : > { %v6177_v20 = vmul.f32 1.442695, %v6174_v6 }
0x29e9   : > { %v6175_v55 = vmul.f32 1.442695, %v6173_v10  ;;  %v6653_v10 = vld [vmem:[#allocation2 + $0x350] sm:$0x3] }
0x29eb   : > { %14878 = vpow2.f32 %v6175_v55 }
0x29ec   : > { %14880 = vpow2.f32 %v6177_v20  ;;  %v14442_v20 = vpack.c.bf16 %v6653_v10, %v6652_v12 }
0x29f5   : > { %v14879_v9 = vpop.eup %14878 }
0x29f6   : > { %v14881_v16 = vpop.eup %14880  ;;  %13572 = vmatprep.mubr.msk.f32.mxu0 %vm1154_vm15, %v14879_v9 }
0x29f7   : > { %13573 = vmatmul.mubr.msk.f32.vlgmr.msra.gmra.mrb[90].mxu0 %vm1154_vm15, %v14881_v16 }
0x29f8   : > { %14429 = vmatpush3.bf16.msk.msra.mxu0 %vm15242_vm8, %v14424_v14 }
0x29f9   : > { %14438 = vmatprep.subr.msk.bf16.mxu0 %vm15242_vm8, %v15362_v11 }
0x2aca   : > { %v13574_v41 = vpop.f32.mrb[90].mxu0 }
0x2acb   : > { %14882 = vrcp.f32 %v13574_v41  ;;  %v6251_v43 = vpop.f32.mrb[91].mxu0 }
0x2acc   : > { %14884 = vrcp.f32 %v6251_v43 }
0x2ad5   : > { %v14883_v18 = vpop.eup %14882 }
0x2ad6   : > { %v14885_v22 = vpop.eup %14884  ;;  %v6263_v24 = vmul.f32 %v14883_v18, %v14881_v16 }
0x2ad7   : > { %v6262_v1 = vmul.f32 %v14885_v22, %v14879_v9  ;;  %v12256_v22 = vld [vmem:[#allocation2 + $0x340] ss:$0 sm:$0xff] }
0x2ad9   : > { %13581 = vmatprep.mubr.msk.f32.mxu1 %vm1154_vm15, %v6262_v1 }
0x2ada   : > { %13582 = vmatmul.mubr.msk.f32.vlgmr.msra.gmra.mrb[86].mxu1 %vm1154_vm15, %v6263_v24 }
0x2adb   : > { %14435 = vmatpush3.bf16.msk.msra.mxu1 %vm15242_vm8, %v15362_v11 }
0x2adc   : > { %14444 = vmatprep.subr.msk.bf16.mxu1 %vm15242_vm8, %v14442_v20 }
0x2bad   : > { %v13583_v36 = vpop.f32.mrb[86].mxu1 }
0x2bae   : > { %v6336_v29 = vpop.f32.mrb[87].mxu1 }
0x2baf   : > { %13588 = vmatprep.mubr.msk.f32.mxu0 %vm782_vm11, %v6336_v29 }
0x2bb0   : > { %13589 = vmatmul.mubr.msk.f32.vlgmr.msra.gmra.mrb[92].mxu0 %vm782_vm11, %v13583_v36 }
0x2bb1   : > { %14441 = vmatpush3.bf16.msk.msra.mxu0 %vm15242_vm8, %v15362_v11 }
0x2c83   : > { %v13590_v31 = vpop.f32.mrb[92].mxu0 }
0x2c84   : > { %v6433_v34 = vadd.f32 %v13590_v31, %v12245_v30  ;;  %v6427_v37 = vpop.f32.mrb[93].mxu0  ;;  %v6746_v31 = vld [vmem:[#allocation2 + $0x368] sm:$0xff] }
0x2c85   : > { %v6428_v47 = vadd.f32 %v12245_v30, %v6427_v37  ;;  %v6745_v30 = vld [vmem:[#allocation2 + $0x360] sm:$0xff]  ;;  %v12257_v37 = vld [vmem:[#allocation2 + $0x358] ss:$0 sm:$0xff] }
0x2c86   : > { %v6437_v26 = vadd.f32 %v6433_v34, %v15869_v23  ;;  %v14448_v34 = vpack.c.bf16 %v6746_v31, %v6745_v30 }
0x2c87   : > { %v6436_v40 = vadd.f32 %v6428_v47, %v15867_v35 }
0x2c88   : > { %v6522_v53 = vmul.f32 %v6437_v26, %v6437_v26  ;;  %14449 = vmatprep.subr.bf16.mxu0 %v14448_v34 }
0x2c89   : > { %v6521_v49 = vmul.f32 %v6436_v40, %v6436_v40  ;;  %13595 = vmatprep.mubr.msk.f32.mxu1 %vm782_vm11, %v6436_v40 }
0x2c8a   : > { %13596 = vmatmul.mubr.msk.f32.vlgmr.msra.gmra.mrb[88].mxu1 %vm782_vm11, %v6437_v26 }
0x2c8b   : > { %13602 = vmatprep.mubr.msk.f32.mxu0 %vm782_vm11, %v6521_v49  ;;  %14447 = vmatpush3.bf16.msk.msra.mxu1 %vm15242_vm8, %v14442_v20 }
0x2c8c   : > { %13603 = vmatmul.mubr.msk.f32.vlgmr.msra.gmra.mrb[94].mxu0 %vm782_vm11, %v6522_v53  ;;  %14454 = vmatprep.subr.msk.bf16.mxu1 %vm15242_vm8, %v15362_v11 }
0x2c8d   : > { %14451 = vmatpush3.bf16.msra.mxu0 %v14448_v34 }
0x2c8e   : > { %14460 = vmatprep.subr.msk.bf16.mxu0 %vm15242_vm8, %v15362_v11 }
0x2d5d   : > { %v13597_v54 = vpop.f32.mrb[88].mxu1 }
0x2d5e   : > { %v6520_v51 = vmul.f32 0.1, %v13597_v54  ;;  %v6510_v4 = vpop.f32.mrb[89].mxu1 }
0x2d5f   : > { %v6519_v56 = vmul.f32 0.1, %v6510_v4  ;;  %v13604_v57 = vpop.f32.mrb[94].mxu0 }
0x2d60   : > { %v6607_v44 = vmul.f32 %v6520_v51, %v6520_v51  ;;  %v6605_v59 = vmul.f32 0.1, %v13604_v57  ;;  %v6595_v23 = vpop.f32.mrb[95].mxu0  ;;  %6617 = vperm.xlu1 %14816, %v6520_v51   ;;  %v12261_v51 = vld [vmem:[#allocation2 + $0x370] ss:$0 sm:$0xff] }
0x2d61   : > { %v6606_v35 = vmul.f32 %v6519_v56, %v6519_v56  ;;  %v6604_v60 = vmul.f32 0.1, %v6595_v23  ;;  %6612 = vperm.xlu0 %14817, %v6519_v56  }
0x2d62   : > { %v6609_v45 = vsub.f32 %v6605_v59, %v6607_v44 }
0x2d63   : > { %v6608_v58 = vsub.f32 %v6604_v60, %v6606_v35 }
0x2d64   : > { %v6623_v61 = vadd.f32 1e-05, %v6609_v45 }
0x2d65   : > { %v6622_v7 = vadd.f32 1e-05, %v6608_v58 }
0x2d66   : > { %14886 = vrsqrt.f32 %v6623_v61 }
0x2d67   : > { %14888 = vrsqrt.f32 %v6622_v7 }
0x2d70   : > { %v14887_v8 = vpop.eup %14886 }
0x2d71   : > { %v14889_v6 = vpop.eup %14888  ;;  %6633 = vperm.xlu1 %14816, %v14887_v8  }
0x2d72   : > { %6628 = vperm.xlu0 %14817, %v14889_v6  }
0x2ddf   : > { %v6618_v55 = vpop.permute.xlu1 %6617 }
0x2de0   : > { %v6613_v9 = vpop.permute.xlu0 %6612  ;;  %v6621_v16 = vsub.f32 %v6437_v26, %v6618_v55 }
0x2de1   : > { %v6620_v62 = vsub.f32 %v6436_v40, %v6613_v9 }
0x2df0   : > { %v6634_v14 = vpop.permute.xlu1 %6633 }
0x2df1   : > { %v6637_v41 = vmul.f32 %v6634_v14, %v6621_v16  ;;  %v6629_v43 = vpop.permute.xlu0 %6628 }
0x2df2   : > { %v6636_v18 = vmul.f32 %v6629_v43, %v6620_v62  ;;  %v7135_v43 = vld [vmem:[#allocation2 + $0x390] sm:$0x3] }
0x2df3   : > { %v6644_v1 = vmul.f32 %v12255_v13, %v6637_v41  ;;  %v7134_v41 = vld [vmem:[#allocation2 + $0x388] sm:$0xff] }
0x2df4   : > { %v6643_v24 = vmul.f32 %v12255_v13, %v6636_v18  ;;  %v14468_v18 = vpack.c.bf16 %v7135_v43, %v7134_v41 }
0x2df5   : > { %v6651_v29 = vadd.f32 %v12256_v22, %v6644_v1 }
0x2df6   : > { %v6650_v36 = vadd.f32 %v12256_v22, %v6643_v24 }
0x2df8   : > { %13609 = vmatprep.mubr.msk.f32.mxu1 %vm782_vm11, %v6650_v36 }
0x2df9   : > { %13610 = vmatmul.mubr.msk.f32.vlgmr.msra.gmra.mrb[90].mxu1 %vm782_vm11, %v6651_v29 }
0x2dfa   : > { %14457 = vmatpush3.bf16.msk.msra.mxu1 %vm15242_vm8, %v15362_v11 }
0x2ecc   : > { %v13611_v47 = vpop.f32.mrb[90].mxu1 }
0x2ecd   : > { %v6740_v26 = vadd.f32 %v13611_v47, %v12257_v37  ;;  %v6734_v40 = vpop.f32.mrb[91].mxu1 }
0x2ece   : > { %v6735_v49 = vadd.f32 %v12257_v37, %v6734_v40  ;;  %v12271_v37 = vld [vmem:[#allocation2 + $0x380] ss:$0 sm:$0xff] }
0x2ecf   : > { %v6744_v54 = vmax.f32 %v6740_v26, 0.0 }
0x2ed0   : > { %v6743_v53 = vmax.f32 %v6735_v49, 0.0 }
0x2ed2   : > { %13616 = vmatprep.mubr.msk.f32.mxu0 %vm414_vm6, %v6743_v53 }
0x2ed3   : > { %13617 = vmatmul.mubr.msk.f32.vlgmr.msra.gmra.mrb[96].mxu0 %vm414_vm6, %v6744_v54 }
0x2ed4   : > { %14463 = vmatpush3.bf16.msk.msra.mxu0 %vm15242_vm8, %v15362_v11 }
0x2ed5   : > { %14470 = vmatprep.subr.msk.bf16.mxu0 %vm15242_vm8, %v14468_v18 }
0x2fa6   : > { %v13618_v4 = vpop.f32.mrb[96].mxu0 }
0x2fa7   : > { %v6830_v56 = vadd.f32 %v13618_v4, %v12261_v51  ;;  %v6824_v57 = vpop.f32.mrb[97].mxu0  ;;  %v7226_v4 = vld [vmem:[#allocation2 + $0x3a8] sm:$0x3] }
0x2fa8   : > { %v6825_v44 = vadd.f32 %v12261_v51, %v6824_v57  ;;  %v7225_v51 = vld [vmem:[#allocation2 + $0x3a0] sm:$0xff] }
0x2fa9   : > { %v6834_v59 = vadd.f32 %v6830_v56, %v6651_v29  ;;  %v12270_v29 = vld [vmem:[#allocation2 + $0x378] ss:$0 sm:$0xff]  ;;  %v14474_v57 = vpack.c.bf16 %v7226_v4, %v7225_v51 }
0x2faa   : > { %v6833_v23 = vadd.f32 %v6825_v44, %v6650_v36  ;;  %v7336_v56 = vld [vmem:[#allocation2 + $0x3b8] sm:$0xff]  ;;  %v7337_v44 = vld [vmem:[#allocation2 + $0x3c0] sm:$0x3] }
0x2fab   : > { %v6919_v60 = vmul.f32 %v6834_v59, %v6834_v59 }
0x2fac   : > { %v6918_v35 = vmul.f32 %v6833_v23, %v6833_v23  ;;  %13623 = vmatprep.mubr.msk.f32.mxu1 %vm782_vm11, %v6833_v23 }
0x2fad   : > { %13624 = vmatmul.mubr.msk.f32.vlgmr.msra.gmra.mrb[92].mxu1 %vm782_vm11, %v6834_v59 }
0x2fae   : > { %13630 = vmatprep.mubr.msk.f32.mxu0 %vm782_vm11, %v6918_v35  ;;  %13637 = vmatprep.mubr.msk.f32.mxu1 %vm414_vm6, %v15685_v15 }
0x2faf   : > { %13631 = vmatmul.mubr.msk.f32.vlgmr.msra.gmra.mrb[98].mxu0 %vm782_vm11, %v6919_v60 }
0x2fb0   : > { %14473 = vmatpush3.bf16.msk.msra.mxu0 %vm15242_vm8, %v14468_v18 }
0x2fb1   : > { %14476 = vmatprep.subr.msk.bf16.mxu0 %vm15242_vm8, %v14474_v57 }
0x3080   : > { %v13625_v45 = vpop.f32.mrb[92].mxu1 }
0x3081   : > { %v6917_v58 = vmul.f32 0.1, %v13625_v45  ;;  %v6907_v61 = vpop.f32.mrb[93].mxu1 }
0x3082   : > { %v6916_v7 = vmul.f32 0.1, %v6907_v61  ;;  %v13632_v8 = vpop.f32.mrb[98].mxu0 }
0x3083   : > { %v7004_v6 = vmul.f32 %v6917_v58, %v6917_v58  ;;  %v7002_v12 = vmul.f32 0.1, %v13632_v8  ;;  %v6992_v10 = vpop.f32.mrb[99].mxu0  ;;  %7014 = vperm.xlu1 %14816, %v6917_v58   ;;  %v12286_v8 = vld [vmem:[#allocation2 + $0x3c8] ss:$0 sm:$0xff] }
0x3084   : > { %v7003_v20 = vmul.f32 %v6916_v7, %v6916_v7  ;;  %v7001_v55 = vmul.f32 0.1, %v6992_v10  ;;  %7009 = vperm.xlu0 %14817, %v6916_v7   ;;  %v12280_v7 = vld [vmem:[#allocation2 + $0x3b0] ss:$0 sm:$0xff] }
0x3085   : > { %v7006_v9 = vsub.f32 %v7002_v12, %v7004_v6 }
0x3086   : > { %v7005_v16 = vsub.f32 %v7001_v55, %v7003_v20 }
0x3087   : > { %v7020_v62 = vadd.f32 1e-05, %v7006_v9 }
0x3088   : > { %v7019_v13 = vadd.f32 1e-05, %v7005_v16 }
0x3089   : > { %14890 = vrsqrt.f32 %v7020_v62 }
0x308a   : > { %14892 = vrsqrt.f32 %v7019_v13 }
0x3093   : > { %v14891_v15 = vpop.eup %14890 }
0x3094   : > { %v14893_v14 = vpop.eup %14892  ;;  %7030 = vperm.xlu1 %14816, %v14891_v15  }
0x3095   : > { %7025 = vperm.xlu0 %14817, %v14893_v14  }
0x3102   : > { %v7015_v22 = vpop.permute.xlu1 %7014 }
0x3103   : > { %v7010_v1 = vpop.permute.xlu0 %7009  ;;  %v7018_v24 = vsub.f32 %v6834_v59, %v7015_v22  ;;  %v14480_v59 = vpack.c.bf16 %v7337_v44, %v7336_v56 }
0x3104   : > { %v7017_v36 = vsub.f32 %v6833_v23, %v7010_v1 }
0x3113   : > { %v7031_v30 = vpop.permute.xlu1 %7030 }
0x3114   : > { %v7034_v31 = vmul.f32 %v7031_v30, %v7018_v24  ;;  %v7026_v34 = vpop.permute.xlu0 %7025 }
0x3115   : > { %v7033_v47 = vmul.f32 %v7026_v34, %v7017_v36 }
0x3116   : > { %v7041_v26 = vmul.f32 %v12270_v29, %v7034_v31 }
0x3117   : > { %v7040_v40 = vmul.f32 %v12270_v29, %v7033_v47 }
0x3118   : > { %v15960_v49 = vadd.f32 %v12271_v37, %v7041_v26 }
0x3119   : > { %v15962_v53 = vadd.f32 %v12271_v37, %v7040_v40 }
0x311b   : > { %13647 = vmatprep.mubr.msk.f32.mxu0 %vm782_vm11, %v15962_v53  ;;  %v14464_v54 = vpack.c.bf16 %v15960_v49, %v15962_v53 }
0x311c   : > { %13648 = vmatmul.mubr.msk.f32.vlgmr.msra.gmra.mrb[100].mxu0 %vm782_vm11, %v15960_v49 }
0x311d   : > { %14465 = vmatprep.subr.bf16.mxu1 %v14464_v54  ;;  %14479 = vmatpush3.bf16.msk.msra.mxu0 %vm15242_vm8, %v14474_v57 }
0x311e   : > { %14467 = vmatpush3.bf16.msra.mxu1 %v14464_v54 }
0x311f   : > { %14482 = vmatprep.subr.msk.bf16.mxu1 %vm15242_vm8, %v14480_v59 }
0x3121   : > { %13638 = vmatmul.mubr.msk.f32.vlgmr.msra.gmra.mrb[94].mxu1 %vm414_vm6, %v15693_v2  ;;  %v12276_v2 = vld [vmem:[#allocation2 + $0x398] ss:$0 sm:$0xff] }
0x3122   : > { %13640 = vmatprep.mubr.msk.f32.mxu1 %vm414_vm6, %v15695_v3  ;;  %14485 = vmatpush3.bf16.msk.msra.mxu1 %vm15242_vm8, %v14480_v59 }
0x3123   : > { %14499 = vmatprep.subr.bf16.mxu1 %v15748_v17 }
0x3125   : > { %13641 = vmatmul.mubr.msk.f32.gmra.mrb[96].mxu1 %vm414_vm6, %v15703_v5 }
0x31ef   : > { %v13649_v3 = vpop.f32.mrb[100].mxu0 }
0x31f0   : > { %v7222_v5 = vadd.f32 %v13649_v3, %v12276_v2  ;;  %v7216_v23 = vpop.f32.mrb[101].mxu0 }
0x31f1   : > { %v7217_v61 = vadd.f32 %v12276_v2, %v7216_v23 }
0x31f4   : > { %v13639_v35 = vpop.f32.mrb[94].mxu1 }
0x31f5   : > { %v7115_v60 = vpop.f32.mrb[95].mxu1 }
0x31f6   : > { %13654 = vmatprep.mubr.msk.f32.mxu0 %vm782_vm11, %v7115_v60  ;;  %13664 = vmatprep.mubr.msk.f32.mxu1 %vm782_vm11, %v7115_v60 }
0x31f7   : > { %13655 = vmatmul.mubr.msk.f32.vlgmr.msra.gmra.mrb[102].mxu0 %vm782_vm11, %v13639_v35  ;;  %13665 = vmatmul.mubr.msk.f32.vlgmr.msra.gmra.mrb[98].mxu1 %vm782_vm11, %v13639_v35 }
0x31f8   : > { %v13642_v45 = vpop.f32.mrb[96].mxu1  ;;  %14501 = vmatpush3.bf16.msra.mxu1 %v15748_v17 }
0x31f9   : > { %v7125_v58 = vpop.f32.mrb[97].mxu1  ;;  %14503 = vmatprep.subr.bf16.mxu1 %v15756_v25 }
0x31fa   : > { %13657 = vmatprep.mubr.msk.f32.mxu0 %vm782_vm11, %v7125_v58  ;;  %13667 = vmatprep.mubr.msk.f32.mxu1 %vm782_vm11, %v7125_v58 }
0x31fb   : > { %13658 = vmatmul.mubr.msk.f32.gmra.mrb[104].mxu0 %vm782_vm11, %v13642_v45  ;;  %13668 = vmatmul.mubr.msk.f32.gmra.mrb[100].mxu1 %vm782_vm11, %v13642_v45 }
0x31fc   : > { %13678 = vmatprep.mubr.msk.f32.mxu0 %vm782_vm11, %v7217_v61  ;;  %14505 = vmatpush3.bf16.msra.mxu1 %v15756_v25 }
0x32ca   : > { %v13656_v6 = vpop.f32.mrb[102].mxu0  ;;  %v13666_v12 = vpop.f32.mrb[98].mxu1 }
0x32cb   : > { %v7319_v10 = vadd.f32 %v13656_v6, %v12280_v7  ;;  %v7418_v20 = vadd.f32 %v13666_v12, %v12286_v8  ;;  %v7313_v55 = vpop.f32.mrb[103].mxu0  ;;  %v7412_v9 = vpop.f32.mrb[99].mxu1 }
0x32cc   : > { %v7314_v16 = vadd.f32 %v12280_v7, %v7313_v55  ;;  %v7413_v62 = vadd.f32 %v12286_v8, %v7412_v9  ;;  %v12302_v9 = vld [vmem:[#allocation2 + $0x3e0] ss:$0 sm:$0xff] }
0x32cd   : > { %v7333_v13 = vmul.f32 %v7319_v10, %v15746_v42  ;;  %v7432_v15 = vmul.f32 %v7418_v20, %v15746_v42 }
0x32ce   : > { %v7332_v14 = vmul.f32 %v7314_v16, %v15751_v21  ;;  %v7431_v41 = vmul.f32 %v7413_v62, %v15751_v21  ;;  %v13659_v43 = vpop.f32.mrb[104].mxu0  ;;  %v13669_v18 = vpop.f32.mrb[100].mxu1 }
0x32cf   : > { %v7329_v22 = vadd.f32 %v13659_v43, %v12280_v7  ;;  %v7428_v1 = vadd.f32 %v13669_v18, %v12286_v8  ;;  %v7323_v24 = vpop.f32.mrb[105].mxu0  ;;  %v7422_v36 = vpop.f32.mrb[101].mxu1  ;;  %v8109_v43 = vld [vmem:[#allocation2 + $0x418] sm:$0x3] }
0x32d0   : > { %v14486_v29 = vpack.c.bf16 %v7333_v13, %v7332_v14  ;;  %v7324_v30 = vadd.f32 %v12280_v7, %v7323_v24  ;;  %v7423_v31 = vadd.f32 %v12286_v8, %v7422_v36  ;;  %v14506_v34 = vpack.c.bf16 %v7432_v15, %v7431_v41  ;;  %v8108_v41 = vld [vmem:[#allocation2 + $0x410] sm:$0xff] }
0x32d1   : > { %v7335_v37 = vmul.f32 %v7329_v22, %v15762_v28  ;;  %v7434_v47 = vmul.f32 %v7428_v1, %v15762_v28  ;;  %v14539_v1 = vpack.c.bf16 %v8109_v43, %v8108_v41  ;;  %v12313_v41 = vld [vmem:[#allocation2 + $0x3f0] ss:$0 sm:$0xff] }
0x32d2   : > { %v7334_v42 = vmul.f32 %v7324_v30, %v15765_v38  ;;  %v7433_v26 = vmul.f32 %v7423_v31, %v15765_v38  ;;  %14488 = vmatprep.subr.msk.bf16.mxu0 %vm15327_vm14, %v14486_v29  ;;  %14507 = vmatprep.subr.bf16.mxu1 %v14506_v34 }
0x32d3   : > { %14491 = vmatpush3.bf16.xpose.msk.msra.mxu0 %vm15327_vm14, %v14486_v29 }
0x32d4   : > { %v14492_v21 = vpack.c.bf16 %v7335_v37, %v7334_v42  ;;  %v14510_v40 = vpack.c.bf16 %v7434_v47, %v7433_v26 }
0x32d6   : > { %14494 = vmatprep.subr.msk.bf16.mxu0 %vm15327_vm14, %v14492_v21 }
0x32db   : > { %14497 = vmatpush3.bf16.xpose.msk.msra.mxu0 %vm15327_vm14, %v14492_v21 }
0x32e2   : > { %13679 = vmatmul.mubr.msk.f32.vlgmr.msra.gmra.mrb[106].mxu0 %vm782_vm11, %v7222_v5 }
0x33b5   : > { %v13680_v28 = vpop.f32.mrb[106].mxu0 }
0x33b6   : > { %v7529_v54 = vmul.f32 0.4472136, %v13680_v28  ;;  %v7519_v38 = vpop.f32.mrb[107].mxu0 }
0x33b7   : > { %v7528_v51 = vmul.f32 0.4472136, %v7519_v38 }
0x33b8   : > { %v7531_v4 = vadd.f32 %v7529_v54, %v15789_v39  ;;  %v7710_v39 = vld [vmem:[#allocation2 + $0x3d0] sm:$0xff] }
0x33b9   : > { %v7530_v56 = vadd.f32 %v7528_v51, %v15791_v63  ;;  %v7711_v63 = vld [vmem:[#allocation2 + $0x3d8] sm:$0x3] }
0x33ba   : > { %v7535_v57 = vsel %vm5303_vm1, %v7531_v4, -inf  ;;  %v14514_v58 = vpack.c.bf16 %v7711_v63, %v7710_v39  ;;  %v16077_v39 = vld [vmem:[#allocation6 + $0x28] sm:$0xff] }
0x33bb   : > { %7536 = vmax.xlane.f32.xlu1 %v7535_v57  ;;  %v7532_v44 = vsel %vm5303_vm1, %v7530_v56, -inf }
0x33bc   : > { %7533 = vmax.xlane.f32.xlu0 %v7532_v44  ;;  %14516 = vmatprep.subr.msk.bf16.mxu0 %vm15242_vm8, %v14514_v58 }
0x33bd   : > { %14519 = vmatpush3.bf16.msk.msra.mxu0 %vm15242_vm8, %v14514_v58 }
0x33be   : > { %14528 = vmatprep.subr.msk.bf16.mxu0 %vm15242_vm8, %v15362_v11 }
0x3448   : > { %v7537_v59 = vpop.xlane.xlu1 %7536 }
0x3449   : > { %v7539_v2 = vsub.f32 %v7531_v4, %v7537_v59  ;;  %v7534_v3 = vpop.xlane.xlu0 %7533  ;;  %v16071_v59 = vld [vmem:[#allocation6 + $0x18] sm:$0xff] }
0x344a   : > { %v7538_v23 = vsub.f32 %v7530_v56, %v7534_v3  ;;  %v16074_v3 = vld [vmem:[#allocation6 + $0x20] sm:$0xff] }
0x344b   : > { %v7542_v35 = vmul.f32 1.442695, %v7539_v2 }
0x344c   : > { %v7540_v5 = vmul.f32 1.442695, %v7538_v23 }
0x344e   : > { %14894 = vpow2.f32 %v7540_v5 }
0x344f   : > { %14896 = vpow2.f32 %v7542_v35 }
0x3458   : > { %v14895_v60 = vpop.eup %14894 }
0x3459   : > { %v14897_v45 = vpop.eup %14896  ;;  %13689 = vmatprep.mubr.msk.f32.mxu1 %vm5303_vm1, %v14895_v60 }
0x345a   : > { %13690 = vmatmul.mubr.msk.f32.vlgmr.msra.gmra.mrb[102].mxu1 %vm5303_vm1, %v14897_v45 }
0x345b   : > { %14509 = vmatpush3.bf16.msra.mxu1 %v14506_v34 }
0x345c   : > { %14511 = vmatprep.subr.bf16.mxu1 %v14510_v40 }
0x345f   : > { %14513 = vmatpush3.bf16.msra.mxu1 %v14510_v40  ;;  %v12318_v40 = vld [vmem:[#allocation2 + $0x420] ss:$0 sm:$0xff] }
0x3460   : > { %14522 = vmatprep.subr.msk.bf16.mxu1 %vm15242_vm8, %v15362_v11 }
0x352d   : > { %v13691_v61 = vpop.f32.mrb[102].mxu1 }
0x352e   : > { %14898 = vrcp.f32 %v13691_v61  ;;  %v7616_v7 = vpop.f32.mrb[103].mxu1 }
0x352f   : > { %14900 = vrcp.f32 %v7616_v7  ;;  %v8017_v7 = vld [vmem:[#allocation2 + $0x3f8] sm:$0xff] }
0x3538   : > { %v14899_v8 = vpop.eup %14898 }
0x3539   : > { %v14901_v6 = vpop.eup %14900  ;;  %v7628_v10 = vmul.f32 %v14899_v8, %v14897_v45  ;;  %v8018_v8 = vld [vmem:[#allocation2 + $0x400] sm:$0x3] }
0x353a   : > { %v7627_v12 = vmul.f32 %v14901_v6, %v14895_v60  ;;  %v14532_v6 = vpack.c.bf16 %v8018_v8, %v8017_v7 }
0x353c   : > { %13700 = vmatprep.mubr.msk.f32.mxu1 %vm5303_vm1, %v7627_v12 }
0x353d   : > { %13701 = vmatmul.mubr.msk.f32.vlgmr.msra.gmra.mrb[104].mxu1 %vm5303_vm1, %v7628_v10 }
0x353e   : > { %14525 = vmatpush3.bf16.msk.msra.mxu1 %vm15242_vm8, %v15362_v11 }
0x353f   : > { %14534 = vmatprep.subr.msk.bf16.mxu1 %vm15242_vm8, %v14532_v6 }
0x3610   : > { %v13702_v20 = vpop.f32.mrb[104].mxu1 }
0x3611   : > { %v7701_v55 = vpop.f32.mrb[105].mxu1 }
0x3612   : > { %13707 = vmatprep.mubr.msk.f32.mxu0 %vm782_vm11, %v7701_v55 }
0x3613   : > { %13708 = vmatmul.mubr.msk.f32.vlgmr.msra.gmra.mrb[108].mxu0 %vm782_vm11, %v13702_v20 }
0x3614   : > { %14531 = vmatpush3.bf16.msk.msra.mxu0 %vm15242_vm8, %v15362_v11 }
0x3615   : > { %14538 = vmatprep.subr.bf16.mxu0 %v15077_v32 }
0x36e6   : > { %v13709_v16 = vpop.f32.mrb[108].mxu0 }
0x36e7   : > { %v7798_v62 = vadd.f32 %v13709_v16, %v12302_v9  ;;  %v7792_v13 = vpop.f32.mrb[109].mxu0 }
0x36e8   : > { %v7793_v15 = vadd.f32 %v12302_v9, %v7792_v13  ;;  %v12312_v9 = vld [vmem:[#allocation2 + $0x3e8] ss:$0 sm:$0xff] }
0x36e9   : > { %v16042_v14 = vadd.f32 %v7798_v62, %v15960_v49 }
0x36ea   : > { %v16045_v18 = vadd.f32 %v7793_v15, %v15962_v53 }
0x36eb   : > { %v7887_v24 = vmul.f32 %v16042_v14, %v16042_v14 }
0x36ec   : > { %v7886_v22 = vmul.f32 %v16045_v18, %v16045_v18  ;;  %13714 = vmatprep.mubr.msk.f32.mxu1 %vm782_vm11, %v16045_v18 }
0x36ed   : > { %13715 = vmatmul.mubr.msk.f32.vlgmr.msra.gmra.mrb[106].mxu1 %vm782_vm11, %v16042_v14 }
0x36ee   : > { %13721 = vmatprep.mubr.msk.f32.mxu0 %vm782_vm11, %v7886_v22  ;;  %14537 = vmatpush3.bf16.msk.msra.mxu1 %vm15242_vm8, %v14532_v6  ;;  %v8201_v22 = vld [vmem:[#allocation2 + $0x428] sm:$0xff] }
0x36ef   : > { %13722 = vmatmul.mubr.msk.f32.vlgmr.msra.gmra.mrb[110].mxu0 %vm782_vm11, %v7887_v24  ;;  %14542 = vmatprep.subr.bf16.mxu1 %v15077_v32 }
0x36f0   : > { %14541 = vmatpush3.bf16.msk.msra.mxu0 %vm15242_vm8, %v14539_v1  ;;  %13735 = vmatprep.mubr.msk.f32.mxu0 %vm15078_vm9, %v15079_v33  ;;  %v8202_v1 = vld [vmem:[#allocation2 + $0x430] sm:$0x3] }
0x36f3   : > { %13736 = vmatmul.mubr.msk.f32.vlgmr.msra.gmra.mrb[112].mxu0 %vm782_vm11, %v15769_v46 }
0x36f4   : > { %13738 = vmatprep.mubr.msk.f32.mxu0 %vm15078_vm9, %v15079_v33 }
0x36f7   : > { %13739 = vmatmul.mubr.msk.f32.gmra.mrb[114].mxu0 %vm782_vm11, %v15771_v48 }
0x36f8   : > { %13741 = vmatprep.mubr.msk.f32.mxu0 %vm15078_vm9, %v15079_v33 }
0x36fb   : > { %13742 = vmatmul.mubr.msk.f32.gmra.mrb[116].mxu0 %vm782_vm11, %v15773_v52 }
0x37c0   : > { %v13716_v49 = vpop.f32.mrb[106].mxu1 }
0x37c1   : > { %v7885_v53 = vmul.f32 0.1, %v13716_v49  ;;  %v7875_v36 = vpop.f32.mrb[107].mxu1 }
0x37c2   : > { %v7884_v29 = vmul.f32 0.1, %v7875_v36  ;;  %v13723_v30 = vpop.f32.mrb[110].mxu0 }
0x37c3   : > { %v7972_v31 = vmul.f32 %v7885_v53, %v7885_v53  ;;  %v7970_v34 = vmul.f32 0.1, %v13723_v30  ;;  %v7960_v37 = vpop.f32.mrb[111].mxu0  ;;  %7982 = vperm.xlu1 %14816, %v7885_v53   ;;  %v14543_v53 = vpack.c.bf16 %v8202_v1, %v8201_v22  ;;  %v12337_v22 = vld [vmem:[#allocation2 + $0x450] ss:$0 sm:$0xff] }
0x37c4   : > { %v7971_v47 = vmul.f32 %v7884_v29, %v7884_v29  ;;  %v7969_v42 = vmul.f32 0.1, %v7960_v37  ;;  %7977 = vperm.xlu0 %14817, %v7884_v29  }
0x37c5   : > { %v7974_v26 = vsub.f32 %v7970_v34, %v7972_v31  ;;  %v12323_v34 = vld [vmem:[#allocation2 + $0x438] ss:$0 sm:$0xff] }
0x37c6   : > { %v7973_v21 = vsub.f32 %v7969_v42, %v7971_v47  ;;  %v8184_v28 = vpop.f32.mrb[112].mxu0 }
0x37c7   : > { %v7988_v54 = vadd.f32 1e-05, %v7974_v26  ;;  %v13737_v38 = vpop.f32.mrb[113].mxu0  ;;  %v8185_v4 = vadd.f32 %v12318_v40, %v8184_v28 }
0x37c8   : > { %v7987_v51 = vadd.f32 1e-05, %v7973_v21 }
0x37c9   : > { %14902 = vrsqrt.f32 %v7988_v54  ;;  %v8198_v2 = vmul.f32 %v16071_v59, %v8185_v4 }
0x37ca   : > { %14904 = vrsqrt.f32 %v7987_v51  ;;  %v8189_v56 = vpop.f32.mrb[114].mxu0 }
0x37cb   : > { %v8190_v57 = vadd.f32 %v12318_v40, %v8189_v56  ;;  %v13740_v44 = vpop.f32.mrb[115].mxu0 }
0x37cd   : > { %v8199_v23 = vmul.f32 %v16074_v3, %v8190_v57 }
0x37ce   : > { %v8194_v35 = vpop.f32.mrb[116].mxu0 }
0x37cf   : > { %v14546_v5 = vpack.c.bf16 %v8199_v23, %v8198_v2  ;;  %v8195_v60 = vadd.f32 %v12318_v40, %v8194_v35  ;;  %v13743_v45 = vpop.f32.mrb[117].mxu0 }
0x37d1   : > { %v8200_v63 = vmul.f32 %v16077_v39, %v8195_v60  ;;  %14548 = vmatprep.subr.msk.bf16.mxu0 %vm15327_vm14, %v14546_v5 }
0x37d2   : > { %14551 = vmatpush3.bf16.xpose.msk.msra.mxu0 %vm15327_vm14, %v14546_v5 }
0x37d3   : > { %v14903_v58 = vpop.eup %14902  ;;  %13761 = vmatprep.subr.msk.mxu0 %vm782_vm11, %v8200_v63 }
0x37d4   : > { %v14905_v61 = vpop.eup %14904  ;;  %7998 = vperm.xlu1 %14816, %v14903_v58  }
0x37d5   : > { %7993 = vperm.xlu0 %14817, %v14905_v61  }
0x37da   : > { %13762 = vmatpush3.xpose.msk.msra.mxu0 %vm782_vm11, %v8200_v63 }
0x3842   : > { %v7983_v12 = vpop.permute.xlu1 %7982 }
0x3843   : > { %v7978_v10 = vpop.permute.xlu0 %7977  ;;  %v7986_v20 = vsub.f32 %v16042_v14, %v7983_v12  ;;  %v12314_v14 = vld [vmem:[#allocation2 + $0x408] ss:$0 sm:$0xff]  ;;  %v8564_v12 = vld [vmem:[#allocation2 + $0x440] sm:$0xff] }
0x3844   : > { %v7985_v55 = vsub.f32 %v16045_v18, %v7978_v10  ;;  %v8565_v10 = vld [vmem:[#allocation2 + $0x448] sm:$0x3] }
0x3853   : > { %v7999_v16 = vpop.permute.xlu1 %7998 }
0x3854   : > { %v8002_v62 = vmul.f32 %v7999_v16, %v7986_v20  ;;  %v7994_v13 = vpop.permute.xlu0 %7993  ;;  %v14560_v20 = vpack.c.bf16 %v8565_v10, %v8564_v12 }
0x3855   : > { %v8001_v15 = vmul.f32 %v7994_v13, %v7985_v55 }
0x3856   : > { %v8009_v43 = vmul.f32 %v12312_v9, %v8002_v62 }
0x3857   : > { %v8008_v24 = vmul.f32 %v12312_v9, %v8001_v15 }
0x3858   : > { %v16095_v36 = vadd.f32 %v12313_v41, %v8009_v43 }
0x3859   : > { %v16093_v49 = vadd.f32 %v12313_v41, %v8008_v24 }
0x385b   : > { %13728 = vmatprep.mubr.msk.f32.mxu1 %vm782_vm11, %v16093_v49 }
0x385c   : > { %13729 = vmatmul.mubr.msk.f32.vlgmr.msra.gmra.mrb[108].mxu1 %vm782_vm11, %v16095_v36 }
0x385d   : > { %14545 = vmatpush3.bf16.msk.msra.mxu1 %vm15242_vm8, %v14543_v53  ;;  %13748 = vmatprep.mubr.msk.f32.mxu1 %vm15078_vm9, %v15079_v33 }
0x385e   : > { %14553 = vmatprep.subr.bf16.mxu1 %v15344_v50 }
0x3860   : > { %13749 = vmatmul.mubr.msk.f32.vlgmr.msra.gmra.mrb[110].mxu1 %vm782_vm11, %v15769_v46 }
0x3861   : > { %13751 = vmatprep.mubr.msk.f32.mxu1 %vm15078_vm9, %v15079_v33  ;;  %14555 = vmatpush3.bf16.msra.mxu1 %v15344_v50 }
0x3862   : > { %13770 = vmatprep.subr.mxu1 %v15885_v0 }
0x3864   : > { %13752 = vmatmul.mubr.msk.f32.gmra.mrb[112].mxu1 %vm782_vm11, %v15771_v48 }
0x3865   : > { %13754 = vmatprep.mubr.msk.f32.mxu1 %vm15078_vm9, %v15079_v33  ;;  %13771 = vmatpush3.msra.mxu1 %v15885_v0 }
0x3866   : > { %14562 = vmatprep.subr.msk.bf16.mxu1 %vm15242_vm8, %v14560_v20 }
0x3868   : > { %13755 = vmatmul.mubr.msk.f32.gmra.mrb[114].mxu1 %vm782_vm11, %v15773_v52 }
0x392f   : > { %v13730_v18 = vpop.f32.mrb[108].mxu1 }
0x3930   : > { %v8099_v29 = vpop.f32.mrb[109].mxu1  ;;  %v8105_v31 = vadd.f32 %v13730_v18, %v12314_v14 }
0x3931   : > { %v8100_v30 = vadd.f32 %v12314_v14, %v8099_v29 }
0x3933   : > { %v8277_v37 = vpop.f32.mrb[110].mxu1  ;;  %13763 = vmatprep.mubr.msk.f32.mxu0 %vm782_vm11, %v8100_v30 }
0x3934   : > { %v13750_v47 = vpop.f32.mrb[111].mxu1  ;;  %13764 = vmatmul.mubr.msk.f32.vlgmr.msra.gmra.mrb[118].mxu0 %vm782_vm11, %v8105_v31  ;;  %v8278_v42 = vadd.f32 %v12323_v34, %v8277_v37 }
0x3936   : > { %v8291_v0 = vmul.f32 %v16071_v59, %v8278_v42 }
0x3937   : > { %v8282_v26 = vpop.f32.mrb[112].mxu1 }
0x3938   : > { %v8283_v21 = vadd.f32 %v12323_v34, %v8282_v26  ;;  %v13753_v40 = vpop.f32.mrb[113].mxu1 }
0x393a   : > { %v8292_v28 = vmul.f32 %v16074_v3, %v8283_v21 }
0x393b   : > { %v8287_v54 = vpop.f32.mrb[114].mxu1 }
0x393c   : > { %v8288_v38 = vadd.f32 %v12323_v34, %v8287_v54  ;;  %v13756_v51 = vpop.f32.mrb[115].mxu1  ;;  %v14556_v4 = vpack.c.bf16 %v8292_v28, %v8291_v0 }
0x393e   : > { %v8293_v56 = vmul.f32 %v16077_v39, %v8288_v38  ;;  %14557 = vmatprep.subr.bf16.mxu0 %v14556_v4 }
0x393f   : > { %14559 = vmatpush3.bf16.msra.mxu0 %v14556_v4 }
0x3940   : > { %13779 = vmatprep.subr.mxu0 %v8293_v56 }
0x3943   : > { %13780 = vmatpush3.msra.mxu0 %v8293_v56 }
0x3944   : > { %14568 = vmatprep.subr.msk.bf16.mxu0 %vm15242_vm8, %v15362_v11 }
0x3a07   : > { %v13765_v57 = vpop.f32.mrb[118].mxu0 }
0x3a08   : > { %v8385_v44 = vmul.f32 0.4472136, %v13765_v57  ;;  %v8375_v2 = vpop.f32.mrb[119].mxu0  ;;  %v8871_v57 = vld [vmem:[#allocation2 + $0x468] sm:$0xff] }
0x3a09   : > { %v8384_v23 = vmul.f32 0.4472136, %v8375_v2 }
0x3a0a   : > { %v8389_v35 = vsel %vm1154_vm15, %v8385_v44, -inf }
0x3a0b   : > { %8390 = vmax.xlane.f32.xlu1 %v8389_v35  ;;  %v8386_v5 = vsel %vm1154_vm15, %v8384_v23, -inf }
0x3a0c   : > { %8387 = vmax.xlane.f32.xlu0 %v8386_v5 }
0x3a98   : > { %v8391_v60 = vpop.xlane.xlu1 %8390 }
0x3a99   : > { %v8393_v45 = vsub.f32 %v8385_v44, %v8391_v60  ;;  %v8388_v63 = vpop.xlane.xlu0 %8387  ;;  %v8872_v44 = vld [vmem:[#allocation2 + $0x470] sm:$0x3] }
0x3a9a   : > { %v8392_v58 = vsub.f32 %v8384_v23, %v8388_v63  ;;  %v14578_v2 = vpack.c.bf16 %v8872_v44, %v8871_v57 }
0x3a9b   : > { %v8396_v61 = vmul.f32 1.442695, %v8393_v45  ;;  %v12347_v45 = vld [vmem:[#allocation2 + $0x458] ss:$0 sm:$0xff] }
0x3a9c   : > { %v8394_v7 = vmul.f32 1.442695, %v8392_v58 }
0x3a9e   : > { %14906 = vpow2.f32 %v8394_v7 }
0x3a9f   : > { %14908 = vpow2.f32 %v8396_v61 }
0x3aa8   : > { %v14907_v8 = vpop.eup %14906 }
0x3aa9   : > { %v14909_v6 = vpop.eup %14908  ;;  %13772 = vmatprep.mubr.msk.f32.mxu1 %vm1154_vm15, %v14907_v8 }
0x3aaa   : > { %13773 = vmatmul.mubr.msk.f32.vlgmr.msra.gmra.mrb[116].mxu1 %vm1154_vm15, %v14909_v6 }
0x3aab   : > { %14565 = vmatpush3.bf16.msk.msra.mxu1 %vm15242_vm8, %v14560_v20 }
0x3aac   : > { %14574 = vmatprep.subr.msk.bf16.mxu1 %vm15242_vm8, %v15362_v11 }
0x3b7d   : > { %v13774_v55 = vpop.f32.mrb[116].mxu1 }
0x3b7e   : > { %14910 = vrcp.f32 %v13774_v55  ;;  %v8470_v9 = vpop.f32.mrb[117].mxu1  ;;  %v8964_v55 = vld [vmem:[#allocation2 + $0x480] sm:$0xff] }
0x3b7f   : > { %14912 = vrcp.f32 %v8470_v9  ;;  %v8965_v9 = vld [vmem:[#allocation2 + $0x488] sm:$0xff] }
0x3b88   : > { %v14911_v16 = vpop.eup %14910 }
0x3b89   : > { %v14913_v62 = vpop.eup %14912  ;;  %v8482_v15 = vmul.f32 %v14911_v16, %v14909_v6  ;;  %v14584_v16 = vpack.c.bf16 %v8965_v9, %v8964_v55 }
0x3b8a   : > { %v8481_v13 = vmul.f32 %v14913_v62, %v14907_v8  ;;  %v12348_v8 = vld [vmem:[#allocation2 + $0x460] ss:$0 sm:$0xff]  ;;  %v12349_v62 = vld [vmem:[#allocation2 + $0x478] ss:$0 sm:$0xff] }
0x3b8c   : > { %13781 = vmatprep.mubr.msk.f32.mxu0 %vm1154_vm15, %v8481_v13 }
0x3b8d   : > { %13782 = vmatmul.mubr.msk.f32.vlgmr.msra.gmra.mrb[120].mxu0 %vm1154_vm15, %v8482_v15 }
0x3b8e   : > { %14571 = vmatpush3.bf16.msk.msra.mxu0 %vm15242_vm8, %v15362_v11 }
0x3b8f   : > { %14580 = vmatprep.subr.msk.bf16.mxu0 %vm15242_vm8, %v14578_v2 }
0x3c60   : > { %v13783_v41 = vpop.f32.mrb[120].mxu0 }
0x3c61   : > { %v8555_v43 = vpop.f32.mrb[121].mxu0 }
0x3c62   : > { %13788 = vmatprep.mubr.msk.f32.mxu1 %vm782_vm11, %v8555_v43 }
0x3c63   : > { %13789 = vmatmul.mubr.msk.f32.vlgmr.msra.gmra.mrb[118].mxu1 %vm782_vm11, %v13783_v41 }
0x3c64   : > { %14577 = vmatpush3.bf16.msk.msra.mxu1 %vm15242_vm8, %v15362_v11 }
0x3c65   : > { %14585 = vmatprep.subr.bf16.mxu1 %v14584_v16 }
0x3d36   : > { %v13790_v1 = vpop.f32.mrb[118].mxu1 }
0x3d37   : > { %v8652_v24 = vadd.f32 %v13790_v1, %v12337_v22  ;;  %v8646_v53 = vpop.f32.mrb[119].mxu1 }
0x3d38   : > { %v8647_v14 = vadd.f32 %v12337_v22, %v8646_v53 }
0x3d39   : > { %v8656_v18 = vadd.f32 %v8652_v24, %v16095_v36  ;;  %v12353_v24 = vld [vmem:[#allocation2 + $0x490] ss:$0 sm:$0xff] }
0x3d3a   : > { %v8655_v29 = vadd.f32 %v8647_v14, %v16093_v49 }
0x3d3b   : > { %v8741_v31 = vmul.f32 %v8656_v18, %v8656_v18 }
0x3d3c   : > { %v8740_v30 = vmul.f32 %v8655_v29, %v8655_v29  ;;  %13795 = vmatprep.mubr.msk.f32.mxu0 %vm782_vm11, %v8655_v29 }
0x3d3d   : > { %13796 = vmatmul.mubr.msk.f32.vlgmr.msra.gmra.mrb[122].mxu0 %vm782_vm11, %v8656_v18 }
0x3d3e   : > { %13802 = vmatprep.mubr.msk.f32.mxu1 %vm782_vm11, %v8740_v30  ;;  %14583 = vmatpush3.bf16.msk.msra.mxu0 %vm15242_vm8, %v14578_v2 }
0x3d3f   : > { %13803 = vmatmul.mubr.msk.f32.vlgmr.msra.gmra.mrb[120].mxu1 %vm782_vm11, %v8741_v31  ;;  %14590 = vmatprep.subr.msk.bf16.mxu0 %vm15242_vm8, %v15362_v11 }
0x3d40   : > { %14587 = vmatpush3.bf16.msra.mxu1 %v14584_v16 }
0x3d41   : > { %14596 = vmatprep.subr.msk.bf16.mxu1 %vm15242_vm8, %v15362_v11 }
0x3e10   : > { %v13797_v34 = vpop.f32.mrb[122].mxu0 }
0x3e11   : > { %v8739_v37 = vmul.f32 0.1, %v13797_v34  ;;  %v8729_v47 = vpop.f32.mrb[123].mxu0 }
0x3e12   : > { %v8738_v42 = vmul.f32 0.1, %v8729_v47  ;;  %v13804_v26 = vpop.f32.mrb[120].mxu1  ;;  %v14960_v47 = vld [vmem:[#allocation6 + $0x48] sm:$0xff] }
0x3e13   : > { %v8826_v21 = vmul.f32 %v8739_v37, %v8739_v37  ;;  %v8824_v40 = vmul.f32 0.1, %v13804_v26  ;;  %v8814_v36 = vpop.f32.mrb[121].mxu1  ;;  %8836 = vperm.xlu1 %14816, %v8739_v37  }
0x3e14   : > { %v8825_v49 = vmul.f32 %v8738_v42, %v8738_v42  ;;  %v8823_v0 = vmul.f32 0.1, %v8814_v36  ;;  %8831 = vperm.xlu0 %14817, %v8738_v42  }
0x3e15   : > { %v8828_v28 = vsub.f32 %v8824_v40, %v8826_v21 }
0x3e16   : > { %v8827_v54 = vsub.f32 %v8823_v0, %v8825_v49 }
0x3e17   : > { %v8842_v38 = vadd.f32 1e-05, %v8828_v28 }
0x3e18   : > { %v8841_v51 = vadd.f32 1e-05, %v8827_v54 }
0x3e19   : > { %14914 = vrsqrt.f32 %v8842_v38 }
0x3e1a   : > { %14916 = vrsqrt.f32 %v8841_v51 }
0x3e23   : > { %v14915_v4 = vpop.eup %14914 }
0x3e24   : > { %v14917_v56 = vpop.eup %14916  ;;  %8852 = vperm.xlu1 %14816, %v14915_v4  }
0x3e25   : > { %8847 = vperm.xlu0 %14817, %v14917_v56  }
0x3e92   : > { %v8837_v23 = vpop.permute.xlu1 %8836 }
0x3e93   : > { %v8832_v35 = vpop.permute.xlu0 %8831  ;;  %v8840_v5 = vsub.f32 %v8656_v18, %v8837_v23  ;;  %v9353_v23 = vld [vmem:[#allocation2 + $0x4a8] sm:$0xff] }
0x3e94   : > { %v8839_v60 = vsub.f32 %v8655_v29, %v8832_v35  ;;  %v9354_v35 = vld [vmem:[#allocation2 + $0x4b0] sm:$0x3] }
0x3ea3   : > { %v8853_v63 = vpop.permute.xlu1 %8852 }
0x3ea4   : > { %v8856_v58 = vmul.f32 %v8853_v63, %v8840_v5  ;;  %v8848_v61 = vpop.permute.xlu0 %8847  ;;  %v14604_v5 = vpack.c.bf16 %v9354_v35, %v9353_v23 }
0x3ea5   : > { %v8855_v7 = vmul.f32 %v8848_v61, %v8839_v60  ;;  %v12362_v61 = vld [vmem:[#allocation2 + $0x498] ss:$0 sm:$0xff] }
0x3ea6   : > { %v8863_v6 = vmul.f32 %v12347_v45, %v8856_v58 }
0x3ea7   : > { %v8862_v12 = vmul.f32 %v12347_v45, %v8855_v7 }
0x3ea8   : > { %v8870_v20 = vadd.f32 %v12348_v8, %v8863_v6 }
0x3ea9   : > { %v8869_v10 = vadd.f32 %v12348_v8, %v8862_v12  ;;  %v12363_v12 = vld [vmem:[#allocation2 + $0x4a0] ss:$0 sm:$0xff] }
0x3eab   : > { %13809 = vmatprep.mubr.msk.f32.mxu0 %vm782_vm11, %v8869_v10 }
0x3eac   : > { %13810 = vmatmul.mubr.msk.f32.vlgmr.msra.gmra.mrb[124].mxu0 %vm782_vm11, %v8870_v20 }
0x3ead   : > { %14593 = vmatpush3.bf16.msk.msra.mxu0 %vm15242_vm8, %v15362_v11 }
0x3f7f   : > { %v13811_v13 = vpop.f32.mrb[124].mxu0 }
0x3f80   : > { %v8959_v15 = vadd.f32 %v13811_v13, %v12349_v62  ;;  %v8953_v41 = vpop.f32.mrb[125].mxu0  ;;  %v14961_v13 = vld [vmem:[#allocation6 + $0x50] sm:$0xff] }
0x3f81   : > { %v8954_v43 = vadd.f32 %v12349_v62, %v8953_v41  ;;  %v14963_v41 = vld [vmem:[#allocation6 + $0x60] sm:$0xff] }
0x3f82   : > { %v8963_v1 = vmax.f32 %v8959_v15, 0.0  ;;  %v14962_v15 = vld [vmem:[#allocation6 + $0x58] sm:$0xff] }
0x3f83   : > { %v8962_v22 = vmax.f32 %v8954_v43, 0.0  ;;  %v9444_v43 = vld [vmem:[#allocation2 + $0x4c0] sm:$0xff] }
0x3f85   : > { %13816 = vmatprep.mubr.msk.f32.mxu1 %vm414_vm6, %v8962_v22  ;;  %v9445_v22 = vld [vmem:[#allocation2 + $0x4c8] sm:$0x3] }
0x3f86   : > { %13817 = vmatmul.mubr.msk.f32.vlgmr.msra.gmra.mrb[122].mxu1 %vm414_vm6, %v8963_v1  ;;  %v9555_v1 = vld [vmem:[#allocation2 + $0x4d8] sm:$0xff] }
0x3f87   : > { %14599 = vmatpush3.bf16.msk.msra.mxu1 %vm15242_vm8, %v15362_v11 }
0x3f88   : > { %14606 = vmatprep.subr.msk.bf16.mxu1 %vm15242_vm8, %v14604_v5 }
0x4059   : > { %v13818_v53 = vpop.f32.mrb[122].mxu1 }
0x405a   : > { %v9049_v14 = vadd.f32 %v13818_v53, %v12353_v24  ;;  %v9043_v18 = vpop.f32.mrb[123].mxu1  ;;  %v9556_v53 = vld [vmem:[#allocation2 + $0x4e0] sm:$0x3] }
0x405b   : > { %v9044_v29 = vadd.f32 %v12353_v24, %v9043_v18  ;;  %v14610_v24 = vpack.c.bf16 %v9445_v22, %v9444_v43  ;;  %v12368_v18 = vld [vmem:[#allocation2 + $0x4b8] ss:$0 sm:$0xff] }
0x405c   : > { %v9053_v30 = vadd.f32 %v9049_v14, %v8870_v20  ;;  %v14616_v14 = vpack.c.bf16 %v9556_v53, %v9555_v1 }
0x405d   : > { %v9052_v31 = vadd.f32 %v9044_v29, %v8869_v10 }
0x405e   : > { %v9138_v37 = vmul.f32 %v9053_v30, %v9053_v30 }
0x405f   : > { %v9137_v34 = vmul.f32 %v9052_v31, %v9052_v31  ;;  %13823 = vmatprep.mubr.msk.f32.mxu0 %vm782_vm11, %v9052_v31 }
0x4060   : > { %13824 = vmatmul.mubr.msk.f32.vlgmr.msra.gmra.mrb[126].mxu0 %vm782_vm11, %v9053_v30 }
0x4061   : > { %13830 = vmatprep.mubr.msk.f32.mxu1 %vm782_vm11, %v9137_v34  ;;  %13837 = vmatprep.mubr.msk.f32.mxu0 %vm414_vm6, %v14960_v47 }
0x4062   : > { %13831 = vmatmul.mubr.msk.f32.vlgmr.msra.gmra.mrb[124].mxu1 %vm782_vm11, %v9138_v37 }
0x4063   : > { %14609 = vmatpush3.bf16.msk.msra.mxu1 %vm15242_vm8, %v14604_v5 }
0x4064   : > { %14612 = vmatprep.subr.msk.bf16.mxu1 %vm15242_vm8, %v14610_v24 }
0x4133   : > { %v13825_v42 = vpop.f32.mrb[126].mxu0 }
0x4134   : > { %v9136_v26 = vmul.f32 0.1, %v13825_v42  ;;  %v9126_v21 = vpop.f32.mrb[127].mxu0 }
0x4135   : > { %v9135_v40 = vmul.f32 0.1, %v9126_v21  ;;  %v13832_v36 = vpop.f32.mrb[124].mxu1  ;;  %v12372_v21 = vld [vmem:[#allocation2 + $0x4d0] ss:$0 sm:$0xff] }
0x4136   : > { %v9223_v49 = vmul.f32 %v9136_v26, %v9136_v26  ;;  %v9221_v0 = vmul.f32 0.1, %v13832_v36  ;;  %v9211_v28 = vpop.f32.mrb[125].mxu1  ;;  %9233 = vperm.xlu1 %14816, %v9136_v26  }
0x4137   : > { %v9222_v54 = vmul.f32 %v9135_v40, %v9135_v40  ;;  %v9220_v38 = vmul.f32 0.1, %v9211_v28  ;;  %9228 = vperm.xlu0 %14817, %v9135_v40   ;;  %v12378_v40 = vld [vmem:[#allocation2 + $0x4e8] ss:$0 sm:$0xff] }
0x4138   : > { %v9225_v51 = vsub.f32 %v9221_v0, %v9223_v49 }
0x4139   : > { %v9224_v4 = vsub.f32 %v9220_v38, %v9222_v54 }
0x413a   : > { %v9239_v56 = vadd.f32 1e-05, %v9225_v51 }
0x413b   : > { %v9238_v57 = vadd.f32 1e-05, %v9224_v4  ;;  %v14964_v4 = vld [vmem:[#allocation6 + $0x70] sm:$0xff] }
0x413c   : > { %14918 = vrsqrt.f32 %v9239_v56 }
0x413d   : > { %14920 = vrsqrt.f32 %v9238_v57 }
0x4146   : > { %v14919_v44 = vpop.eup %14918 }
0x4147   : > { %v14921_v2 = vpop.eup %14920  ;;  %9249 = vperm.xlu1 %14816, %v14919_v44   ;;  %v14965_v44 = vld [vmem:[#allocation6 + $0x68] sm:$0xff] }
0x4148   : > { %9244 = vperm.xlu0 %14817, %v14921_v2  }
0x41b5   : > { %v9234_v60 = vpop.permute.xlu1 %9233 }
0x41b6   : > { %v9229_v45 = vpop.permute.xlu0 %9228  ;;  %v9237_v63 = vsub.f32 %v9053_v30, %v9234_v60 }
0x41b7   : > { %v9236_v58 = vsub.f32 %v9052_v31, %v9229_v45 }
0x41c6   : > { %v9250_v7 = vpop.permute.xlu1 %9249 }
0x41c7   : > { %v9253_v8 = vmul.f32 %v9250_v7, %v9237_v63  ;;  %v9245_v6 = vpop.permute.xlu0 %9244 }
0x41c8   : > { %v9252_v10 = vmul.f32 %v9245_v6, %v9236_v58  ;;  %v14966_v6 = vld [vmem:[#allocation6 + $0x80] sm:$0xff] }
0x41c9   : > { %v9260_v20 = vmul.f32 %v12362_v61, %v9253_v8 }
0x41ca   : > { %v9259_v55 = vmul.f32 %v12362_v61, %v9252_v10 }
0x41cb   : > { %v16183_v9 = vadd.f32 %v12363_v12, %v9260_v20  ;;  %v14967_v20 = vld [vmem:[#allocation6 + $0x78] sm:$0xff] }
0x41cc   : > { %v16185_v16 = vadd.f32 %v12363_v12, %v9259_v55 }
0x41ce   : > { %13847 = vmatprep.mubr.msk.f32.mxu1 %vm782_vm11, %v16185_v16  ;;  %v14600_v62 = vpack.c.bf16 %v16183_v9, %v16185_v16 }
0x41cf   : > { %13848 = vmatmul.mubr.msk.f32.vlgmr.msra.gmra.mrb[126].mxu1 %vm782_vm11, %v16183_v9 }
0x41d0   : > { %14601 = vmatprep.subr.bf16.mxu0 %v14600_v62  ;;  %14615 = vmatpush3.bf16.msk.msra.mxu1 %vm15242_vm8, %v14610_v24  ;;  %v14968_v24 = vld [vmem:[#allocation6 + $0xb0] sm:$0xff] }
0x41d1   : > { %14603 = vmatpush3.bf16.msra.mxu0 %v14600_v62 }
0x41d2   : > { %14618 = vmatprep.subr.msk.bf16.mxu0 %vm15242_vm8, %v14616_v14 }
0x41d4   : > { %13838 = vmatmul.mubr.msk.f32.vlgmr.msra.gmra.mrb[128].mxu0 %vm414_vm6, %v14961_v13 }
0x41d5   : > { %13840 = vmatprep.mubr.msk.f32.mxu0 %vm414_vm6, %v14962_v15  ;;  %14621 = vmatpush3.bf16.msk.msra.mxu0 %vm15242_vm8, %v14616_v14  ;;  %v14969_v14 = vld [vmem:[#allocation6 + $0xa8] sm:$0xff] }
0x41d6   : > { %14635 = vmatprep.subr.bf16.mxu0 %v15748_v17 }
0x41d8   : > { %13841 = vmatmul.mubr.msk.f32.gmra.mrb[130].mxu0 %vm414_vm6, %v14963_v41 }
0x42a2   : > { %v13849_v29 = vpop.f32.mrb[126].mxu1 }
0x42a3   : > { %v9441_v30 = vadd.f32 %v13849_v29, %v12368_v18  ;;  %v9435_v31 = vpop.f32.mrb[127].mxu1 }
0x42a4   : > { %v9436_v26 = vadd.f32 %v12368_v18, %v9435_v31 }
0x42a7   : > { %v13839_v34 = vpop.f32.mrb[128].mxu0 }
0x42a8   : > { %v9334_v37 = vpop.f32.mrb[129].mxu0 }
0x42a9   : > { %13854 = vmatprep.mubr.msk.f32.mxu1 %vm782_vm11, %v9334_v37  ;;  %13864 = vmatprep.mubr.msk.f32.mxu0 %vm782_vm11, %v9334_v37 }
0x42aa   : > { %13855 = vmatmul.mubr.msk.f32.vlgmr.msra.gmra.mrb[128].mxu1 %vm782_vm11, %v13839_v34  ;;  %13865 = vmatmul.mubr.msk.f32.vlgmr.msra.gmra.mrb[132].mxu0 %vm782_vm11, %v13839_v34 }
0x42ab   : > { %v13842_v47 = vpop.f32.mrb[130].mxu0  ;;  %14637 = vmatpush3.bf16.msra.mxu0 %v15748_v17 }
0x42ac   : > { %v9344_v42 = vpop.f32.mrb[131].mxu0  ;;  %14639 = vmatprep.subr.bf16.mxu0 %v15756_v25 }
0x42ad   : > { %13857 = vmatprep.mubr.msk.f32.mxu1 %vm782_vm11, %v9344_v42  ;;  %13867 = vmatprep.mubr.msk.f32.mxu0 %vm782_vm11, %v9344_v42 }
0x42ae   : > { %13858 = vmatmul.mubr.msk.f32.gmra.mrb[130].mxu1 %vm782_vm11, %v13842_v47  ;;  %13868 = vmatmul.mubr.msk.f32.gmra.mrb[134].mxu0 %vm782_vm11, %v13842_v47 }
0x42af   : > { %13878 = vmatprep.mubr.msk.f32.mxu1 %vm782_vm11, %v9436_v26  ;;  %14641 = vmatpush3.bf16.msra.mxu0 %v15756_v25 }
0x437d   : > { %v13856_v36 = vpop.f32.mrb[128].mxu1  ;;  %v13866_v17 = vpop.f32.mrb[132].mxu0 }
0x437e   : > { %v9538_v49 = vadd.f32 %v13856_v36, %v12372_v21  ;;  %v9637_v0 = vadd.f32 %v13866_v17, %v12378_v40  ;;  %v9532_v28 = vpop.f32.mrb[129].mxu1  ;;  %v9631_v54 = vpop.f32.mrb[133].mxu0  ;;  %v9929_v36 = vld [vmem:[#allocation2 + $0x4f0] sm:$0xff]  ;;  %v9930_v17 = vld [vmem:[#allocation2 + $0x4f8] sm:$0x3] }
0x437f   : > { %v9533_v38 = vadd.f32 %v12372_v21, %v9532_v28  ;;  %v9632_v51 = vadd.f32 %v12378_v40, %v9631_v54 }
0x4380   : > { %v9552_v56 = vmul.f32 %v14964_v4, %v9538_v49  ;;  %v9651_v57 = vmul.f32 %v14964_v4, %v9637_v0  ;;  %v14650_v49 = vpack.c.bf16 %v9930_v17, %v9929_v36  ;;  %v10236_v17 = vld [vmem:[#allocation2 + $0x518] sm:$0xff] }
0x4381   : > { %v9551_v2 = vmul.f32 %v14965_v44, %v9533_v38  ;;  %v9650_v23 = vmul.f32 %v14965_v44, %v9632_v51  ;;  %v13859_v35 = vpop.f32.mrb[130].mxu1  ;;  %v13869_v5 = vpop.f32.mrb[134].mxu0  ;;  %v12394_v44 = vld [vmem:[#allocation2 + $0x500] ss:$0 sm:$0xff] }
0x4382   : > { %v9548_v60 = vadd.f32 %v13859_v35, %v12372_v21  ;;  %v9647_v25 = vadd.f32 %v13869_v5, %v12378_v40  ;;  %v9542_v45 = vpop.f32.mrb[131].mxu1  ;;  %v9641_v63 = vpop.f32.mrb[135].mxu0 }
0x4383   : > { %v14622_v58 = vpack.c.bf16 %v9552_v56, %v9551_v2  ;;  %v9543_v61 = vadd.f32 %v12372_v21, %v9542_v45  ;;  %v9642_v7 = vadd.f32 %v12378_v40, %v9641_v63  ;;  %v14642_v8 = vpack.c.bf16 %v9651_v57, %v9650_v23  ;;  %v10328_v45 = vld [vmem:[#allocation2 + $0x538] sm:$0x3] }
0x4384   : > { %v9554_v12 = vmul.f32 %v14966_v6, %v9548_v60  ;;  %v9653_v10 = vmul.f32 %v14966_v6, %v9647_v25  ;;  %v10327_v25 = vld [vmem:[#allocation2 + $0x530] sm:$0xff] }
0x4385   : > { %v9553_v55 = vmul.f32 %v14967_v20, %v9543_v61  ;;  %v9652_v62 = vmul.f32 %v14967_v20, %v9642_v7  ;;  %14624 = vmatprep.subr.msk.bf16.mxu1 %vm15327_vm14, %v14622_v58  ;;  %14643 = vmatprep.subr.bf16.mxu0 %v14642_v8  ;;  %v14675_v61 = vpack.c.bf16 %v10328_v45, %v10327_v25 }
0x4386   : > { %14627 = vmatpush3.bf16.xpose.msk.msra.mxu1 %vm15327_vm14, %v14622_v58 }
0x4387   : > { %v14628_v13 = vpack.c.bf16 %v9554_v12, %v9553_v55  ;;  %v14646_v15 = vpack.c.bf16 %v9653_v10, %v9652_v62 }
0x4389   : > { %14630 = vmatprep.subr.msk.bf16.mxu1 %vm15327_vm14, %v14628_v13 }
0x438e   : > { %14633 = vmatpush3.bf16.xpose.msk.msra.mxu1 %vm15327_vm14, %v14628_v13 }
0x438f   : > { %14652 = vmatprep.subr.msk.bf16.mxu1 %vm15242_vm8, %v14650_v49 }
0x4395   : > { %13879 = vmatmul.mubr.msk.f32.vlgmr.msra.gmra.mrb[132].mxu1 %vm782_vm11, %v9441_v30 }
0x4396   : > { %14655 = vmatpush3.bf16.msk.msra.mxu1 %vm15242_vm8, %v14650_v49  ;;  %v10237_v49 = vld [vmem:[#allocation2 + $0x520] sm:$0x3] }
0x4397   : > { %14664 = vmatprep.subr.msk.bf16.mxu1 %vm15242_vm8, %v15362_v11 }
0x4468   : > { %v13880_v41 = vpop.f32.mrb[132].mxu1 }
0x4469   : > { %v9748_v43 = vmul.f32 0.4472136, %v13880_v41  ;;  %v9738_v22 = vpop.f32.mrb[133].mxu1 }
0x446a   : > { %v9747_v1 = vmul.f32 0.4472136, %v9738_v22 }
0x446b   : > { %v9750_v53 = vadd.f32 %v14968_v24, %v9748_v43  ;;  %v12410_v43 = vld [vmem:[#allocation2 + $0x540] ss:$0 sm:$0xff] }
0x446c   : > { %v9749_v18 = vadd.f32 %v14969_v14, %v9747_v1 }
0x446d   : > { %v9754_v29 = vsel %vm5303_vm1, %v9750_v53, -inf }
0x446e   : > { %9755 = vmax.xlane.f32.xlu1 %v9754_v29  ;;  %v9751_v31 = vsel %vm5303_vm1, %v9749_v18, -inf }
0x446f   : > { %9752 = vmax.xlane.f32.xlu0 %v9751_v31 }
0x44fb   : > { %v9756_v34 = vpop.xlane.xlu1 %9755 }
0x44fc   : > { %v9758_v37 = vsub.f32 %v9750_v53, %v9756_v34  ;;  %v9753_v47 = vpop.xlane.xlu0 %9752 }
0x44fd   : > { %v9757_v42 = vsub.f32 %v9749_v18, %v9753_v47 }
0x44fe   : > { %v9761_v26 = vmul.f32 1.442695, %v9758_v37 }
0x44ff   : > { %v9759_v30 = vmul.f32 1.442695, %v9757_v42 }
0x4501   : > { %14922 = vpow2.f32 %v9759_v30 }
0x4502   : > { %14924 = vpow2.f32 %v9761_v26 }
0x450b   : > { %v14923_v21 = vpop.eup %14922 }
0x450c   : > { %v14925_v40 = vpop.eup %14924  ;;  %13889 = vmatprep.mubr.msk.f32.mxu0 %vm5303_vm1, %v14923_v21 }
0x450d   : > { %13890 = vmatmul.mubr.msk.f32.vlgmr.msra.gmra.mrb[136].mxu0 %vm5303_vm1, %v14925_v40 }
0x450e   : > { %14645 = vmatpush3.bf16.msra.mxu0 %v14642_v8 }
0x450f   : > { %14647 = vmatprep.subr.bf16.mxu0 %v14646_v15 }
0x4512   : > { %14649 = vmatpush3.bf16.msra.mxu0 %v14646_v15 }
0x4513   : > { %14658 = vmatprep.subr.msk.bf16.mxu0 %vm15242_vm8, %v15362_v11 }
0x45e0   : > { %v13891_v0 = vpop.f32.mrb[136].mxu0 }
0x45e1   : > { %14926 = vrcp.f32 %v13891_v0  ;;  %v9835_v28 = vpop.f32.mrb[137].mxu0  ;;  %v14668_v0 = vpack.c.bf16 %v10237_v49, %v10236_v17 }
0x45e2   : > { %14928 = vrcp.f32 %v9835_v28 }
0x45eb   : > { %v14927_v54 = vpop.eup %14926 }
0x45ec   : > { %v14929_v38 = vpop.eup %14928  ;;  %v9847_v4 = vmul.f32 %v14927_v54, %v14925_v40 }
0x45ed   : > { %v9846_v51 = vmul.f32 %v14929_v38, %v14923_v21 }
0x45ef   : > { %13900 = vmatprep.mubr.msk.f32.mxu0 %vm5303_vm1, %v9846_v51  ;;  %v12404_v51 = vld [vmem:[#allocation2 + $0x508] ss:$0 sm:$0xff] }
0x45f0   : > { %13901 = vmatmul.mubr.msk.f32.vlgmr.msra.gmra.mrb[138].mxu0 %vm5303_vm1, %v9847_v4 }
0x45f1   : > { %14661 = vmatpush3.bf16.msk.msra.mxu0 %vm15242_vm8, %v15362_v11 }
0x45f2   : > { %14670 = vmatprep.subr.msk.bf16.mxu0 %vm15242_vm8, %v14668_v0 }
0x46c3   : > { %v13902_v56 = vpop.f32.mrb[138].mxu0 }
0x46c4   : > { %v9920_v57 = vpop.f32.mrb[139].mxu0 }
0x46c5   : > { %13907 = vmatprep.mubr.msk.f32.mxu1 %vm782_vm11, %v9920_v57 }
0x46c6   : > { %13908 = vmatmul.mubr.msk.f32.vlgmr.msra.gmra.mrb[134].mxu1 %vm782_vm11, %v13902_v56 }
0x46c7   : > { %14667 = vmatpush3.bf16.msk.msra.mxu1 %vm15242_vm8, %v15362_v11 }
0x46c8   : > { %14674 = vmatprep.subr.bf16.mxu1 %v15077_v32 }
0x4799   : > { %v13909_v2 = vpop.f32.mrb[134].mxu1 }
0x479a   : > { %v10017_v23 = vadd.f32 %v13909_v2, %v12394_v44  ;;  %v10011_v35 = vpop.f32.mrb[135].mxu1  ;;  %v12405_v2 = vld [vmem:[#allocation2 + $0x510] ss:$0 sm:$0xff] }
0x479b   : > { %v10012_v5 = vadd.f32 %v12394_v44, %v10011_v35  ;;  %v10420_v35 = vld [vmem:[#allocation2 + $0x548] sm:$0xff] }
0x479c   : > { %v16252_v60 = vadd.f32 %v10017_v23, %v16183_v9 }
0x479d   : > { %v16255_v63 = vadd.f32 %v10012_v5, %v16185_v16  ;;  %v10421_v5 = vld [vmem:[#allocation2 + $0x550] sm:$0x3] }
0x479e   : > { %v10106_v7 = vmul.f32 %v16252_v60, %v16252_v60 }
0x479f   : > { %v10105_v58 = vmul.f32 %v16255_v63, %v16255_v63  ;;  %13914 = vmatprep.mubr.msk.f32.mxu0 %vm782_vm11, %v16255_v63 }
0x47a0   : > { %13915 = vmatmul.mubr.msk.f32.vlgmr.msra.gmra.mrb[140].mxu0 %vm782_vm11, %v16252_v60 }
0x47a1   : > { %13921 = vmatprep.mubr.msk.f32.mxu1 %vm782_vm11, %v10105_v58  ;;  %14673 = vmatpush3.bf16.msk.msra.mxu0 %vm15242_vm8, %v14668_v0  ;;  %v14679_v58 = vpack.c.bf16 %v10421_v5, %v10420_v35 }
0x47a2   : > { %13922 = vmatmul.mubr.msk.f32.vlgmr.msra.gmra.mrb[136].mxu1 %vm782_vm11, %v10106_v7  ;;  %14678 = vmatprep.subr.bf16.mxu0 %v15077_v32 }
0x47a3   : > { %14677 = vmatpush3.bf16.msk.msra.mxu1 %vm15242_vm8, %v14675_v61  ;;  %13935 = vmatprep.mubr.msk.f32.mxu1 %vm15078_vm9, %v15079_v33 }
0x47a6   : > { %13936 = vmatmul.mubr.msk.f32.vlgmr.msra.gmra.mrb[138].mxu1 %vm782_vm11, %v15769_v46 }
0x47a7   : > { %13938 = vmatprep.mubr.msk.f32.mxu1 %vm15078_vm9, %v15079_v33 }
0x47aa   : > { %13939 = vmatmul.mubr.msk.f32.gmra.mrb[140].mxu1 %vm782_vm11, %v15771_v48 }
0x47ab   : > { %13941 = vmatprep.mubr.msk.f32.mxu1 %vm15078_vm9, %v15079_v33 }
0x47ae   : > { %13942 = vmatmul.mubr.msk.f32.gmra.mrb[142].mxu1 %vm782_vm11, %v15773_v52 }
0x4873   : > { %v13916_v9 = vpop.f32.mrb[140].mxu0 }
0x4874   : > { %v10104_v16 = vmul.f32 0.1, %v13916_v9  ;;  %v10094_v8 = vpop.f32.mrb[141].mxu0 }
0x4875   : > { %v10103_v6 = vmul.f32 0.1, %v10094_v8  ;;  %v13923_v12 = vpop.f32.mrb[136].mxu1  ;;  %v12415_v8 = vld [vmem:[#allocation2 + $0x558] ss:$0 sm:$0xff] }
0x4876   : > { %v10191_v10 = vmul.f32 %v10104_v16, %v10104_v16  ;;  %v10189_v20 = vmul.f32 0.1, %v13923_v12  ;;  %v10179_v55 = vpop.f32.mrb[137].mxu1  ;;  %10201 = vperm.xlu1 %14816, %v10104_v16  }
0x4877   : > { %v10190_v62 = vmul.f32 %v10103_v6, %v10103_v6  ;;  %v10188_v13 = vmul.f32 0.1, %v10179_v55  ;;  %10196 = vperm.xlu0 %14817, %v10103_v6  }
0x4878   : > { %v10193_v15 = vsub.f32 %v10189_v20, %v10191_v10 }
0x4879   : > { %v10192_v41 = vsub.f32 %v10188_v13, %v10190_v62  ;;  %v10403_v22 = vpop.f32.mrb[138].mxu1 }
0x487a   : > { %v10207_v1 = vadd.f32 1e-05, %v10193_v15  ;;  %v13937_v24 = vpop.f32.mrb[139].mxu1  ;;  %v10404_v14 = vadd.f32 %v12410_v43, %v10403_v22 }
0x487b   : > { %v10206_v53 = vadd.f32 1e-05, %v10192_v41 }
0x487c   : > { %14930 = vrsqrt.f32 %v10207_v1  ;;  %v10417_v34 = vmul.f32 %v16071_v59, %v10404_v14 }
0x487d   : > { %14932 = vrsqrt.f32 %v10206_v53  ;;  %v10408_v18 = vpop.f32.mrb[140].mxu1 }
0x487e   : > { %v10409_v29 = vadd.f32 %v12410_v43, %v10408_v18  ;;  %v13940_v31 = vpop.f32.mrb[141].mxu1 }
0x4880   : > { %v10418_v37 = vmul.f32 %v16074_v3, %v10409_v29 }
0x4881   : > { %v10413_v47 = vpop.f32.mrb[142].mxu1 }
0x4882   : > { %v14682_v42 = vpack.c.bf16 %v10418_v37, %v10417_v34  ;;  %v10414_v26 = vadd.f32 %v12410_v43, %v10413_v47  ;;  %v13943_v30 = vpop.f32.mrb[143].mxu1 }
0x4884   : > { %v10419_v21 = vmul.f32 %v16077_v39, %v10414_v26  ;;  %14684 = vmatprep.subr.msk.bf16.mxu1 %vm15327_vm14, %v14682_v42  ;;  %v10784_v26 = vld [vmem:[#allocation2 + $0x568] sm:$0x3] }
0x4885   : > { %14687 = vmatpush3.bf16.xpose.msk.msra.mxu1 %vm15327_vm14, %v14682_v42  ;;  %v10783_v42 = vld [vmem:[#allocation2 + $0x560] sm:$0xff] }
0x4886   : > { %v14931_v40 = vpop.eup %14930  ;;  %13961 = vmatprep.subr.msk.mxu1 %vm782_vm11, %v10419_v21  ;;  %v14696_v30 = vpack.c.bf16 %v10784_v26, %v10783_v42 }
0x4887   : > { %v14933_v36 = vpop.eup %14932  ;;  %10217 = vperm.xlu1 %14816, %v14931_v40  }
0x4888   : > { %10212 = vperm.xlu0 %14817, %v14933_v36  }
0x488d   : > { %13962 = vmatpush3.xpose.msk.msra.mxu1 %vm782_vm11, %v10419_v21 }
0x48f5   : > { %v10202_v19 = vpop.permute.xlu1 %10201 }
0x48f6   : > { %v10197_v28 = vpop.permute.xlu0 %10196  ;;  %v10205_v54 = vsub.f32 %v16252_v60, %v10202_v19  ;;  %v14970_v60 = vld [vmem:[#allocation6 + $0x40] sm:$0xff] }
0x48f7   : > { %v10204_v38 = vsub.f32 %v16255_v63, %v10197_v28  ;;  %v12406_v63 = vld [vmem:[#allocation2 + $0x528] ss:$0 sm:$0xff] }
0x4906   : > { %v10218_v4 = vpop.permute.xlu1 %10217 }
0x4907   : > { %v10221_v56 = vmul.f32 %v10218_v4, %v10205_v54  ;;  %v10213_v57 = vpop.permute.xlu0 %10212  ;;  %v12429_v54 = vld [vmem:[#allocation2 + $0x570] ss:$0 sm:$0xff] }
0x4908   : > { %v10220_v44 = vmul.f32 %v10213_v57, %v10204_v38 }
0x4909   : > { %v10228_v23 = vmul.f32 %v12404_v51, %v10221_v56 }
0x490a   : > { %v10227_v25 = vmul.f32 %v12404_v51, %v10220_v44 }
0x490b   : > { %v16299_v61 = vadd.f32 %v12405_v2, %v10228_v23 }
0x490c   : > { %v16297_v45 = vadd.f32 %v12405_v2, %v10227_v25 }
0x490e   : > { %13928 = vmatprep.mubr.msk.f32.mxu0 %vm782_vm11, %v16297_v45 }
0x490f   : > { %13929 = vmatmul.mubr.msk.f32.vlgmr.msra.gmra.mrb[142].mxu0 %vm782_vm11, %v16299_v61 }
0x4910   : > { %14681 = vmatpush3.bf16.msk.msra.mxu0 %vm15242_vm8, %v14679_v58  ;;  %13948 = vmatprep.mubr.msk.f32.mxu0 %vm15078_vm9, %v15079_v33 }
0x4911   : > { %14689 = vmatprep.subr.bf16.mxu0 %v15344_v50 }
0x4913   : > { %13949 = vmatmul.mubr.msk.f32.vlgmr.msra.gmra.mrb[144].mxu0 %vm782_vm11, %v15769_v46 }
0x4914   : > { %13951 = vmatprep.mubr.msk.f32.mxu0 %vm15078_vm9, %v15079_v33  ;;  %14691 = vmatpush3.bf16.msra.mxu0 %v15344_v50 }
0x4915   : > { %13970 = vmatprep.subr.mxu0 %v14970_v60 }
0x4917   : > { %13952 = vmatmul.mubr.msk.f32.gmra.mrb[146].mxu0 %vm782_vm11, %v15771_v48 }
0x4918   : > { %13954 = vmatprep.mubr.msk.f32.mxu0 %vm15078_vm9, %v15079_v33  ;;  %13971 = vmatpush3.msra.mxu0 %v14970_v60 }
0x4919   : > { %14698 = vmatprep.subr.msk.bf16.mxu0 %vm15242_vm8, %v14696_v30 }
0x491b   : > { %13955 = vmatmul.mubr.msk.f32.gmra.mrb[148].mxu0 %vm782_vm11, %v15773_v52 }
0x49e2   : > { %v13930_v7 = vpop.f32.mrb[142].mxu0 }
0x49e3   : > { %v10318_v46 = vpop.f32.mrb[143].mxu0  ;;  %v10324_v16 = vadd.f32 %v13930_v7, %v12406_v63 }
0x49e4   : > { %v10319_v9 = vadd.f32 %v12406_v63, %v10318_v46 }
0x49e6   : > { %v10496_v6 = vpop.f32.mrb[144].mxu0  ;;  %13963 = vmatprep.mubr.msk.f32.mxu1 %vm782_vm11, %v10319_v9 }
0x49e7   : > { %v13950_v50 = vpop.f32.mrb[145].mxu0  ;;  %13964 = vmatmul.mubr.msk.f32.vlgmr.msra.gmra.mrb[144].mxu1 %vm782_vm11, %v10324_v16  ;;  %v10497_v48 = vadd.f32 %v12415_v8, %v10496_v6 }
0x49e9   : > { %v10510_v55 = vmul.f32 %v16071_v59, %v10497_v48 }
0x49ea   : > { %v10501_v12 = vpop.f32.mrb[146].mxu0 }
0x49eb   : > { %v10502_v10 = vadd.f32 %v12415_v8, %v10501_v12  ;;  %v13953_v20 = vpop.f32.mrb[147].mxu0  ;;  %v11090_v12 = vld [vmem:[#allocation2 + $0x588] sm:$0xff] }
0x49ed   : > { %v10511_v52 = vmul.f32 %v16074_v3, %v10502_v10  ;;  %v11091_v10 = vld [vmem:[#allocation2 + $0x590] sm:$0x3] }
0x49ee   : > { %v10506_v62 = vpop.f32.mrb[148].mxu0  ;;  %v14714_v20 = vpack.c.bf16 %v11091_v10, %v11090_v12 }
0x49ef   : > { %v10507_v13 = vadd.f32 %v12415_v8, %v10506_v62  ;;  %v13956_v15 = vpop.f32.mrb[149].mxu0  ;;  %v14692_v41 = vpack.c.bf16 %v10511_v52, %v10510_v55 }
0x49f0   : > { %v12439_v15 = vld [vmem:[#allocation2 + $0x578] ss:$0 sm:$0xff] }
0x49f1   : > { %v10512_v43 = vmul.f32 %v16077_v39, %v10507_v13  ;;  %14693 = vmatprep.subr.bf16.mxu1 %v14692_v41 }
0x49f2   : > { %14695 = vmatpush3.bf16.msra.mxu1 %v14692_v41 }
0x49f3   : > { %13979 = vmatprep.subr.mxu1 %v10512_v43 }
0x49f6   : > { %13980 = vmatpush3.msra.mxu1 %v10512_v43 }
0x49f7   : > { %14704 = vmatprep.subr.msk.bf16.mxu1 %vm15242_vm8, %v15362_v11 }
0x4aba   : > { %v13965_v22 = vpop.f32.mrb[144].mxu1 }
0x4abb   : > { %v10604_v1 = vmul.f32 0.4472136, %v13965_v22  ;;  %v10594_v24 = vpop.f32.mrb[145].mxu1 }
0x4abc   : > { %v10603_v59 = vmul.f32 0.4472136, %v10594_v24  ;;  %v12440_v24 = vld [vmem:[#allocation2 + $0x580] ss:$0 sm:$0xff] }
0x4abd   : > { %v10608_v3 = vsel %vm1154_vm15, %v10604_v1, -inf }
0x4abe   : > { %10609 = vmax.xlane.f32.xlu1 %v10608_v3  ;;  %v10605_v53 = vsel %vm1154_vm15, %v10603_v59, -inf }
0x4abf   : > { %10606 = vmax.xlane.f32.xlu0 %v10605_v53 }
0x4b4b   : > { %v10610_v14 = vpop.xlane.xlu1 %10609 }
0x4b4c   : > { %v10612_v39 = vsub.f32 %v10604_v1, %v10610_v14  ;;  %v10607_v18 = vpop.xlane.xlu0 %10606 }
0x4b4d   : > { %v10611_v29 = vsub.f32 %v10603_v59, %v10607_v18  ;;  %v11184_v18 = vld [vmem:[#allocation2 + $0x5a8] sm:$0xff] }
0x4b4e   : > { %v10615_v31 = vmul.f32 1.442695, %v10612_v39  ;;  %v11183_v39 = vld [vmem:[#allocation2 + $0x5a0] sm:$0xff] }
0x4b4f   : > { %v10613_v34 = vmul.f32 1.442695, %v10611_v29  ;;  %v14720_v29 = vpack.c.bf16 %v11184_v18, %v11183_v39  ;;  %v11646_v18 = vld [vmem:[#allocation4 + $0x48] sm:$0xff] }
0x4b51   : > { %14934 = vpow2.f32 %v10613_v34 }
0x4b52   : > { %14936 = vpow2.f32 %v10615_v31  ;;  %v12441_v31 = vld [vmem:[#allocation2 + $0x598] ss:$0 sm:$0xff] }
0x4b5b   : > { %v14935_v37 = vpop.eup %14934 }
0x4b5c   : > { %v14937_v47 = vpop.eup %14936  ;;  %13972 = vmatprep.mubr.msk.f32.mxu0 %vm1154_vm15, %v14935_v37 }
0x4b5d   : > { %13973 = vmatmul.mubr.msk.f32.vlgmr.msra.gmra.mrb[150].mxu0 %vm1154_vm15, %v14937_v47 }
0x4b5e   : > { %14701 = vmatpush3.bf16.msk.msra.mxu0 %vm15242_vm8, %v14696_v30 }
0x4b5f   : > { %14710 = vmatprep.subr.msk.bf16.mxu0 %vm15242_vm8, %v15362_v11 }
0x4c30   : > { %v13974_v21 = vpop.f32.mrb[150].mxu0 }
0x4c31   : > { %14938 = vrcp.f32 %v13974_v21  ;;  %v10689_v40 = vpop.f32.mrb[151].mxu0  ;;  %v12445_v21 = vld [vmem:[#allocation2 + $0x5b0] ss:$0 sm:$0xff] }
0x4c32   : > { %14940 = vrcp.f32 %v10689_v40 }
0x4c3b   : > { %v14939_v36 = vpop.eup %14938 }
0x4c3c   : > { %v14941_v17 = vpop.eup %14940  ;;  %v10701_v0 = vmul.f32 %v14939_v36, %v14937_v47 }
0x4c3d   : > { %v10700_v49 = vmul.f32 %v14941_v17, %v14935_v37 }
0x4c3f   : > { %13981 = vmatprep.mubr.msk.f32.mxu1 %vm1154_vm15, %v10700_v49 }
0x4c40   : > { %13982 = vmatmul.mubr.msk.f32.vlgmr.msra.gmra.mrb[146].mxu1 %vm1154_vm15, %v10701_v0 }
0x4c41   : > { %14707 = vmatpush3.bf16.msk.msra.mxu1 %vm15242_vm8, %v15362_v11 }
0x4c42   : > { %14716 = vmatprep.subr.msk.bf16.mxu1 %vm15242_vm8, %v14714_v20 }
0x4d13   : > { %v13983_v19 = vpop.f32.mrb[146].mxu1 }
0x4d14   : > { %v10774_v28 = vpop.f32.mrb[147].mxu1 }
0x4d15   : > { %13988 = vmatprep.mubr.msk.f32.mxu0 %vm782_vm11, %v10774_v28 }
0x4d16   : > { %13989 = vmatmul.mubr.msk.f32.vlgmr.msra.gmra.mrb[152].mxu0 %vm782_vm11, %v13983_v19 }
0x4d17   : > { %14713 = vmatpush3.bf16.msk.msra.mxu0 %vm15242_vm8, %v15362_v11 }
0x4d18   : > { %14721 = vmatprep.subr.bf16.mxu0 %v14720_v29 }
0x4de9   : > { %v13990_v38 = vpop.f32.mrb[152].mxu0 }
0x4dea   : > { %v10871_v51 = vadd.f32 %v13990_v38, %v12429_v54  ;;  %v10865_v4 = vpop.f32.mrb[153].mxu0 }
0x4deb   : > { %v10866_v56 = vadd.f32 %v12429_v54, %v10865_v4 }
0x4dec   : > { %v10875_v57 = vadd.f32 %v10871_v51, %v16299_v61 }
0x4ded   : > { %v10874_v44 = vadd.f32 %v10866_v56, %v16297_v45 }
0x4dee   : > { %v10960_v23 = vmul.f32 %v10875_v57, %v10875_v57 }
0x4def   : > { %v10959_v2 = vmul.f32 %v10874_v44, %v10874_v44  ;;  %13995 = vmatprep.mubr.msk.f32.mxu1 %vm782_vm11, %v10874_v44 }
0x4df0   : > { %13996 = vmatmul.mubr.msk.f32.vlgmr.msra.gmra.mrb[148].mxu1 %vm782_vm11, %v10875_v57 }
0x4df1   : > { %14002 = vmatprep.mubr.msk.f32.mxu0 %vm782_vm11, %v10959_v2  ;;  %14719 = vmatpush3.bf16.msk.msra.mxu1 %vm15242_vm8, %v14714_v20  ;;  %v12455_v20 = vld [vmem:[#allocation2 + $0x5c0] ss:$0 sm:$0xff] }
0x4df2   : > { %14003 = vmatmul.mubr.msk.f32.vlgmr.msra.gmra.mrb[154].mxu0 %vm782_vm11, %v10960_v23  ;;  %14726 = vmatprep.subr.msk.bf16.mxu1 %vm15242_vm8, %v15362_v11 }
0x4df3   : > { %14723 = vmatpush3.bf16.msra.mxu0 %v14720_v29  ;;  %v11647_v29 = vld [vmem:[#allocation4 + $0x50] sm:$0xff] }
0x4df4   : > { %14732 = vmatprep.subr.msk.bf16.mxu0 %vm15242_vm8, %v15362_v11 }
0x4ec3   : > { %v13997_v35 = vpop.f32.mrb[148].mxu1 }
0x4ec4   : > { %v10958_v5 = vmul.f32 0.1, %v13997_v35  ;;  %v10948_v25 = vpop.f32.mrb[149].mxu1 }
0x4ec5   : > { %v10957_v58 = vmul.f32 0.1, %v10948_v25  ;;  %v14004_v60 = vpop.f32.mrb[154].mxu0 }
0x4ec6   : > { %v11045_v63 = vmul.f32 %v10958_v5, %v10958_v5  ;;  %v11043_v7 = vmul.f32 0.1, %v14004_v60  ;;  %v11033_v61 = vpop.f32.mrb[155].mxu0  ;;  %11055 = vperm.xlu1 %14816, %v10958_v5  }
0x4ec7   : > { %v11044_v45 = vmul.f32 %v10957_v58, %v10957_v58  ;;  %v11042_v46 = vmul.f32 0.1, %v11033_v61  ;;  %11050 = vperm.xlu0 %14817, %v10957_v58   ;;  %v11560_v61 = vld [vmem:[#allocation4] sm:$0xff] }
0x4ec8   : > { %v11047_v9 = vsub.f32 %v11043_v7, %v11045_v63 }
0x4ec9   : > { %v11046_v16 = vsub.f32 %v11042_v46, %v11044_v45  ;;  %v11561_v45 = vld [vmem:[#allocation4 + $0x8] sm:$0x3] }
0x4eca   : > { %v11061_v8 = vadd.f32 1e-05, %v11047_v9  ;;  %v14740_v46 = vpack.c.bf16 %v11561_v45, %v11560_v61 }
0x4ecb   : > { %v11060_v6 = vadd.f32 1e-05, %v11046_v16 }
0x4ecc   : > { %14942 = vrsqrt.f32 %v11061_v8 }
0x4ecd   : > { %14944 = vrsqrt.f32 %v11060_v6 }
0x4ed6   : > { %v14943_v50 = vpop.eup %14942 }
0x4ed7   : > { %v14945_v48 = vpop.eup %14944  ;;  %11071 = vperm.xlu1 %14816, %v14943_v50   ;;  %v12454_v50 = vld [vmem:[#allocation2 + $0x5b8] ss:$0 sm:$0xff] }
0x4ed8   : > { %11066 = vperm.xlu0 %14817, %v14945_v48  }
0x4f45   : > { %v11056_v55 = vpop.permute.xlu1 %11055 }
0x4f46   : > { %v11051_v52 = vpop.permute.xlu0 %11050  ;;  %v11059_v62 = vsub.f32 %v10875_v57, %v11056_v55 }
0x4f47   : > { %v11058_v13 = vsub.f32 %v10874_v44, %v11051_v52 }
0x4f56   : > { %v11072_v41 = vpop.permute.xlu1 %11071 }
0x4f57   : > { %v11075_v43 = vmul.f32 %v11072_v41, %v11059_v62  ;;  %v11067_v22 = vpop.permute.xlu0 %11066 }
0x4f58   : > { %v11074_v1 = vmul.f32 %v11067_v22, %v11058_v13  ;;  %v11641_v22 = vld [vmem:[#allocation4 + $0x20] sm:$0xff] }
0x4f59   : > { %v11082_v59 = vmul.f32 %v12439_v15, %v11075_v43  ;;  %v11640_v43 = vld [vmem:[#allocation4 + $0x18] sm:$0xff] }
0x4f5a   : > { %v11081_v3 = vmul.f32 %v12439_v15, %v11074_v1  ;;  %v11642_v1 = vld [vmem:[#allocation4 + $0x28] sm:$0xff] }
0x4f5b   : > { %v11089_v14 = vadd.f32 %v12440_v24, %v11082_v59  ;;  %v11643_v59 = vld [vmem:[#allocation4 + $0x30] sm:$0xff] }
0x4f5c   : > { %v11088_v53 = vadd.f32 %v12440_v24, %v11081_v3  ;;  %v14744_v24 = vpack.c.bf16 %v11641_v22, %v11640_v43  ;;  %v14747_v3 = vpack.c.bf16 %v11643_v59, %v11642_v1 }
0x4f5e   : > { %14009 = vmatprep.mubr.msk.f32.mxu1 %vm782_vm11, %v11088_v53 }
0x4f5f   : > { %14010 = vmatmul.mubr.msk.f32.vlgmr.msra.gmra.mrb[150].mxu1 %vm782_vm11, %v11089_v14 }
0x4f60   : > { %14729 = vmatpush3.bf16.msk.msra.mxu1 %vm15242_vm8, %v15362_v11 }
0x4f61   : > { %14736 = vmatprep.subr.bf16.mxu1 %v15077_v32 }
0x5032   : > { %v14011_v34 = vpop.f32.mrb[150].mxu1 }
0x5033   : > { %v11178_v37 = vadd.f32 %v14011_v34, %v12441_v31  ;;  %v11172_v47 = vpop.f32.mrb[151].mxu1 }
0x5034   : > { %v11173_v42 = vadd.f32 %v12441_v31, %v11172_v47  ;;  %v14753_v31 = vpack.c.bf16 %v11647_v29, %v11646_v18  ;;  %v11648_v47 = vld [vmem:[#allocation4 + $0x58] sm:$0xff] }
0x5035   : > { %v11182_v30 = vmax.f32 %v11178_v37, 0.0 }
0x5036   : > { %v11181_v26 = vmax.f32 %v11173_v42, 0.0  ;;  %v11649_v42 = vld [vmem:[#allocation4 + $0x60] sm:$0xff] }
0x5038   : > { %14016 = vmatprep.mubr.msk.f32.mxu0 %vm414_vm6, %v11181_v26  ;;  %v14756_v26 = vpack.c.bf16 %v11649_v42, %v11648_v47 }
0x5039   : > { %14017 = vmatmul.mubr.msk.f32.vlgmr.msra.gmra.mrb[156].mxu0 %vm414_vm6, %v11182_v30  ;;  %v11726_v30 = vld [vmem:[#allocation4 + $0x70] sm:$0xff] }
0x503a   : > { %14735 = vmatpush3.bf16.msk.msra.mxu0 %vm15242_vm8, %v15362_v11 }
0x503b   : > { %14739 = vmatprep.subr.bf16.mxu0 %v15077_v32 }
0x510c   : > { %v14018_v40 = vpop.f32.mrb[156].mxu0 }
0x510d   : > { %v11268_v36 = vadd.f32 %v14018_v40, %v12445_v21  ;;  %v11262_v17 = vpop.f32.mrb[157].mxu0  ;;  %v11728_v40 = vld [vmem:[#allocation4 + $0x80] sm:$0xff] }
0x510e   : > { %v11263_v49 = vadd.f32 %v12445_v21, %v11262_v17  ;;  %v11727_v21 = vld [vmem:[#allocation4 + $0x78] sm:$0xff]  ;;  %v11729_v17 = vld [vmem:[#allocation4 + $0x88] sm:$0xff] }
0x510f   : > { %v11272_v0 = vadd.f32 %v11268_v36, %v11089_v14  ;;  %v11645_v14 = vld [vmem:[#allocation4 + $0x40] sm:$0xff]  ;;  %v14759_v36 = vpack.c.bf16 %v11727_v21, %v11726_v30 }
0x5110   : > { %v11271_v19 = vadd.f32 %v11263_v49, %v11088_v53  ;;  %v11644_v53 = vld [vmem:[#allocation4 + $0x38] sm:$0xff]  ;;  %v14762_v49 = vpack.c.bf16 %v11729_v17, %v11728_v40 }
0x5111   : > { %v11357_v54 = vmul.f32 %v11272_v0, %v11272_v0  ;;  %v14750_v39 = vpack.c.bf16 %v11645_v14, %v11644_v53 }
0x5112   : > { %v11356_v28 = vmul.f32 %v11271_v19, %v11271_v19  ;;  %14023 = vmatprep.mubr.msk.f32.mxu1 %vm782_vm11, %v11271_v19 }
0x5113   : > { %14024 = vmatmul.mubr.msk.f32.vlgmr.msra.gmra.mrb[152].mxu1 %vm782_vm11, %v11272_v0 }
0x5114   : > { %14030 = vmatprep.mubr.msk.f32.mxu0 %vm782_vm11, %v11356_v28  ;;  %14037 = vmatprep.mubr.msk.f32.mxu1 %vm15078_vm9, %v15079_v33 }
0x5115   : > { %14031 = vmatmul.mubr.msk.f32.vlgmr.msra.gmra.mrb[158].mxu0 %vm782_vm11, %v11357_v54 }
0x5116   : > { %14044 = vmatprep.mubr.msk.f32.mxu0 %vm15078_vm9, %v15079_v33  ;;  %14742 = vmatpush3.bf16.msk.msra.mxu0 %vm15242_vm8, %v14740_v46 }
0x5117   : > { %14758 = vmatprep.subr.bf16.mxu0 %v15077_v32 }
0x51e6   : > { %v14025_v11 = vpop.f32.mrb[152].mxu1 }
0x51e7   : > { %v11355_v38 = vmul.f32 0.1, %v14025_v11  ;;  %v11345_v51 = vpop.f32.mrb[153].mxu1 }
0x51e8   : > { %v11354_v4 = vmul.f32 0.1, %v11345_v51  ;;  %v14032_v56 = vpop.f32.mrb[158].mxu0  ;;  %v11731_v51 = vld [vmem:[#allocation4 + $0x98] sm:$0xff] }
0x51e9   : > { %v11442_v57 = vmul.f32 %v11355_v38, %v11355_v38  ;;  %v11440_v44 = vmul.f32 0.1, %v14032_v56  ;;  %v11430_v2 = vpop.f32.mrb[159].mxu0  ;;  %11452 = vperm.xlu1 %14816, %v11355_v38   ;;  %v11730_v38 = vld [vmem:[#allocation4 + $0x90] sm:$0xff]  ;;  %v11650_v56 = vld [vmem:[#allocation4 + $0x68] sm:$0x1] }
0x51ea   : > { %v11441_v23 = vmul.f32 %v11354_v4, %v11354_v4  ;;  %v11439_v35 = vmul.f32 0.1, %v11430_v2  ;;  %11447 = vperm.xlu0 %14817, %v11354_v4   ;;  %v14765_v4 = vpack.c.bf16 %v11731_v51, %v11730_v38 }
0x51eb   : > { %v11444_v5 = vsub.f32 %v11440_v44, %v11442_v57 }
0x51ec   : > { %v11443_v25 = vsub.f32 %v11439_v35, %v11441_v23  ;;  %v11812_v35 = vld [vmem:[#allocation4 + $0xa8] sm:$0xff] }
0x51ed   : > { %v11458_v58 = vadd.f32 1e-05, %v11444_v5  ;;  %v11813_v5 = vld [vmem:[#allocation4 + $0xb0] sm:$0xff] }
0x51ee   : > { %v11457_v60 = vadd.f32 1e-05, %v11443_v25  ;;  %v14768_v25 = vpack.c.bf16 %v11813_v5, %v11812_v35 }
0x51ef   : > { %14946 = vrsqrt.f32 %v11458_v58  ;;  %v11814_v58 = vld [vmem:[#allocation4 + $0xb8] sm:$0x1f] }
0x51f0   : > { %14948 = vrsqrt.f32 %v11457_v60  ;;  %v11732_v60 = vld [vmem:[#allocation4 + $0xa0] sm:$0x1] }
0x51f9   : > { %v14947_v63 = vpop.eup %14946 }
0x51fa   : > { %v14949_v7 = vpop.eup %14948  ;;  %11468 = vperm.xlu1 %14816, %v14947_v63  }
0x51fb   : > { %11463 = vperm.xlu0 %14817, %v14949_v7  }
0x5268   : > { %v11453_v9 = vpop.permute.xlu1 %11452 }
0x5269   : > { %v11448_v16 = vpop.permute.xlu0 %11447  ;;  %v11456_v8 = vsub.f32 %v11272_v0, %v11453_v9  ;;  %v11562_v0 = vld [vmem:[#allocation4 + $0x10] sm:$0x1] }
0x526a   : > { %v11455_v6 = vsub.f32 %v11271_v19, %v11448_v16  ;;  %v11815_v16 = vld [vmem:[#allocation4 + $0xc0] sm:$0x1] }
0x5279   : > { %v11469_v48 = vpop.permute.xlu1 %11468 }
0x527a   : > { %v11472_v12 = vmul.f32 %v11469_v48, %v11456_v8  ;;  %v11464_v10 = vpop.permute.xlu0 %11463 }
0x527b   : > { %v11471_v55 = vmul.f32 %v11464_v10, %v11455_v6 }
0x527c   : > { %v11479_v52 = vmul.f32 %v12454_v50, %v11472_v12 }
0x527d   : > { %v11478_v62 = vmul.f32 %v12454_v50, %v11471_v55 }
0x527e   : > { %v11486_v13 = vadd.f32 %v12455_v20, %v11479_v52 }
0x527f   : > { %v11485_v15 = vadd.f32 %v12455_v20, %v11478_v62 }
0x5281   : > { %v14737_v41 = vpack.c.bf16 %v11486_v13, %v11485_v15 }
0x5283   : > { %14738 = vmatpush3.bf16.msra.mxu1 %v14737_v41 }
0x5284   : > { %14743 = vmatprep.subr.bf16.mxu1 %v15077_v32 }
0x5286   : > { %14038 = vmatmul.mubr.msk.f32.vlgmr.msra.gmra.mrb[154].mxu1 %vm414_vm6, %v310_v27  ;;  %vm11816_vm6 = vcmask 171008  }
0x5287   : > { %14067 = vmatprep.mubr.msk.f32.mxu1 %vm15078_vm9, %v15079_v33  ;;  %14745 = vmatpush3.bf16.msra.mxu1 %v14744_v24 }
0x5288   : > { %14746 = vmatprep.subr.bf16.mxu1 %v15077_v32 }
0x528b   : > { %14748 = vmatpush3.bf16.msra.mxu1 %v14747_v3 }
0x528c   : > { %14749 = vmatprep.subr.bf16.mxu1 %v15077_v32 }
0x528f   : > { %14751 = vmatpush3.bf16.msra.mxu1 %v14750_v39 }
0x5290   : > { %14752 = vmatprep.subr.bf16.mxu1 %v15077_v32 }
0x5293   : > { %14754 = vmatpush3.bf16.msra.mxu1 %v14753_v31 }
0x5294   : > { %14755 = vmatprep.subr.bf16.mxu1 %v15077_v32 }
0x5297   : > { %14757 = vmatpush3.bf16.msra.mxu1 %v14756_v26 }
0x5359   : > { %v11556_v34 = vpop.f32.mrb[154].mxu1 }
0x535a   : > { %14045 = vmatmul.mubr.msk.f32.vlgmr.msra.gmra.mrb[160].mxu0 %vm782_vm11, %v11556_v34  ;;  %v14039_v37 = vpop.f32.mrb[155].mxu1 }
0x535b   : > { %14082 = vmatprep.mubr.msk.f32.mxu0 %vm15078_vm9, %v15079_v33  ;;  %14760 = vmatpush3.bf16.msra.mxu0 %v14759_v36 }
0x535c   : > { %14761 = vmatprep.subr.bf16.mxu0 %v15077_v32 }
0x535f   : > { %14763 = vmatpush3.bf16.msra.mxu0 %v14762_v49 }
0x5360   : > { %14764 = vmatprep.subr.bf16.mxu0 %v15077_v32 }
0x5363   : > { %14766 = vmatpush3.bf16.msra.mxu0 %v14765_v4 }
0x5364   : > { %14767 = vmatprep.subr.bf16.mxu0 %v15077_v32  ;;  %v11807_v32 = vlaneseq }
0x5366   : > { %v11808_v63 = vand.u32 127, %v11807_v32 }
0x5368   : > { %vm11809_vm5 = vcmp.lt.s32.totalorder %v11808_v63, 16 }
0x542d   : > { %v11635_v19 = vpop.f32.mrb[160].mxu0 }
0x542e   : > { %v11636_v28 = vadd.f32 %v11635_v19, %v11562_v0  ;;  %v14046_v54 = vpop.f32.mrb[161].mxu0 }
0x5430   : > { %v11639_v11 = vmax.f32 %v11636_v28, 0.0 }
0x5432   : > { %14068 = vmatmul.mubr.msk.f32.vlgmr.msra.gmra.mrb[156].mxu1 %vm11651_vm2, %v11639_v11 }
0x5505   : > { %v11721_v57 = vpop.f32.mrb[156].mxu1 }
0x5506   : > { %v11722_v44 = vadd.f32 %v11721_v57, %v11650_v56  ;;  %v14069_v2 = vpop.f32.mrb[157].mxu1 }
0x5508   : > { %v11725_v23 = vmax.f32 %v11722_v44, 0.0 }
0x550a   : > { %14083 = vmatmul.mubr.msk.f32.vlgmr.msra.gmra.mrb[162].mxu0 %vm11733_vm3, %v11725_v23 }
0x550b   : > { %14091 = vmatprep.mubr.msk.f32.mxu0 %vm15078_vm9, %v15079_v33  ;;  %14769 = vmatpush3.bf16.msra.mxu0 %v14768_v25 }
0x550c   : > { %14089 = vmatprep.subr.mxu0 %v15079_v33 }
0x550f   : > { %14090 = vmatpush3.msk.msra.mxu0 %vm11820_vm4, %v11814_v58 }
0x55dd   : > { %v11803_v7 = vpop.f32.mrb[162].mxu0 }
0x55de   : > { %v11804_v61 = vadd.f32 %v11803_v7, %v11732_v60  ;;  %v14084_v45 = vpop.f32.mrb[163].mxu0 }
0x55e0   : > { %v11810_v46 = vmax.f32 %v11804_v61, 0.0 }
0x55e2   : > { %v11811_v9 = vsel %vm11809_vm5, %v11810_v46, %v11804_v61 }
0x55e3   : > { %14092 = vmatmul.mubr.msk.f32.vlgmr.msra.gmra.mrb[164].mxu0 %vm11816_vm6, %v11811_v9 }
0x56b6   : > { %v11890_v33 = vpop.f32.mrb[164].mxu0 }
0x56b7   : > { %v11891_v8 = vadd.f32 %v11890_v33, %v11815_v16  ;;  %v14093_v6 = vpop.f32.mrb[165].mxu0 }
0x56b9   : > { %11894 = vst [vmem:[%s284_s29] sm:$0x1] %v11891_v8 }
0x56ba PF: > { %s17_s18 = sadd.s32 1, %s15069_s18  }
0x56bb   : > { %p14_p5 = scmp.ge.s32.totalorder %s17_s18, 4  }
0x56bd   :  { %16 = sbr.rel (!%p14_p5) target bundleno = 2 (0x2), region = 86 }
0x56c4   :  { %11912 = vsyncpa [#allocation3], 1 }
0x56c5   :  { %11914 = vsyncpa [#allocation3 + $0x1], 1 }
0x56c6   :  { %11915 = vsyncpa [#allocation5], 1 }

</bundles_post_ra>
